<compile_context>
chip_gen: v7x
topology: tpu7x:2x2x1
jax: 0.10.0
libtpu: 0.0.40
codegen_flags: <defaults>
</compile_context>

<pallas_src>
import collections
import functools

import jax
import jax.numpy as jnp
from jax import lax
from jax.experimental import pallas as pl
from jax.experimental.pallas import tpu as pltpu


ConvCfg = collections.namedtuple("ConvCfg", ["k1", "s1", "c1", "k2", "s2", "c2"])

# <= default scoped VMEM on v6e/v7x, comfortably below v7x's 64 MiB physical VMEM.
_VMEM_LIMIT_BYTES = 32 * 1024 * 1024


def _round_up(x, m):
    return -(-x // m) * m


# ---------------------------------------------------------------------------
# Kernel 1: conv1 -> conv2 -> flatten -> LSTM input-gate projection (fused)
# ---------------------------------------------------------------------------
def _feature_kernel(p_ref, w1_ref, b1_ref, w2_ref, b2_ref, wih_ref, bg_ref,
                    o_ref, y1_ref, *, k2, s2, ho1p, wo1p, ho2, wo2):
    """conv1+ReLU -> conv2+ReLU -> flatten(h,w,c) -> x @ W_ih^T + (b_ih + b_hh).

    p_ref  : (TN, ho1p*wo1p, k1*k1*Cin)  conv1 im2col patches, lane order (ki,kj,ci)
    w1_ref : (k1*k1*Cin, C1)
    w2_ref : (k2*k2*C1,  C2)             rows in (ki, kj, ci) order
    wih_ref: (C2*ho2*wo2, 4H)            rows permuted to the kernel's (h,w,c) order
    bg_ref : (1, 4H)                     b_ih + b_hh
    o_ref  : (TN, 4H)                    pre-projected LSTM gate inputs (lane-dense)
    y1_ref : (TN, ho1p, wo1p, C1)        VMEM scratch for the conv1 activation
    """
    tn = p_ref.shape[0]
    kk_cin = p_ref.shape[-1]
    c1 = w1_ref.shape[-1]

    # conv1: one big MXU matmul over all tile rows / spatial positions.  The
    # reshapes only merge/split tile-aligned leading dims (ho1p*wo1p and wo1p
    # are multiples of 8) -> layout no-ops.
    patches = p_ref[...].reshape(tn * ho1p * wo1p, kk_cin)
    y1 = jnp.dot(patches, w1_ref[...], preferred_element_type=jnp.float32) + b1_ref[...]
    y1_ref[...] = jnp.maximum(y1, 0.0).reshape(tn, ho1p, wo1p, c1)

    # conv2 + flatten + x-projection; the conv1 activation stays in VMEM.
    # Padded conv1 positions (beyond the true ho1/wo1 grid) are never read here.
    feats = []
    for oh in range(ho2):
        for ow in range(wo2):
            win = jnp.concatenate(
                [y1_ref[:, s2 * oh + ki, s2 * ow + kj, :]
                 for ki in range(k2) for kj in range(k2)], axis=-1)   # (TN, k2*k2*C1)
            f = jnp.dot(win, w2_ref[...], preferred_element_type=jnp.float32) + b2_ref[...]
            feats.append(jnp.maximum(f, 0.0))                         # (TN, C2)
    feat = jnp.concatenate(feats, axis=-1)                            # (TN, ho2*wo2*C2)

    o_ref[...] = (
        jnp.dot(feat, wih_ref[...], preferred_element_type=jnp.float32) + bg_ref[...])


def _pallas_features(p, w1, b1, w2, b2, wih, bg, *, k2, s2, ho1p, wo1p, ho2, wo2,
                     tile_n):
    n, grid_hw, kk_cin = p.shape
    c1 = w1.shape[-1]
    k2c, c2 = w2.shape
    f_dim, g_dim = wih.shape
    kernel = functools.partial(
        _feature_kernel, k2=k2, s2=s2, ho1p=ho1p, wo1p=wo1p, ho2=ho2, wo2=wo2)
    return pl.pallas_call(
        kernel,
        out_shape=jax.ShapeDtypeStruct((n, g_dim), jnp.float32),
        grid=(n // tile_n,),
        in_specs=[
            pl.BlockSpec((tile_n, grid_hw, kk_cin), lambda i: (i, 0, 0)),
            pl.BlockSpec((kk_cin, c1), lambda i: (0, 0)),
            pl.BlockSpec((1, c1), lambda i: (0, 0)),
            pl.BlockSpec((k2c, c2), lambda i: (0, 0)),
            pl.BlockSpec((1, c2), lambda i: (0, 0)),
            pl.BlockSpec((f_dim, g_dim), lambda i: (0, 0)),
            pl.BlockSpec((1, g_dim), lambda i: (0, 0)),
        ],
        out_specs=pl.BlockSpec((tile_n, g_dim), lambda i: (i, 0)),
        scratch_shapes=[pltpu.VMEM((tile_n, ho1p, wo1p, c1), jnp.float32)],
        compiler_params=pltpu.CompilerParams(
            dimension_semantics=("parallel",),        # megacore split on v7x
            vmem_limit_bytes=_VMEM_LIMIT_BYTES),
    )(p, w1, b1.reshape(1, c1), w2, b2.reshape(1, c2), wih, bg.reshape(1, g_dim))


# ---------------------------------------------------------------------------
# Kernel 2: LSTM (pre-projected inputs) + fused critic head
# ---------------------------------------------------------------------------
def _lstm_head_kernel(xp_ref, whh_ref, wv_ref, bv_ref, o_ref, *, hidden):
    """Single-layer LSTM with pre-projected inputs, critic head fused per step.

    xp_ref : (T, B, 4H)  x_t @ W_ih^T + b_ih + b_hh, time-major, gate order i,f,g,o
    whh_ref: (H, 4H)     recurrent weights (PyTorch W_hh transposed)
    wv_ref : (1, H)      critic head weight row
    bv_ref : (1, 1)      critic head bias
    o_ref  : (T, B, 1)   per-step value estimates
    """
    t_len, batch, _ = xp_ref.shape
    whh = whh_ref[...]            # hoisted out of the time loop
    wv = wv_ref[...]
    bv = bv_ref[...]

    h = jnp.zeros((batch, hidden), jnp.float32)
    c = jnp.zeros((batch, hidden), jnp.float32)
    for t in range(t_len):        # short static trip count: fully unrolled
        gates = xp_ref[t] + jnp.dot(h, whh, preferred_element_type=jnp.float32)
        i_g = jax.nn.sigmoid(gates[:, 0 * hidden:1 * hidden])
        f_g = jax.nn.sigmoid(gates[:, 1 * hidden:2 * hidden])
        g_g = jnp.tanh(gates[:, 2 * hidden:3 * hidden])
        o_g = jax.nn.sigmoid(gates[:, 3 * hidden:4 * hidden])
        c = f_g * c + i_g * g_g
        h = o_g * jnp.tanh(c)
        # Fused critic head: VPU multiply + lane reduce; the (T, B, H) hidden
        # sequence never leaves the kernel.
        o_ref[t] = jnp.sum(h * wv, axis=-1, keepdims=True) + bv


def _pallas_lstm_head(xp_tbg, w_hh_t, w_v, b_v, hidden):
    t_len, batch, g_dim = xp_tbg.shape
    kernel = functools.partial(_lstm_head_kernel, hidden=hidden)
    return pl.pallas_call(
        kernel,
        out_shape=jax.ShapeDtypeStruct((t_len, batch, 1), jnp.float32),
        grid=(1,),
        in_specs=[
            pl.BlockSpec((t_len, batch, g_dim), lambda i: (0, 0, 0)),
            pl.BlockSpec((hidden, g_dim), lambda i: (0, 0)),
            pl.BlockSpec((1, hidden), lambda i: (0, 0)),
            pl.BlockSpec((1, 1), lambda i: (0, 0)),
        ],
        out_specs=pl.BlockSpec((t_len, batch, 1), lambda i: (0, 0, 0)),
        compiler_params=pltpu.CompilerParams(
            dimension_semantics=("arbitrary",),
            vmem_limit_bytes=_VMEM_LIMIT_BYTES),
    )(xp_tbg, w_hh_t, w_v.reshape(1, hidden), b_v.reshape(1, 1))


# ---------------------------------------------------------------------------
# CNNLSTMCritic forward
# ---------------------------------------------------------------------------
def cnn_lstm_critic_forward(obs, params, *, cfg, hidden, tile_n=8):
    """obs: (B, T, C, H, W) float32 -> value estimates (B, T) float32."""
    assert tile_n % 8 == 0, "tile_n must be a multiple of 8 (sublane tiling)"
    B, T, C, H, W = obs.shape
    n = B * T
    k1, s1, k2, s2 = cfg.k1, cfg.s1, cfg.k2, cfg.s2

    ho1 = (H - k1) // s1 + 1
    wo1 = (W - k1) // s1 + 1
    ho2 = (ho1 - k2) // s2 + 1
    wo2 = (wo1 - k2) // s2 + 1
    # Pad the conv1 output grid to a multiple of 8 so every in-kernel reshape only
    # merges/splits tile-aligned dims; padded positions are never consumed.
    ho1p = _round_up(ho1, 8)
    wo1p = _round_up(wo1, 8)

    # conv1 im2col in the wrapper: pure gather / layout plumbing (zero FLOPs),
    # producing one lane-dense, contiguous patch slab per frame so the kernel's
    # DMA is dense and conv1 becomes a single MXU matmul per tile.
    x = obs.reshape(n, C, H, W).transpose(0, 2, 3, 1)                 # NHWC
    taps = []
    for ki in range(k1):
        for kj in range(k1):
            taps.append(x[:, ki:ki + s1 * (ho1 - 1) + 1:s1,
                          kj:kj + s1 * (wo1 - 1) + 1:s1, :])          # (n, ho1, wo1, C)
    p = jnp.concatenate(taps, axis=-1)                                # (n, ho1, wo1, k1*k1*C)
    p = jnp.pad(p, ((0, 0), (0, ho1p - ho1), (0, wo1p - wo1), (0, 0)))
    p = p.reshape(n, ho1p * wo1p, k1 * k1 * C)

    n_pad = _round_up(n, tile_n)
    if n_pad != n:
        p = jnp.pad(p, ((0, n_pad - n), (0, 0), (0, 0)))

    # Fused conv1 -> conv2 -> flatten -> input-gate projection.
    xp = _pallas_features(
        p, params["w1"], params["b1"], params["w2"], params["b2"],
        params["w_ih_hwc_t"], params["b_gates"],
        k2=k2, s2=s2, ho1p=ho1p, wo1p=wo1p, ho2=ho2, wo2=wo2,
        tile_n=tile_n)                                                # (n_pad, 4H)

    xp = xp[:n].reshape(B, T, 4 * hidden).transpose(1, 0, 2)          # (T, B, 4H) time-major
    vals = _pallas_lstm_head(xp, params["w_hh_t"], params["w_v"], params["b_v"],
                             hidden)                                  # (T, B, 1)
    return vals[:, :, 0].T                                            # (B, T)


# ---------------------------------------------------------------------------
# Deterministic synthetic parameters (PyTorch layouts) + one-time repacking
# ---------------------------------------------------------------------------
def init_torch_params(key, in_channels, img_hw, hidden, cfg):
    """Synthetic parameters in PyTorch-native layouts (Conv2d / LSTM / Linear)."""
    H, W = img_hw
    ho1 = (H - cfg.k1) // cfg.s1 + 1
    wo1 = (W - cfg.k1) // cfg.s1 + 1
    ho2 = (ho1 - cfg.k2) // cfg.s2 + 1
    wo2 = (wo1 - cfg.k2) // cfg.s2 + 1
    feat = cfg.c2 * ho2 * wo2
    ks = jax.random.split(key, 9)
    s = 0.05
    return {
        "conv1_w": s * jax.random.normal(ks[0], (cfg.c1, in_channels, cfg.k1, cfg.k1), jnp.float32),
        "conv1_b": s * jax.random.normal(ks[1], (cfg.c1,), jnp.float32),
        "conv2_w": s * jax.random.normal(ks[2], (cfg.c2, cfg.c1, cfg.k2, cfg.k2), jnp.float32),
        "conv2_b": s * jax.random.normal(ks[3], (cfg.c2,), jnp.float32),
        "w_ih": s * jax.random.normal(ks[4], (4 * hidden, feat), jnp.float32),   # (4H, F), F in (c,h,w) order
        "w_hh": s * jax.random.normal(ks[5], (4 * hidden, hidden), jnp.float32),
        "b_ih": s * jax.random.normal(ks[6], (4 * hidden,), jnp.float32),
        "b_hh": s * jax.random.normal(ks[7], (4 * hidden,), jnp.float32),
        "w_v": s * jax.random.normal(ks[8], (1, hidden), jnp.float32),
        "b_v": jnp.zeros((1,), jnp.float32),
    }


def prepare_params(tp, in_channels, img_hw, cfg):
    """One-time repack of PyTorch-layout weights into kernel-friendly layouts."""
    H, W = img_hw
    ho1 = (H - cfg.k1) // cfg.s1 + 1
    wo1 = (W - cfg.k1) // cfg.s1 + 1
    ho2 = (ho1 - cfg.k2) // cfg.s2 + 1
    wo2 = (wo1 - cfg.k2) // cfg.s2 + 1
    feat = cfg.c2 * ho2 * wo2

    # Conv2d weight (Cout, Cin, kh, kw) -> matmul weight (kh*kw*Cin, Cout), rows in
    # (ki, kj, ci) order to match the im2col lane order.
    w1 = tp["conv1_w"].transpose(2, 3, 1, 0).reshape(cfg.k1 * cfg.k1 * in_channels, cfg.c1)
    w2 = tp["conv2_w"].transpose(2, 3, 1, 0).reshape(cfg.k2 * cfg.k2 * cfg.c1, cfg.c2)

    # PyTorch flattens conv features in (c, h, w) order; the fused kernel emits
    # (h, w, c).  Permute the rows of W_ih^T once here instead of transposing the
    # conv activation at runtime.
    chw_ids = jnp.arange(feat).reshape(cfg.c2, ho2, wo2)
    perm = chw_ids.transpose(1, 2, 0).reshape(-1)
    w_ih_hwc_t = tp["w_ih"].T[perm, :]

    return {
        "w1": w1, "b1": tp["conv1_b"],
        "w2": w2, "b2": tp["conv2_b"],
        "w_ih_hwc_t": w_ih_hwc_t,
        "b_gates": tp["b_ih"] + tp["b_hh"],
        "w_hh_t": tp["w_hh"].T,          # (H, 4H)
        "w_v": tp["w_v"],                # (1, H)
        "b_v": tp["b_v"],                # (1,)
    }


# ---------------------------------------------------------------------------
# Pure-JAX (XLA) reference for correctness validation
# ---------------------------------------------------------------------------
def reference_forward(obs, tp, *, cfg, hidden):
    B, T, C, H, W = obs.shape
    s1, s2 = cfg.s1, cfg.s2
    hi = lax.Precision.HIGHEST
    dn = ("NCHW", "OIHW", "NCHW")
    x = obs.reshape(B * T, C, H, W)
    y1 = lax.conv_general_dilated(x, tp["conv1_w"], (s1, s1), "VALID",
                                  dimension_numbers=dn, precision=hi)
    y1 = jnp.maximum(y1 + tp["conv1_b"][None, :, None, None], 0.0)
    y2 = lax.conv_general_dilated(y1, tp["conv2_w"], (s2, s2), "VALID",
                                  dimension_numbers=dn, precision=hi)
    y2 = jnp.maximum(y2 + tp["conv2_b"][None, :, None, None], 0.0)
    feat = y2.reshape(B * T, -1)                                      # (c,h,w) flatten
    xg = jnp.dot(feat, tp["w_ih"].T, precision=hi) + tp["b_ih"] + tp["b_hh"]
    xg = xg.reshape(B, T, 4 * hidden)
    h = jnp.zeros((B, hidden), jnp.float32)
    c = jnp.zeros((B, hidden), jnp.float32)
    vs = []
    for t in range(T):
        g = xg[:, t] + jnp.dot(h, tp["w_hh"].T, precision=hi)
        i_g = jax.nn.sigmoid(g[:, :hidden])
        f_g = jax.nn.sigmoid(g[:, hidden:2 * hidden])
        g_g = jnp.tanh(g[:, 2 * hidden:3 * hidden])
        o_g = jax.nn.sigmoid(g[:, 3 * hidden:])
        c = f_g * c + i_g * g_g
        h = o_g * jnp.tanh(c)
        vs.append(jnp.dot(h, tp["w_v"].T, precision=hi) + tp["b_v"])  # (B, 1)
    return jnp.concatenate(vs, axis=-1)                               # (B, T)


if __name__ == "__main__":
    B, T, C, H, W = 2, 8, 4, 16, 16
    HIDDEN = 32
    CFG = ConvCfg(k1=4, s1=2, c1=8, k2=3, s2=2, c2=16)
    # conv1: 16 -> 7, conv2: 7 -> 3, features = 16*3*3 = 144, gates = 4*32 = 128

    key = jax.random.PRNGKey(0)
    k_obs, k_par = jax.random.split(key)
    obs = jax.random.normal(k_obs, (B, T, C, H, W), dtype=jnp.float32)

    torch_params = init_torch_params(k_par, in_channels=C, img_hw=(H, W),
                                     hidden=HIDDEN, cfg=CFG)
    params = prepare_params(torch_params, in_channels=C, img_hw=(H, W), cfg=CFG)

    fwd = jax.jit(functools.partial(
        cnn_lstm_critic_forward, cfg=CFG, hidden=HIDDEN, tile_n=8))
    v = jax.block_until_ready(fwd(obs, params))

    assert v.shape == (B, T), v.shape
    assert v.dtype == jnp.float32
    assert bool(jnp.all(jnp.isfinite(v)))

    ref_fn = jax.jit(functools.partial(reference_forward, cfg=CFG, hidden=HIDDEN))
    v_ref = jax.block_until_ready(ref_fn(obs, torch_params))
    err = float(jnp.max(jnp.abs(v - v_ref)))
    assert err < 5e-3, f"max |pallas - reference| = {err}"

    print("KERNEL_OK")
</pallas_src>

<mosaic_0001>
module attributes {stable_mosaic.version = 11 : i64} {
  func.func @_feature_kernel(%arg0: i32, %arg1: memref<8x64x64xf32, #tpu.memory_space<vmem>>, %arg2: memref<64x8xf32, #tpu.memory_space<vmem>>, %arg3: memref<1x8xf32, #tpu.memory_space<vmem>>, %arg4: memref<72x16xf32, #tpu.memory_space<vmem>>, %arg5: memref<1x16xf32, #tpu.memory_space<vmem>>, %arg6: memref<144x128xf32, #tpu.memory_space<vmem>>, %arg7: memref<1x128xf32, #tpu.memory_space<vmem>>, %arg8: memref<8x128xf32, #tpu.memory_space<vmem>>, %arg9: memref<8x8x8x8xf32, #tpu.memory_space<vmem>>) attributes {dimension_semantics = [#tpu.dimension_semantics<parallel>], iteration_bounds = array<i64: 2>, scalar_prefetch = 0 : i64, scratch_operands = 1 : i64, tpu.core_type = #tpu.core_type<tc>, window_params = [{transform_indices = @transform_0, window_bounds = array<i64: 8, 64, 64>}, {pipeline_mode = #tpu.pipeline_mode<synchronous>, transform_indices = @transform_1, window_bounds = array<i64: 64, 8>}, {pipeline_mode = #tpu.pipeline_mode<synchronous>, transform_indices = @transform_2, window_bounds = array<i64: 1, 8>}, {pipeline_mode = #tpu.pipeline_mode<synchronous>, transform_indices = @transform_3, window_bounds = array<i64: 72, 16>}, {pipeline_mode = #tpu.pipeline_mode<synchronous>, transform_indices = @transform_4, window_bounds = array<i64: 1, 16>}, {pipeline_mode = #tpu.pipeline_mode<synchronous>, transform_indices = @transform_5, window_bounds = array<i64: 144, 128>}, {pipeline_mode = #tpu.pipeline_mode<synchronous>, transform_indices = @transform_6, window_bounds = array<i64: 1, 128>}, {transform_indices = @transform_7, window_bounds = array<i64: 8, 128>}]} {
    %c0 = arith.constant 0 : index
    %c0_0 = arith.constant 0 : index
    %c0_1 = arith.constant 0 : index
    %0 = vector.load %arg1[%c0, %c0_0, %c0_1] : memref<8x64x64xf32, #tpu.memory_space<vmem>>, vector<8x64x64xf32>
    %1 = vector.shape_cast %0 : vector<8x64x64xf32> to vector<512x64xf32>
    %c0_2 = arith.constant 0 : index
    %c0_3 = arith.constant 0 : index
    %2 = vector.load %arg2[%c0_2, %c0_3] : memref<64x8xf32, #tpu.memory_space<vmem>>, vector<64x8xf32>
    %cst = arith.constant dense<0.000000e+00> : vector<512x8xf32>
    %3 = tpu.matmul %1, %2, %cst {dimension_numbers = #tpu.dot_dimension_numbers<[1], [0], [0], [1], [0, 0, 1, 1], [], []>} : vector<512x64xf32>, vector<64x8xf32>, vector<512x8xf32> -> vector<512x8xf32>
    %c0_4 = arith.constant 0 : index
    %c0_5 = arith.constant 0 : index
    %4 = vector.load %arg3[%c0_4, %c0_5] : memref<1x8xf32, #tpu.memory_space<vmem>>, vector<1x8xf32>
    %5 = vector.broadcast %4 : vector<1x8xf32> to vector<512x8xf32>
    %6 = arith.addf %3, %5 : vector<512x8xf32>
    %cst_6 = arith.constant 0.000000e+00 : f32
    %7 = vector.broadcast %cst_6 : f32 to vector<512x8xf32>
    %8 = arith.maximumf %6, %7 : vector<512x8xf32>
    %9 = vector.shape_cast %8 : vector<512x8xf32> to vector<8x8x8x8xf32>
    %c0_7 = arith.constant 0 : index
    %c0_8 = arith.constant 0 : index
    %c0_9 = arith.constant 0 : index
    %c0_10 = arith.constant 0 : index
    %10 = vector.load %arg9[%c0_7, %c0_8, %c0_9, %c0_10] : memref<8x8x8x8xf32, #tpu.memory_space<vmem>>, vector<8x8x8x8xf32>
    tpu.vector_store %arg9[%c0_7, %c0_8, %c0_9, %c0_10], %9 {strides = array<i32>} : memref<8x8x8x8xf32, #tpu.memory_space<vmem>>, vector<8x8x8x8xf32>,
    %c0_11 = arith.constant 0 : index
    %c0_12 = arith.constant 0 : index
    %c0_13 = arith.constant 0 : index
    %c0_14 = arith.constant 0 : index
    %11 = vector.load %arg9[%c0_11, %c0_12, %c0_13, %c0_14] : memref<8x8x8x8xf32, #tpu.memory_space<vmem>>, vector<8x1x1x8xf32>
    %12 = vector.shape_cast %11 : vector<8x1x1x8xf32> to vector<8x8xf32>
    %c0_15 = arith.constant 0 : index
    %c0_16 = arith.constant 0 : index
    %c1 = arith.constant 1 : index
    %c0_17 = arith.constant 0 : index
    %13 = vector.load %arg9[%c0_15, %c0_16, %c1, %c0_17] : memref<8x8x8x8xf32, #tpu.memory_space<vmem>>, vector<8x1x1x8xf32>
    %14 = vector.shape_cast %13 : vector<8x1x1x8xf32> to vector<8x8xf32>
    %c0_18 = arith.constant 0 : index
    %c0_19 = arith.constant 0 : index
    %c2 = arith.constant 2 : index
    %c0_20 = arith.constant 0 : index
    %15 = vector.load %arg9[%c0_18, %c0_19, %c2, %c0_20] : memref<8x8x8x8xf32, #tpu.memory_space<vmem>>, vector<8x1x1x8xf32>
    %16 = vector.shape_cast %15 : vector<8x1x1x8xf32> to vector<8x8xf32>
    %c0_21 = arith.constant 0 : index
    %c1_22 = arith.constant 1 : index
    %c0_23 = arith.constant 0 : index
    %c0_24 = arith.constant 0 : index
    %17 = vector.load %arg9[%c0_21, %c1_22, %c0_23, %c0_24] : memref<8x8x8x8xf32, #tpu.memory_space<vmem>>, vector<8x1x1x8xf32>
    %18 = vector.shape_cast %17 : vector<8x1x1x8xf32> to vector<8x8xf32>
    %c0_25 = arith.constant 0 : index
    %c1_26 = arith.constant 1 : index
    %c1_27 = arith.constant 1 : index
    %c0_28 = arith.constant 0 : index
    %19 = vector.load %arg9[%c0_25, %c1_26, %c1_27, %c0_28] : memref<8x8x8x8xf32, #tpu.memory_space<vmem>>, vector<8x1x1x8xf32>
    %20 = vector.shape_cast %19 : vector<8x1x1x8xf32> to vector<8x8xf32>
    %c0_29 = arith.constant 0 : index
    %c1_30 = arith.constant 1 : index
    %c2_31 = arith.constant 2 : index
    %c0_32 = arith.constant 0 : index
    %21 = vector.load %arg9[%c0_29, %c1_30, %c2_31, %c0_32] : memref<8x8x8x8xf32, #tpu.memory_space<vmem>>, vector<8x1x1x8xf32>
    %22 = vector.shape_cast %21 : vector<8x1x1x8xf32> to vector<8x8xf32>
    %c0_33 = arith.constant 0 : index
    %c2_34 = arith.constant 2 : index
    %c0_35 = arith.constant 0 : index
    %c0_36 = arith.constant 0 : index
    %23 = vector.load %arg9[%c0_33, %c2_34, %c0_35, %c0_36] : memref<8x8x8x8xf32, #tpu.memory_space<vmem>>, vector<8x1x1x8xf32>
    %24 = vector.shape_cast %23 : vector<8x1x1x8xf32> to vector<8x8xf32>
    %c0_37 = arith.constant 0 : index
    %c2_38 = arith.constant 2 : index
    %c1_39 = arith.constant 1 : index
    %c0_40 = arith.constant 0 : index
    %25 = vector.load %arg9[%c0_37, %c2_38, %c1_39, %c0_40] : memref<8x8x8x8xf32, #tpu.memory_space<vmem>>, vector<8x1x1x8xf32>
    %26 = vector.shape_cast %25 : vector<8x1x1x8xf32> to vector<8x8xf32>
    %c0_41 = arith.constant 0 : index
    %c2_42 = arith.constant 2 : index
    %c2_43 = arith.constant 2 : index
    %c0_44 = arith.constant 0 : index
    %27 = vector.load %arg9[%c0_41, %c2_42, %c2_43, %c0_44] : memref<8x8x8x8xf32, #tpu.memory_space<vmem>>, vector<8x1x1x8xf32>
    %28 = vector.shape_cast %27 : vector<8x1x1x8xf32> to vector<8x8xf32>
    %29 = tpu.concatenate %12, %14, %16, %18, %20, %22, %24, %26, %28 in 1 : vector<8x8xf32>, vector<8x8xf32>, vector<8x8xf32>, vector<8x8xf32>, vector<8x8xf32>, vector<8x8xf32>, vector<8x8xf32>, vector<8x8xf32>, vector<8x8xf32> -> vector<8x72xf32>
    %c0_45 = arith.constant 0 : index
    %c0_46 = arith.constant 0 : index
    %30 = vector.load %arg4[%c0_45, %c0_46] : memref<72x16xf32, #tpu.memory_space<vmem>>, vector<72x16xf32>
    %cst_47 = arith.constant dense<0.000000e+00> : vector<8x16xf32>
    %31 = tpu.matmul %29, %30, %cst_47 {dimension_numbers = #tpu.dot_dimension_numbers<[1], [0], [0], [1], [0, 0, 1, 1], [], []>} : vector<8x72xf32>, vector<72x16xf32>, vector<8x16xf32> -> vector<8x16xf32>
    %c0_48 = arith.constant 0 : index
    %c0_49 = arith.constant 0 : index
    %32 = vector.load %arg5[%c0_48, %c0_49] : memref<1x16xf32, #tpu.memory_space<vmem>>, vector<1x16xf32>
    %33 = vector.broadcast %32 : vector<1x16xf32> to vector<8x16xf32>
    %34 = arith.addf %31, %33 : vector<8x16xf32>
    %cst_50 = arith.constant 0.000000e+00 : f32
    %35 = vector.broadcast %cst_50 : f32 to vector<8x16xf32>
    %36 = arith.maximumf %34, %35 : vector<8x16xf32>
    %c0_51 = arith.constant 0 : index
    %c0_52 = arith.constant 0 : index
    %c2_53 = arith.constant 2 : index
    %c0_54 = arith.constant 0 : index
    %37 = vector.load %arg9[%c0_51, %c0_52, %c2_53, %c0_54] : memref<8x8x8x8xf32, #tpu.memory_space<vmem>>, vector<8x1x1x8xf32>
    %38 = vector.shape_cast %37 : vector<8x1x1x8xf32> to vector<8x8xf32>
    %c0_55 = arith.constant 0 : index
    %c0_56 = arith.constant 0 : index
    %c3 = arith.constant 3 : index
    %c0_57 = arith.constant 0 : index
    %39 = vector.load %arg9[%c0_55, %c0_56, %c3, %c0_57] : memref<8x8x8x8xf32, #tpu.memory_space<vmem>>, vector<8x1x1x8xf32>
    %40 = vector.shape_cast %39 : vector<8x1x1x8xf32> to vector<8x8xf32>
    %c0_58 = arith.constant 0 : index
    %c0_59 = arith.constant 0 : index
    %c4 = arith.constant 4 : index
    %c0_60 = arith.constant 0 : index
    %41 = vector.load %arg9[%c0_58, %c0_59, %c4, %c0_60] : memref<8x8x8x8xf32, #tpu.memory_space<vmem>>, vector<8x1x1x8xf32>
    %42 = vector.shape_cast %41 : vector<8x1x1x8xf32> to vector<8x8xf32>
    %c0_61 = arith.constant 0 : index
    %c1_62 = arith.constant 1 : index
    %c2_63 = arith.constant 2 : index
    %c0_64 = arith.constant 0 : index
    %43 = vector.load %arg9[%c0_61, %c1_62, %c2_63, %c0_64] : memref<8x8x8x8xf32, #tpu.memory_space<vmem>>, vector<8x1x1x8xf32>
    %44 = vector.shape_cast %43 : vector<8x1x1x8xf32> to vector<8x8xf32>
    %c0_65 = arith.constant 0 : index
    %c1_66 = arith.constant 1 : index
    %c3_67 = arith.constant 3 : index
    %c0_68 = arith.constant 0 : index
    %45 = vector.load %arg9[%c0_65, %c1_66, %c3_67, %c0_68] : memref<8x8x8x8xf32, #tpu.memory_space<vmem>>, vector<8x1x1x8xf32>
    %46 = vector.shape_cast %45 : vector<8x1x1x8xf32> to vector<8x8xf32>
    %c0_69 = arith.constant 0 : index
    %c1_70 = arith.constant 1 : index
    %c4_71 = arith.constant 4 : index
    %c0_72 = arith.constant 0 : index
    %47 = vector.load %arg9[%c0_69, %c1_70, %c4_71, %c0_72] : memref<8x8x8x8xf32, #tpu.memory_space<vmem>>, vector<8x1x1x8xf32>
    %48 = vector.shape_cast %47 : vector<8x1x1x8xf32> to vector<8x8xf32>
    %c0_73 = arith.constant 0 : index
    %c2_74 = arith.constant 2 : index
    %c2_75 = arith.constant 2 : index
    %c0_76 = arith.constant 0 : index
    %49 = vector.load %arg9[%c0_73, %c2_74, %c2_75, %c0_76] : memref<8x8x8x8xf32, #tpu.memory_space<vmem>>, vector<8x1x1x8xf32>
    %50 = vector.shape_cast %49 : vector<8x1x1x8xf32> to vector<8x8xf32>
    %c0_77 = arith.constant 0 : index
    %c2_78 = arith.constant 2 : index
    %c3_79 = arith.constant 3 : index
    %c0_80 = arith.constant 0 : index
    %51 = vector.load %arg9[%c0_77, %c2_78, %c3_79, %c0_80] : memref<8x8x8x8xf32, #tpu.memory_space<vmem>>, vector<8x1x1x8xf32>
    %52 = vector.shape_cast %51 : vector<8x1x1x8xf32> to vector<8x8xf32>
    %c0_81 = arith.constant 0 : index
    %c2_82 = arith.constant 2 : index
    %c4_83 = arith.constant 4 : index
    %c0_84 = arith.constant 0 : index
    %53 = vector.load %arg9[%c0_81, %c2_82, %c4_83, %c0_84] : memref<8x8x8x8xf32, #tpu.memory_space<vmem>>, vector<8x1x1x8xf32>
    %54 = vector.shape_cast %53 : vector<8x1x1x8xf32> to vector<8x8xf32>
    %55 = tpu.concatenate %38, %40, %42, %44, %46, %48, %50, %52, %54 in 1 : vector<8x8xf32>, vector<8x8xf32>, vector<8x8xf32>, vector<8x8xf32>, vector<8x8xf32>, vector<8x8xf32>, vector<8x8xf32>, vector<8x8xf32>, vector<8x8xf32> -> vector<8x72xf32>
    %c0_85 = arith.constant 0 : index
    %c0_86 = arith.constant 0 : index
    %56 = vector.load %arg4[%c0_85, %c0_86] : memref<72x16xf32, #tpu.memory_space<vmem>>, vector<72x16xf32>
    %cst_87 = arith.constant dense<0.000000e+00> : vector<8x16xf32>
    %57 = tpu.matmul %55, %56, %cst_87 {dimension_numbers = #tpu.dot_dimension_numbers<[1], [0], [0], [1], [0, 0, 1, 1], [], []>} : vector<8x72xf32>, vector<72x16xf32>, vector<8x16xf32> -> vector<8x16xf32>
    %c0_88 = arith.constant 0 : index
    %c0_89 = arith.constant 0 : index
    %58 = vector.load %arg5[%c0_88, %c0_89] : memref<1x16xf32, #tpu.memory_space<vmem>>, vector<1x16xf32>
    %59 = vector.broadcast %58 : vector<1x16xf32> to vector<8x16xf32>
    %60 = arith.addf %57, %59 : vector<8x16xf32>
    %cst_90 = arith.constant 0.000000e+00 : f32
    %61 = vector.broadcast %cst_90 : f32 to vector<8x16xf32>
    %62 = arith.maximumf %60, %61 : vector<8x16xf32>
    %c0_91 = arith.constant 0 : index
    %c0_92 = arith.constant 0 : index
    %c4_93 = arith.constant 4 : index
    %c0_94 = arith.constant 0 : index
    %63 = vector.load %arg9[%c0_91, %c0_92, %c4_93, %c0_94] : memref<8x8x8x8xf32, #tpu.memory_space<vmem>>, vector<8x1x1x8xf32>
    %64 = vector.shape_cast %63 : vector<8x1x1x8xf32> to vector<8x8xf32>
    %c0_95 = arith.constant 0 : index
    %c0_96 = arith.constant 0 : index
    %c5 = arith.constant 5 : index
    %c0_97 = arith.constant 0 : index
    %65 = vector.load %arg9[%c0_95, %c0_96, %c5, %c0_97] : memref<8x8x8x8xf32, #tpu.memory_space<vmem>>, vector<8x1x1x8xf32>
    %66 = vector.shape_cast %65 : vector<8x1x1x8xf32> to vector<8x8xf32>
    %c0_98 = arith.constant 0 : index
    %c0_99 = arith.constant 0 : index
    %c6 = arith.constant 6 : index
    %c0_100 = arith.constant 0 : index
    %67 = vector.load %arg9[%c0_98, %c0_99, %c6, %c0_100] : memref<8x8x8x8xf32, #tpu.memory_space<vmem>>, vector<8x1x1x8xf32>
    %68 = vector.shape_cast %67 : vector<8x1x1x8xf32> to vector<8x8xf32>
    %c0_101 = arith.constant 0 : index
    %c1_102 = arith.constant 1 : index
    %c4_103 = arith.constant 4 : index
    %c0_104 = arith.constant 0 : index
    %69 = vector.load %arg9[%c0_101, %c1_102, %c4_103, %c0_104] : memref<8x8x8x8xf32, #tpu.memory_space<vmem>>, vector<8x1x1x8xf32>
    %70 = vector.shape_cast %69 : vector<8x1x1x8xf32> to vector<8x8xf32>
    %c0_105 = arith.constant 0 : index
    %c1_106 = arith.constant 1 : index
    %c5_107 = arith.constant 5 : index
    %c0_108 = arith.constant 0 : index
    %71 = vector.load %arg9[%c0_105, %c1_106, %c5_107, %c0_108] : memref<8x8x8x8xf32, #tpu.memory_space<vmem>>, vector<8x1x1x8xf32>
    %72 = vector.shape_cast %71 : vector<8x1x1x8xf32> to vector<8x8xf32>
    %c0_109 = arith.constant 0 : index
    %c1_110 = arith.constant 1 : index
    %c6_111 = arith.constant 6 : index
    %c0_112 = arith.constant 0 : index
    %73 = vector.load %arg9[%c0_109, %c1_110, %c6_111, %c0_112] : memref<8x8x8x8xf32, #tpu.memory_space<vmem>>, vector<8x1x1x8xf32>
    %74 = vector.shape_cast %73 : vector<8x1x1x8xf32> to vector<8x8xf32>
    %c0_113 = arith.constant 0 : index
    %c2_114 = arith.constant 2 : index
    %c4_115 = arith.constant 4 : index
    %c0_116 = arith.constant 0 : index
    %75 = vector.load %arg9[%c0_113, %c2_114, %c4_115, %c0_116] : memref<8x8x8x8xf32, #tpu.memory_space<vmem>>, vector<8x1x1x8xf32>
    %76 = vector.shape_cast %75 : vector<8x1x1x8xf32> to vector<8x8xf32>
    %c0_117 = arith.constant 0 : index
    %c2_118 = arith.constant 2 : index
    %c5_119 = arith.constant 5 : index
    %c0_120 = arith.constant 0 : index
    %77 = vector.load %arg9[%c0_117, %c2_118, %c5_119, %c0_120] : memref<8x8x8x8xf32, #tpu.memory_space<vmem>>, vector<8x1x1x8xf32>
    %78 = vector.shape_cast %77 : vector<8x1x1x8xf32> to vector<8x8xf32>
    %c0_121 = arith.constant 0 : index
    %c2_122 = arith.constant 2 : index
    %c6_123 = arith.constant 6 : index
    %c0_124 = arith.constant 0 : index
    %79 = vector.load %arg9[%c0_121, %c2_122, %c6_123, %c0_124] : memref<8x8x8x8xf32, #tpu.memory_space<vmem>>, vector<8x1x1x8xf32>
    %80 = vector.shape_cast %79 : vector<8x1x1x8xf32> to vector<8x8xf32>
    %81 = tpu.concatenate %64, %66, %68, %70, %72, %74, %76, %78, %80 in 1 : vector<8x8xf32>, vector<8x8xf32>, vector<8x8xf32>, vector<8x8xf32>, vector<8x8xf32>, vector<8x8xf32>, vector<8x8xf32>, vector<8x8xf32>, vector<8x8xf32> -> vector<8x72xf32>
    %c0_125 = arith.constant 0 : index
    %c0_126 = arith.constant 0 : index
    %82 = vector.load %arg4[%c0_125, %c0_126] : memref<72x16xf32, #tpu.memory_space<vmem>>, vector<72x16xf32>
    %cst_127 = arith.constant dense<0.000000e+00> : vector<8x16xf32>
    %83 = tpu.matmul %81, %82, %cst_127 {dimension_numbers = #tpu.dot_dimension_numbers<[1], [0], [0], [1], [0, 0, 1, 1], [], []>} : vector<8x72xf32>, vector<72x16xf32>, vector<8x16xf32> -> vector<8x16xf32>
    %c0_128 = arith.constant 0 : index
    %c0_129 = arith.constant 0 : index
    %84 = vector.load %arg5[%c0_128, %c0_129] : memref<1x16xf32, #tpu.memory_space<vmem>>, vector<1x16xf32>
    %85 = vector.broadcast %84 : vector<1x16xf32> to vector<8x16xf32>
    %86 = arith.addf %83, %85 : vector<8x16xf32>
    %cst_130 = arith.constant 0.000000e+00 : f32
    %87 = vector.broadcast %cst_130 : f32 to vector<8x16xf32>
    %88 = arith.maximumf %86, %87 : vector<8x16xf32>
    %c0_131 = arith.constant 0 : index
    %c2_132 = arith.constant 2 : index
    %c0_133 = arith.constant 0 : index
    %c0_134 = arith.constant 0 : index
    %89 = vector.load %arg9[%c0_131, %c2_132, %c0_133, %c0_134] : memref<8x8x8x8xf32, #tpu.memory_space<vmem>>, vector<8x1x1x8xf32>
    %90 = vector.shape_cast %89 : vector<8x1x1x8xf32> to vector<8x8xf32>
    %c0_135 = arith.constant 0 : index
    %c2_136 = arith.constant 2 : index
    %c1_137 = arith.constant 1 : index
    %c0_138 = arith.constant 0 : index
    %91 = vector.load %arg9[%c0_135, %c2_136, %c1_137, %c0_138] : memref<8x8x8x8xf32, #tpu.memory_space<vmem>>, vector<8x1x1x8xf32>
    %92 = vector.shape_cast %91 : vector<8x1x1x8xf32> to vector<8x8xf32>
    %c0_139 = arith.constant 0 : index
    %c2_140 = arith.constant 2 : index
    %c2_141 = arith.constant 2 : index
    %c0_142 = arith.constant 0 : index
    %93 = vector.load %arg9[%c0_139, %c2_140, %c2_141, %c0_142] : memref<8x8x8x8xf32, #tpu.memory_space<vmem>>, vector<8x1x1x8xf32>
    %94 = vector.shape_cast %93 : vector<8x1x1x8xf32> to vector<8x8xf32>
    %c0_143 = arith.constant 0 : index
    %c3_144 = arith.constant 3 : index
    %c0_145 = arith.constant 0 : index
    %c0_146 = arith.constant 0 : index
    %95 = vector.load %arg9[%c0_143, %c3_144, %c0_145, %c0_146] : memref<8x8x8x8xf32, #tpu.memory_space<vmem>>, vector<8x1x1x8xf32>
    %96 = vector.shape_cast %95 : vector<8x1x1x8xf32> to vector<8x8xf32>
    %c0_147 = arith.constant 0 : index
    %c3_148 = arith.constant 3 : index
    %c1_149 = arith.constant 1 : index
    %c0_150 = arith.constant 0 : index
    %97 = vector.load %arg9[%c0_147, %c3_148, %c1_149, %c0_150] : memref<8x8x8x8xf32, #tpu.memory_space<vmem>>, vector<8x1x1x8xf32>
    %98 = vector.shape_cast %97 : vector<8x1x1x8xf32> to vector<8x8xf32>
    %c0_151 = arith.constant 0 : index
    %c3_152 = arith.constant 3 : index
    %c2_153 = arith.constant 2 : index
    %c0_154 = arith.constant 0 : index
    %99 = vector.load %arg9[%c0_151, %c3_152, %c2_153, %c0_154] : memref<8x8x8x8xf32, #tpu.memory_space<vmem>>, vector<8x1x1x8xf32>
    %100 = vector.shape_cast %99 : vector<8x1x1x8xf32> to vector<8x8xf32>
    %c0_155 = arith.constant 0 : index
    %c4_156 = arith.constant 4 : index
    %c0_157 = arith.constant 0 : index
    %c0_158 = arith.constant 0 : index
    %101 = vector.load %arg9[%c0_155, %c4_156, %c0_157, %c0_158] : memref<8x8x8x8xf32, #tpu.memory_space<vmem>>, vector<8x1x1x8xf32>
    %102 = vector.shape_cast %101 : vector<8x1x1x8xf32> to vector<8x8xf32>
    %c0_159 = arith.constant 0 : index
    %c4_160 = arith.constant 4 : index
    %c1_161 = arith.constant 1 : index
    %c0_162 = arith.constant 0 : index
    %103 = vector.load %arg9[%c0_159, %c4_160, %c1_161, %c0_162] : memref<8x8x8x8xf32, #tpu.memory_space<vmem>>, vector<8x1x1x8xf32>
    %104 = vector.shape_cast %103 : vector<8x1x1x8xf32> to vector<8x8xf32>
    %c0_163 = arith.constant 0 : index
    %c4_164 = arith.constant 4 : index
    %c2_165 = arith.constant 2 : index
    %c0_166 = arith.constant 0 : index
    %105 = vector.load %arg9[%c0_163, %c4_164, %c2_165, %c0_166] : memref<8x8x8x8xf32, #tpu.memory_space<vmem>>, vector<8x1x1x8xf32>
    %106 = vector.shape_cast %105 : vector<8x1x1x8xf32> to vector<8x8xf32>
    %107 = tpu.concatenate %90, %92, %94, %96, %98, %100, %102, %104, %106 in 1 : vector<8x8xf32>, vector<8x8xf32>, vector<8x8xf32>, vector<8x8xf32>, vector<8x8xf32>, vector<8x8xf32>, vector<8x8xf32>, vector<8x8xf32>, vector<8x8xf32> -> vector<8x72xf32>
    %c0_167 = arith.constant 0 : index
    %c0_168 = arith.constant 0 : index
    %108 = vector.load %arg4[%c0_167, %c0_168] : memref<72x16xf32, #tpu.memory_space<vmem>>, vector<72x16xf32>
    %cst_169 = arith.constant dense<0.000000e+00> : vector<8x16xf32>
    %109 = tpu.matmul %107, %108, %cst_169 {dimension_numbers = #tpu.dot_dimension_numbers<[1], [0], [0], [1], [0, 0, 1, 1], [], []>} : vector<8x72xf32>, vector<72x16xf32>, vector<8x16xf32> -> vector<8x16xf32>
    %c0_170 = arith.constant 0 : index
    %c0_171 = arith.constant 0 : index
    %110 = vector.load %arg5[%c0_170, %c0_171] : memref<1x16xf32, #tpu.memory_space<vmem>>, vector<1x16xf32>
    %111 = vector.broadcast %110 : vector<1x16xf32> to vector<8x16xf32>
    %112 = arith.addf %109, %111 : vector<8x16xf32>
    %cst_172 = arith.constant 0.000000e+00 : f32
    %113 = vector.broadcast %cst_172 : f32 to vector<8x16xf32>
    %114 = arith.maximumf %112, %113 : vector<8x16xf32>
    %c0_173 = arith.constant 0 : index
    %c2_174 = arith.constant 2 : index
    %c2_175 = arith.constant 2 : index
    %c0_176 = arith.constant 0 : index
    %115 = vector.load %arg9[%c0_173, %c2_174, %c2_175, %c0_176] : memref<8x8x8x8xf32, #tpu.memory_space<vmem>>, vector<8x1x1x8xf32>
    %116 = vector.shape_cast %115 : vector<8x1x1x8xf32> to vector<8x8xf32>
    %c0_177 = arith.constant 0 : index
    %c2_178 = arith.constant 2 : index
    %c3_179 = arith.constant 3 : index
    %c0_180 = arith.constant 0 : index
    %117 = vector.load %arg9[%c0_177, %c2_178, %c3_179, %c0_180] : memref<8x8x8x8xf32, #tpu.memory_space<vmem>>, vector<8x1x1x8xf32>
    %118 = vector.shape_cast %117 : vector<8x1x1x8xf32> to vector<8x8xf32>
    %c0_181 = arith.constant 0 : index
    %c2_182 = arith.constant 2 : index
    %c4_183 = arith.constant 4 : index
    %c0_184 = arith.constant 0 : index
    %119 = vector.load %arg9[%c0_181, %c2_182, %c4_183, %c0_184] : memref<8x8x8x8xf32, #tpu.memory_space<vmem>>, vector<8x1x1x8xf32>
    %120 = vector.shape_cast %119 : vector<8x1x1x8xf32> to vector<8x8xf32>
    %c0_185 = arith.constant 0 : index
    %c3_186 = arith.constant 3 : index
    %c2_187 = arith.constant 2 : index
    %c0_188 = arith.constant 0 : index
    %121 = vector.load %arg9[%c0_185, %c3_186, %c2_187, %c0_188] : memref<8x8x8x8xf32, #tpu.memory_space<vmem>>, vector<8x1x1x8xf32>
    %122 = vector.shape_cast %121 : vector<8x1x1x8xf32> to vector<8x8xf32>
    %c0_189 = arith.constant 0 : index
    %c3_190 = arith.constant 3 : index
    %c3_191 = arith.constant 3 : index
    %c0_192 = arith.constant 0 : index
    %123 = vector.load %arg9[%c0_189, %c3_190, %c3_191, %c0_192] : memref<8x8x8x8xf32, #tpu.memory_space<vmem>>, vector<8x1x1x8xf32>
    %124 = vector.shape_cast %123 : vector<8x1x1x8xf32> to vector<8x8xf32>
    %c0_193 = arith.constant 0 : index
    %c3_194 = arith.constant 3 : index
    %c4_195 = arith.constant 4 : index
    %c0_196 = arith.constant 0 : index
    %125 = vector.load %arg9[%c0_193, %c3_194, %c4_195, %c0_196] : memref<8x8x8x8xf32, #tpu.memory_space<vmem>>, vector<8x1x1x8xf32>
    %126 = vector.shape_cast %125 : vector<8x1x1x8xf32> to vector<8x8xf32>
    %c0_197 = arith.constant 0 : index
    %c4_198 = arith.constant 4 : index
    %c2_199 = arith.constant 2 : index
    %c0_200 = arith.constant 0 : index
    %127 = vector.load %arg9[%c0_197, %c4_198, %c2_199, %c0_200] : memref<8x8x8x8xf32, #tpu.memory_space<vmem>>, vector<8x1x1x8xf32>
    %128 = vector.shape_cast %127 : vector<8x1x1x8xf32> to vector<8x8xf32>
    %c0_201 = arith.constant 0 : index
    %c4_202 = arith.constant 4 : index
    %c3_203 = arith.constant 3 : index
    %c0_204 = arith.constant 0 : index
    %129 = vector.load %arg9[%c0_201, %c4_202, %c3_203, %c0_204] : memref<8x8x8x8xf32, #tpu.memory_space<vmem>>, vector<8x1x1x8xf32>
    %130 = vector.shape_cast %129 : vector<8x1x1x8xf32> to vector<8x8xf32>
    %c0_205 = arith.constant 0 : index
    %c4_206 = arith.constant 4 : index
    %c4_207 = arith.constant 4 : index
    %c0_208 = arith.constant 0 : index
    %131 = vector.load %arg9[%c0_205, %c4_206, %c4_207, %c0_208] : memref<8x8x8x8xf32, #tpu.memory_space<vmem>>, vector<8x1x1x8xf32>
    %132 = vector.shape_cast %131 : vector<8x1x1x8xf32> to vector<8x8xf32>
    %133 = tpu.concatenate %116, %118, %120, %122, %124, %126, %128, %130, %132 in 1 : vector<8x8xf32>, vector<8x8xf32>, vector<8x8xf32>, vector<8x8xf32>, vector<8x8xf32>, vector<8x8xf32>, vector<8x8xf32>, vector<8x8xf32>, vector<8x8xf32> -> vector<8x72xf32>
    %c0_209 = arith.constant 0 : index
    %c0_210 = arith.constant 0 : index
    %134 = vector.load %arg4[%c0_209, %c0_210] : memref<72x16xf32, #tpu.memory_space<vmem>>, vector<72x16xf32>
    %cst_211 = arith.constant dense<0.000000e+00> : vector<8x16xf32>
    %135 = tpu.matmul %133, %134, %cst_211 {dimension_numbers = #tpu.dot_dimension_numbers<[1], [0], [0], [1], [0, 0, 1, 1], [], []>} : vector<8x72xf32>, vector<72x16xf32>, vector<8x16xf32> -> vector<8x16xf32>
    %c0_212 = arith.constant 0 : index
    %c0_213 = arith.constant 0 : index
    %136 = vector.load %arg5[%c0_212, %c0_213] : memref<1x16xf32, #tpu.memory_space<vmem>>, vector<1x16xf32>
    %137 = vector.broadcast %136 : vector<1x16xf32> to vector<8x16xf32>
    %138 = arith.addf %135, %137 : vector<8x16xf32>
    %cst_214 = arith.constant 0.000000e+00 : f32
    %139 = vector.broadcast %cst_214 : f32 to vector<8x16xf32>
    %140 = arith.maximumf %138, %139 : vector<8x16xf32>
    %c0_215 = arith.constant 0 : index
    %c2_216 = arith.constant 2 : index
    %c4_217 = arith.constant 4 : index
    %c0_218 = arith.constant 0 : index
    %141 = vector.load %arg9[%c0_215, %c2_216, %c4_217, %c0_218] : memref<8x8x8x8xf32, #tpu.memory_space<vmem>>, vector<8x1x1x8xf32>
    %142 = vector.shape_cast %141 : vector<8x1x1x8xf32> to vector<8x8xf32>
    %c0_219 = arith.constant 0 : index
    %c2_220 = arith.constant 2 : index
    %c5_221 = arith.constant 5 : index
    %c0_222 = arith.constant 0 : index
    %143 = vector.load %arg9[%c0_219, %c2_220, %c5_221, %c0_222] : memref<8x8x8x8xf32, #tpu.memory_space<vmem>>, vector<8x1x1x8xf32>
    %144 = vector.shape_cast %143 : vector<8x1x1x8xf32> to vector<8x8xf32>
    %c0_223 = arith.constant 0 : index
    %c2_224 = arith.constant 2 : index
    %c6_225 = arith.constant 6 : index
    %c0_226 = arith.constant 0 : index
    %145 = vector.load %arg9[%c0_223, %c2_224, %c6_225, %c0_226] : memref<8x8x8x8xf32, #tpu.memory_space<vmem>>, vector<8x1x1x8xf32>
    %146 = vector.shape_cast %145 : vector<8x1x1x8xf32> to vector<8x8xf32>
    %c0_227 = arith.constant 0 : index
    %c3_228 = arith.constant 3 : index
    %c4_229 = arith.constant 4 : index
    %c0_230 = arith.constant 0 : index
    %147 = vector.load %arg9[%c0_227, %c3_228, %c4_229, %c0_230] : memref<8x8x8x8xf32, #tpu.memory_space<vmem>>, vector<8x1x1x8xf32>
    %148 = vector.shape_cast %147 : vector<8x1x1x8xf32> to vector<8x8xf32>
    %c0_231 = arith.constant 0 : index
    %c3_232 = arith.constant 3 : index
    %c5_233 = arith.constant 5 : index
    %c0_234 = arith.constant 0 : index
    %149 = vector.load %arg9[%c0_231, %c3_232, %c5_233, %c0_234] : memref<8x8x8x8xf32, #tpu.memory_space<vmem>>, vector<8x1x1x8xf32>
    %150 = vector.shape_cast %149 : vector<8x1x1x8xf32> to vector<8x8xf32>
    %c0_235 = arith.constant 0 : index
    %c3_236 = arith.constant 3 : index
    %c6_237 = arith.constant 6 : index
    %c0_238 = arith.constant 0 : index
    %151 = vector.load %arg9[%c0_235, %c3_236, %c6_237, %c0_238] : memref<8x8x8x8xf32, #tpu.memory_space<vmem>>, vector<8x1x1x8xf32>
    %152 = vector.shape_cast %151 : vector<8x1x1x8xf32> to vector<8x8xf32>
    %c0_239 = arith.constant 0 : index
    %c4_240 = arith.constant 4 : index
    %c4_241 = arith.constant 4 : index
    %c0_242 = arith.constant 0 : index
    %153 = vector.load %arg9[%c0_239, %c4_240, %c4_241, %c0_242] : memref<8x8x8x8xf32, #tpu.memory_space<vmem>>, vector<8x1x1x8xf32>
    %154 = vector.shape_cast %153 : vector<8x1x1x8xf32> to vector<8x8xf32>
    %c0_243 = arith.constant 0 : index
    %c4_244 = arith.constant 4 : index
    %c5_245 = arith.constant 5 : index
    %c0_246 = arith.constant 0 : index
    %155 = vector.load %arg9[%c0_243, %c4_244, %c5_245, %c0_246] : memref<8x8x8x8xf32, #tpu.memory_space<vmem>>, vector<8x1x1x8xf32>
    %156 = vector.shape_cast %155 : vector<8x1x1x8xf32> to vector<8x8xf32>
    %c0_247 = arith.constant 0 : index
    %c4_248 = arith.constant 4 : index
    %c6_249 = arith.constant 6 : index
    %c0_250 = arith.constant 0 : index
    %157 = vector.load %arg9[%c0_247, %c4_248, %c6_249, %c0_250] : memref<8x8x8x8xf32, #tpu.memory_space<vmem>>, vector<8x1x1x8xf32>
    %158 = vector.shape_cast %157 : vector<8x1x1x8xf32> to vector<8x8xf32>
    %159 = tpu.concatenate %142, %144, %146, %148, %150, %152, %154, %156, %158 in 1 : vector<8x8xf32>, vector<8x8xf32>, vector<8x8xf32>, vector<8x8xf32>, vector<8x8xf32>, vector<8x8xf32>, vector<8x8xf32>, vector<8x8xf32>, vector<8x8xf32> -> vector<8x72xf32>
    %c0_251 = arith.constant 0 : index
    %c0_252 = arith.constant 0 : index
    %160 = vector.load %arg4[%c0_251, %c0_252] : memref<72x16xf32, #tpu.memory_space<vmem>>, vector<72x16xf32>
    %cst_253 = arith.constant dense<0.000000e+00> : vector<8x16xf32>
    %161 = tpu.matmul %159, %160, %cst_253 {dimension_numbers = #tpu.dot_dimension_numbers<[1], [0], [0], [1], [0, 0, 1, 1], [], []>} : vector<8x72xf32>, vector<72x16xf32>, vector<8x16xf32> -> vector<8x16xf32>
    %c0_254 = arith.constant 0 : index
    %c0_255 = arith.constant 0 : index
    %162 = vector.load %arg5[%c0_254, %c0_255] : memref<1x16xf32, #tpu.memory_space<vmem>>, vector<1x16xf32>
    %163 = vector.broadcast %162 : vector<1x16xf32> to vector<8x16xf32>
    %164 = arith.addf %161, %163 : vector<8x16xf32>
    %cst_256 = arith.constant 0.000000e+00 : f32
    %165 = vector.broadcast %cst_256 : f32 to vector<8x16xf32>
    %166 = arith.maximumf %164, %165 : vector<8x16xf32>
    %c0_257 = arith.constant 0 : index
    %c4_258 = arith.constant 4 : index
    %c0_259 = arith.constant 0 : index
    %c0_260 = arith.constant 0 : index
    %167 = vector.load %arg9[%c0_257, %c4_258, %c0_259, %c0_260] : memref<8x8x8x8xf32, #tpu.memory_space<vmem>>, vector<8x1x1x8xf32>
    %168 = vector.shape_cast %167 : vector<8x1x1x8xf32> to vector<8x8xf32>
    %c0_261 = arith.constant 0 : index
    %c4_262 = arith.constant 4 : index
    %c1_263 = arith.constant 1 : index
    %c0_264 = arith.constant 0 : index
    %169 = vector.load %arg9[%c0_261, %c4_262, %c1_263, %c0_264] : memref<8x8x8x8xf32, #tpu.memory_space<vmem>>, vector<8x1x1x8xf32>
    %170 = vector.shape_cast %169 : vector<8x1x1x8xf32> to vector<8x8xf32>
    %c0_265 = arith.constant 0 : index
    %c4_266 = arith.constant 4 : index
    %c2_267 = arith.constant 2 : index
    %c0_268 = arith.constant 0 : index
    %171 = vector.load %arg9[%c0_265, %c4_266, %c2_267, %c0_268] : memref<8x8x8x8xf32, #tpu.memory_space<vmem>>, vector<8x1x1x8xf32>
    %172 = vector.shape_cast %171 : vector<8x1x1x8xf32> to vector<8x8xf32>
    %c0_269 = arith.constant 0 : index
    %c5_270 = arith.constant 5 : index
    %c0_271 = arith.constant 0 : index
    %c0_272 = arith.constant 0 : index
    %173 = vector.load %arg9[%c0_269, %c5_270, %c0_271, %c0_272] : memref<8x8x8x8xf32, #tpu.memory_space<vmem>>, vector<8x1x1x8xf32>
    %174 = vector.shape_cast %173 : vector<8x1x1x8xf32> to vector<8x8xf32>
    %c0_273 = arith.constant 0 : index
    %c5_274 = arith.constant 5 : index
    %c1_275 = arith.constant 1 : index
    %c0_276 = arith.constant 0 : index
    %175 = vector.load %arg9[%c0_273, %c5_274, %c1_275, %c0_276] : memref<8x8x8x8xf32, #tpu.memory_space<vmem>>, vector<8x1x1x8xf32>
    %176 = vector.shape_cast %175 : vector<8x1x1x8xf32> to vector<8x8xf32>
    %c0_277 = arith.constant 0 : index
    %c5_278 = arith.constant 5 : index
    %c2_279 = arith.constant 2 : index
    %c0_280 = arith.constant 0 : index
    %177 = vector.load %arg9[%c0_277, %c5_278, %c2_279, %c0_280] : memref<8x8x8x8xf32, #tpu.memory_space<vmem>>, vector<8x1x1x8xf32>
    %178 = vector.shape_cast %177 : vector<8x1x1x8xf32> to vector<8x8xf32>
    %c0_281 = arith.constant 0 : index
    %c6_282 = arith.constant 6 : index
    %c0_283 = arith.constant 0 : index
    %c0_284 = arith.constant 0 : index
    %179 = vector.load %arg9[%c0_281, %c6_282, %c0_283, %c0_284] : memref<8x8x8x8xf32, #tpu.memory_space<vmem>>, vector<8x1x1x8xf32>
    %180 = vector.shape_cast %179 : vector<8x1x1x8xf32> to vector<8x8xf32>
    %c0_285 = arith.constant 0 : index
    %c6_286 = arith.constant 6 : index
    %c1_287 = arith.constant 1 : index
    %c0_288 = arith.constant 0 : index
    %181 = vector.load %arg9[%c0_285, %c6_286, %c1_287, %c0_288] : memref<8x8x8x8xf32, #tpu.memory_space<vmem>>, vector<8x1x1x8xf32>
    %182 = vector.shape_cast %181 : vector<8x1x1x8xf32> to vector<8x8xf32>
    %c0_289 = arith.constant 0 : index
    %c6_290 = arith.constant 6 : index
    %c2_291 = arith.constant 2 : index
    %c0_292 = arith.constant 0 : index
    %183 = vector.load %arg9[%c0_289, %c6_290, %c2_291, %c0_292] : memref<8x8x8x8xf32, #tpu.memory_space<vmem>>, vector<8x1x1x8xf32>
    %184 = vector.shape_cast %183 : vector<8x1x1x8xf32> to vector<8x8xf32>
    %185 = tpu.concatenate %168, %170, %172, %174, %176, %178, %180, %182, %184 in 1 : vector<8x8xf32>, vector<8x8xf32>, vector<8x8xf32>, vector<8x8xf32>, vector<8x8xf32>, vector<8x8xf32>, vector<8x8xf32>, vector<8x8xf32>, vector<8x8xf32> -> vector<8x72xf32>
    %c0_293 = arith.constant 0 : index
    %c0_294 = arith.constant 0 : index
    %186 = vector.load %arg4[%c0_293, %c0_294] : memref<72x16xf32, #tpu.memory_space<vmem>>, vector<72x16xf32>
    %cst_295 = arith.constant dense<0.000000e+00> : vector<8x16xf32>
    %187 = tpu.matmul %185, %186, %cst_295 {dimension_numbers = #tpu.dot_dimension_numbers<[1], [0], [0], [1], [0, 0, 1, 1], [], []>} : vector<8x72xf32>, vector<72x16xf32>, vector<8x16xf32> -> vector<8x16xf32>
    %c0_296 = arith.constant 0 : index
    %c0_297 = arith.constant 0 : index
    %188 = vector.load %arg5[%c0_296, %c0_297] : memref<1x16xf32, #tpu.memory_space<vmem>>, vector<1x16xf32>
    %189 = vector.broadcast %188 : vector<1x16xf32> to vector<8x16xf32>
    %190 = arith.addf %187, %189 : vector<8x16xf32>
    %cst_298 = arith.constant 0.000000e+00 : f32
    %191 = vector.broadcast %cst_298 : f32 to vector<8x16xf32>
    %192 = arith.maximumf %190, %191 : vector<8x16xf32>
    %c0_299 = arith.constant 0 : index
    %c4_300 = arith.constant 4 : index
    %c2_301 = arith.constant 2 : index
    %c0_302 = arith.constant 0 : index
    %193 = vector.load %arg9[%c0_299, %c4_300, %c2_301, %c0_302] : memref<8x8x8x8xf32, #tpu.memory_space<vmem>>, vector<8x1x1x8xf32>
    %194 = vector.shape_cast %193 : vector<8x1x1x8xf32> to vector<8x8xf32>
    %c0_303 = arith.constant 0 : index
    %c4_304 = arith.constant 4 : index
    %c3_305 = arith.constant 3 : index
    %c0_306 = arith.constant 0 : index
    %195 = vector.load %arg9[%c0_303, %c4_304, %c3_305, %c0_306] : memref<8x8x8x8xf32, #tpu.memory_space<vmem>>, vector<8x1x1x8xf32>
    %196 = vector.shape_cast %195 : vector<8x1x1x8xf32> to vector<8x8xf32>
    %c0_307 = arith.constant 0 : index
    %c4_308 = arith.constant 4 : index
    %c4_309 = arith.constant 4 : index
    %c0_310 = arith.constant 0 : index
    %197 = vector.load %arg9[%c0_307, %c4_308, %c4_309, %c0_310] : memref<8x8x8x8xf32, #tpu.memory_space<vmem>>, vector<8x1x1x8xf32>
    %198 = vector.shape_cast %197 : vector<8x1x1x8xf32> to vector<8x8xf32>
    %c0_311 = arith.constant 0 : index
    %c5_312 = arith.constant 5 : index
    %c2_313 = arith.constant 2 : index
    %c0_314 = arith.constant 0 : index
    %199 = vector.load %arg9[%c0_311, %c5_312, %c2_313, %c0_314] : memref<8x8x8x8xf32, #tpu.memory_space<vmem>>, vector<8x1x1x8xf32>
    %200 = vector.shape_cast %199 : vector<8x1x1x8xf32> to vector<8x8xf32>
    %c0_315 = arith.constant 0 : index
    %c5_316 = arith.constant 5 : index
    %c3_317 = arith.constant 3 : index
    %c0_318 = arith.constant 0 : index
    %201 = vector.load %arg9[%c0_315, %c5_316, %c3_317, %c0_318] : memref<8x8x8x8xf32, #tpu.memory_space<vmem>>, vector<8x1x1x8xf32>
    %202 = vector.shape_cast %201 : vector<8x1x1x8xf32> to vector<8x8xf32>
    %c0_319 = arith.constant 0 : index
    %c5_320 = arith.constant 5 : index
    %c4_321 = arith.constant 4 : index
    %c0_322 = arith.constant 0 : index
    %203 = vector.load %arg9[%c0_319, %c5_320, %c4_321, %c0_322] : memref<8x8x8x8xf32, #tpu.memory_space<vmem>>, vector<8x1x1x8xf32>
    %204 = vector.shape_cast %203 : vector<8x1x1x8xf32> to vector<8x8xf32>
    %c0_323 = arith.constant 0 : index
    %c6_324 = arith.constant 6 : index
    %c2_325 = arith.constant 2 : index
    %c0_326 = arith.constant 0 : index
    %205 = vector.load %arg9[%c0_323, %c6_324, %c2_325, %c0_326] : memref<8x8x8x8xf32, #tpu.memory_space<vmem>>, vector<8x1x1x8xf32>
    %206 = vector.shape_cast %205 : vector<8x1x1x8xf32> to vector<8x8xf32>
    %c0_327 = arith.constant 0 : index
    %c6_328 = arith.constant 6 : index
    %c3_329 = arith.constant 3 : index
    %c0_330 = arith.constant 0 : index
    %207 = vector.load %arg9[%c0_327, %c6_328, %c3_329, %c0_330] : memref<8x8x8x8xf32, #tpu.memory_space<vmem>>, vector<8x1x1x8xf32>
    %208 = vector.shape_cast %207 : vector<8x1x1x8xf32> to vector<8x8xf32>
    %c0_331 = arith.constant 0 : index
    %c6_332 = arith.constant 6 : index
    %c4_333 = arith.constant 4 : index
    %c0_334 = arith.constant 0 : index
    %209 = vector.load %arg9[%c0_331, %c6_332, %c4_333, %c0_334] : memref<8x8x8x8xf32, #tpu.memory_space<vmem>>, vector<8x1x1x8xf32>
    %210 = vector.shape_cast %209 : vector<8x1x1x8xf32> to vector<8x8xf32>
    %211 = tpu.concatenate %194, %196, %198, %200, %202, %204, %206, %208, %210 in 1 : vector<8x8xf32>, vector<8x8xf32>, vector<8x8xf32>, vector<8x8xf32>, vector<8x8xf32>, vector<8x8xf32>, vector<8x8xf32>, vector<8x8xf32>, vector<8x8xf32> -> vector<8x72xf32>
    %c0_335 = arith.constant 0 : index
    %c0_336 = arith.constant 0 : index
    %212 = vector.load %arg4[%c0_335, %c0_336] : memref<72x16xf32, #tpu.memory_space<vmem>>, vector<72x16xf32>
    %cst_337 = arith.constant dense<0.000000e+00> : vector<8x16xf32>
    %213 = tpu.matmul %211, %212, %cst_337 {dimension_numbers = #tpu.dot_dimension_numbers<[1], [0], [0], [1], [0, 0, 1, 1], [], []>} : vector<8x72xf32>, vector<72x16xf32>, vector<8x16xf32> -> vector<8x16xf32>
    %c0_338 = arith.constant 0 : index
    %c0_339 = arith.constant 0 : index
    %214 = vector.load %arg5[%c0_338, %c0_339] : memref<1x16xf32, #tpu.memory_space<vmem>>, vector<1x16xf32>
    %215 = vector.broadcast %214 : vector<1x16xf32> to vector<8x16xf32>
    %216 = arith.addf %213, %215 : vector<8x16xf32>
    %cst_340 = arith.constant 0.000000e+00 : f32
    %217 = vector.broadcast %cst_340 : f32 to vector<8x16xf32>
    %218 = arith.maximumf %216, %217 : vector<8x16xf32>
    %c0_341 = arith.constant 0 : index
    %c4_342 = arith.constant 4 : index
    %c4_343 = arith.constant 4 : index
    %c0_344 = arith.constant 0 : index
    %219 = vector.load %arg9[%c0_341, %c4_342, %c4_343, %c0_344] : memref<8x8x8x8xf32, #tpu.memory_space<vmem>>, vector<8x1x1x8xf32>
    %220 = vector.shape_cast %219 : vector<8x1x1x8xf32> to vector<8x8xf32>
    %c0_345 = arith.constant 0 : index
    %c4_346 = arith.constant 4 : index
    %c5_347 = arith.constant 5 : index
    %c0_348 = arith.constant 0 : index
    %221 = vector.load %arg9[%c0_345, %c4_346, %c5_347, %c0_348] : memref<8x8x8x8xf32, #tpu.memory_space<vmem>>, vector<8x1x1x8xf32>
    %222 = vector.shape_cast %221 : vector<8x1x1x8xf32> to vector<8x8xf32>
    %c0_349 = arith.constant 0 : index
    %c4_350 = arith.constant 4 : index
    %c6_351 = arith.constant 6 : index
    %c0_352 = arith.constant 0 : index
    %223 = vector.load %arg9[%c0_349, %c4_350, %c6_351, %c0_352] : memref<8x8x8x8xf32, #tpu.memory_space<vmem>>, vector<8x1x1x8xf32>
    %224 = vector.shape_cast %223 : vector<8x1x1x8xf32> to vector<8x8xf32>
    %c0_353 = arith.constant 0 : index
    %c5_354 = arith.constant 5 : index
    %c4_355 = arith.constant 4 : index
    %c0_356 = arith.constant 0 : index
    %225 = vector.load %arg9[%c0_353, %c5_354, %c4_355, %c0_356] : memref<8x8x8x8xf32, #tpu.memory_space<vmem>>, vector<8x1x1x8xf32>
    %226 = vector.shape_cast %225 : vector<8x1x1x8xf32> to vector<8x8xf32>
    %c0_357 = arith.constant 0 : index
    %c5_358 = arith.constant 5 : index
    %c5_359 = arith.constant 5 : index
    %c0_360 = arith.constant 0 : index
    %227 = vector.load %arg9[%c0_357, %c5_358, %c5_359, %c0_360] : memref<8x8x8x8xf32, #tpu.memory_space<vmem>>, vector<8x1x1x8xf32>
    %228 = vector.shape_cast %227 : vector<8x1x1x8xf32> to vector<8x8xf32>
    %c0_361 = arith.constant 0 : index
    %c5_362 = arith.constant 5 : index
    %c6_363 = arith.constant 6 : index
    %c0_364 = arith.constant 0 : index
    %229 = vector.load %arg9[%c0_361, %c5_362, %c6_363, %c0_364] : memref<8x8x8x8xf32, #tpu.memory_space<vmem>>, vector<8x1x1x8xf32>
    %230 = vector.shape_cast %229 : vector<8x1x1x8xf32> to vector<8x8xf32>
    %c0_365 = arith.constant 0 : index
    %c6_366 = arith.constant 6 : index
    %c4_367 = arith.constant 4 : index
    %c0_368 = arith.constant 0 : index
    %231 = vector.load %arg9[%c0_365, %c6_366, %c4_367, %c0_368] : memref<8x8x8x8xf32, #tpu.memory_space<vmem>>, vector<8x1x1x8xf32>
    %232 = vector.shape_cast %231 : vector<8x1x1x8xf32> to vector<8x8xf32>
    %c0_369 = arith.constant 0 : index
    %c6_370 = arith.constant 6 : index
    %c5_371 = arith.constant 5 : index
    %c0_372 = arith.constant 0 : index
    %233 = vector.load %arg9[%c0_369, %c6_370, %c5_371, %c0_372] : memref<8x8x8x8xf32, #tpu.memory_space<vmem>>, vector<8x1x1x8xf32>
    %234 = vector.shape_cast %233 : vector<8x1x1x8xf32> to vector<8x8xf32>
    %c0_373 = arith.constant 0 : index
    %c6_374 = arith.constant 6 : index
    %c6_375 = arith.constant 6 : index
    %c0_376 = arith.constant 0 : index
    %235 = vector.load %arg9[%c0_373, %c6_374, %c6_375, %c0_376] : memref<8x8x8x8xf32, #tpu.memory_space<vmem>>, vector<8x1x1x8xf32>
    %236 = vector.shape_cast %235 : vector<8x1x1x8xf32> to vector<8x8xf32>
    %237 = tpu.concatenate %220, %222, %224, %226, %228, %230, %232, %234, %236 in 1 : vector<8x8xf32>, vector<8x8xf32>, vector<8x8xf32>, vector<8x8xf32>, vector<8x8xf32>, vector<8x8xf32>, vector<8x8xf32>, vector<8x8xf32>, vector<8x8xf32> -> vector<8x72xf32>
    %c0_377 = arith.constant 0 : index
    %c0_378 = arith.constant 0 : index
    %238 = vector.load %arg4[%c0_377, %c0_378] : memref<72x16xf32, #tpu.memory_space<vmem>>, vector<72x16xf32>
    %cst_379 = arith.constant dense<0.000000e+00> : vector<8x16xf32>
    %239 = tpu.matmul %237, %238, %cst_379 {dimension_numbers = #tpu.dot_dimension_numbers<[1], [0], [0], [1], [0, 0, 1, 1], [], []>} : vector<8x72xf32>, vector<72x16xf32>, vector<8x16xf32> -> vector<8x16xf32>
    %c0_380 = arith.constant 0 : index
    %c0_381 = arith.constant 0 : index
    %240 = vector.load %arg5[%c0_380, %c0_381] : memref<1x16xf32, #tpu.memory_space<vmem>>, vector<1x16xf32>
    %241 = vector.broadcast %240 : vector<1x16xf32> to vector<8x16xf32>
    %242 = arith.addf %239, %241 : vector<8x16xf32>
    %cst_382 = arith.constant 0.000000e+00 : f32
    %243 = vector.broadcast %cst_382 : f32 to vector<8x16xf32>
    %244 = arith.maximumf %242, %243 : vector<8x16xf32>
    %245 = tpu.concatenate %36, %62, %88, %114, %140, %166, %192, %218, %244 in 1 : vector<8x16xf32>, vector<8x16xf32>, vector<8x16xf32>, vector<8x16xf32>, vector<8x16xf32>, vector<8x16xf32>, vector<8x16xf32>, vector<8x16xf32>, vector<8x16xf32> -> vector<8x144xf32>
    %c0_383 = arith.constant 0 : index
    %c0_384 = arith.constant 0 : index
    %246 = vector.load %arg6[%c0_383, %c0_384] : memref<144x128xf32, #tpu.memory_space<vmem>>, vector<144x128xf32>
    %cst_385 = arith.constant dense<0.000000e+00> : vector<8x128xf32>
    %247 = tpu.matmul %245, %246, %cst_385 {dimension_numbers = #tpu.dot_dimension_numbers<[1], [0], [0], [1], [0, 0, 1, 1], [], []>} : vector<8x144xf32>, vector<144x128xf32>, vector<8x128xf32> -> vector<8x128xf32>
    %c0_386 = arith.constant 0 : index
    %c0_387 = arith.constant 0 : index
    %248 = vector.load %arg7[%c0_386, %c0_387] : memref<1x128xf32, #tpu.memory_space<vmem>>, vector<1x128xf32>
    %249 = vector.broadcast %248 : vector<1x128xf32> to vector<8x128xf32>
    %250 = arith.addf %247, %249 : vector<8x128xf32>
    %c0_388 = arith.constant 0 : index
    %c0_389 = arith.constant 0 : index
    %251 = vector.load %arg8[%c0_388, %c0_389] : memref<8x128xf32, #tpu.memory_space<vmem>>, vector<8x128xf32>
    tpu.vector_store %arg8[%c0_388, %c0_389], %250 {strides = array<i32>} : memref<8x128xf32, #tpu.memory_space<vmem>>, vector<8x128xf32>,
    return
  }
  func.func @transform_0(%arg0: i32) -> (i32, i32, i32) {
    %c0_i32 = arith.constant 0 : i32
    %c0_i32_0 = arith.constant 0 : i32
    %c0_i32_1 = arith.constant 0 : i32
    return %arg0, %c0_i32, %c0_i32_0 : i32, i32, i32
  }
  func.func @transform_1(%arg0: i32) -> (i32, i32) {
    %c0_i32 = arith.constant 0 : i32
    %c0_i32_0 = arith.constant 0 : i32
    %c0_i32_1 = arith.constant 0 : i32
    return %c0_i32, %c0_i32_0 : i32, i32
  }
  func.func @transform_2(%arg0: i32) -> (i32, i32) {
    %c0_i32 = arith.constant 0 : i32
    %c0_i32_0 = arith.constant 0 : i32
    %c0_i32_1 = arith.constant 0 : i32
    return %c0_i32, %c0_i32_0 : i32, i32
  }
  func.func @transform_3(%arg0: i32) -> (i32, i32) {
    %c0_i32 = arith.constant 0 : i32
    %c0_i32_0 = arith.constant 0 : i32
    %c0_i32_1 = arith.constant 0 : i32
    return %c0_i32, %c0_i32_0 : i32, i32
  }
  func.func @transform_4(%arg0: i32) -> (i32, i32) {
    %c0_i32 = arith.constant 0 : i32
    %c0_i32_0 = arith.constant 0 : i32
    %c0_i32_1 = arith.constant 0 : i32
    return %c0_i32, %c0_i32_0 : i32, i32
  }
  func.func @transform_5(%arg0: i32) -> (i32, i32) {
    %c0_i32 = arith.constant 0 : i32
    %c0_i32_0 = arith.constant 0 : i32
    %c0_i32_1 = arith.constant 0 : i32
    return %c0_i32, %c0_i32_0 : i32, i32
  }
  func.func @transform_6(%arg0: i32) -> (i32, i32) {
    %c0_i32 = arith.constant 0 : i32
    %c0_i32_0 = arith.constant 0 : i32
    %c0_i32_1 = arith.constant 0 : i32
    return %c0_i32, %c0_i32_0 : i32, i32
  }
  func.func @transform_7(%arg0: i32) -> (i32, i32) {
    %c0_i32 = arith.constant 0 : i32
    %c0_i32_0 = arith.constant 0 : i32
    return %arg0, %c0_i32 : i32, i32
  }
}

module attributes {stable_mosaic.version = 11 : i64} {
  func.func @_lstm_head_kernel(%arg0: i32, %arg1: memref<8x2x128xf32, #tpu.memory_space<vmem>>, %arg2: memref<32x128xf32, #tpu.memory_space<vmem>>, %arg3: memref<1x32xf32, #tpu.memory_space<vmem>>, %arg4: memref<1x1xf32, #tpu.memory_space<vmem>>, %arg5: memref<8x2x1xf32, #tpu.memory_space<vmem>>) attributes {dimension_semantics = [#tpu.dimension_semantics<arbitrary>], iteration_bounds = array<i64: 1>, scalar_prefetch = 0 : i64, scratch_operands = 0 : i64, tpu.core_type = #tpu.core_type<tc>, window_params = [{pipeline_mode = #tpu.pipeline_mode<synchronous>, transform_indices = @transform_0, window_bounds = array<i64: 8, 2, 128>}, {pipeline_mode = #tpu.pipeline_mode<synchronous>, transform_indices = @transform_1, window_bounds = array<i64: 32, 128>}, {pipeline_mode = #tpu.pipeline_mode<synchronous>, transform_indices = @transform_2, window_bounds = array<i64: 1, 32>}, {pipeline_mode = #tpu.pipeline_mode<synchronous>, transform_indices = @transform_3, window_bounds = array<i64: 1, 1>}, {pipeline_mode = #tpu.pipeline_mode<synchronous>, transform_indices = @transform_4, window_bounds = array<i64: 8, 2, 1>}]} {
    %c0 = arith.constant 0 : index
    %c0_0 = arith.constant 0 : index
    %0 = vector.load %arg2[%c0, %c0_0] : memref<32x128xf32, #tpu.memory_space<vmem>>, vector<32x128xf32>
    %c0_1 = arith.constant 0 : index
    %c0_2 = arith.constant 0 : index
    %1 = vector.load %arg3[%c0_1, %c0_2] : memref<1x32xf32, #tpu.memory_space<vmem>>, vector<1x32xf32>
    %c0_3 = arith.constant 0 : index
    %c0_4 = arith.constant 0 : index
    %2 = vector.load %arg4[%c0_3, %c0_4] : memref<1x1xf32, #tpu.memory_space<vmem>>, vector<1x1xf32>
    %cst = arith.constant 0.000000e+00 : f32
    %3 = vector.broadcast %cst : f32 to vector<2x32xf32>
    %cst_5 = arith.constant 0.000000e+00 : f32
    %4 = vector.broadcast %cst_5 : f32 to vector<2x32xf32>
    %c0_6 = arith.constant 0 : index
    %c0_7 = arith.constant 0 : index
    %c0_8 = arith.constant 0 : index
    %5 = vector.load %arg1[%c0_6, %c0_7, %c0_8] : memref<8x2x128xf32, #tpu.memory_space<vmem>>, vector<1x2x128xf32>
    %6 = vector.shape_cast %5 : vector<1x2x128xf32> to vector<2x128xf32>
    %cst_9 = arith.constant dense<0.000000e+00> : vector<2x128xf32>
    %7 = tpu.matmul %3, %0, %cst_9 {dimension_numbers = #tpu.dot_dimension_numbers<[1], [0], [0], [1], [0, 0, 1, 1], [], []>} : vector<2x32xf32>, vector<32x128xf32>, vector<2x128xf32> -> vector<2x128xf32>
    %8 = arith.addf %6, %7 : vector<2x128xf32>
    %9 = vector.extract_strided_slice %8 {offsets = [0, 0], sizes = [2, 32], strides = [1, 1]} : vector<2x128xf32> to vector<2x32xf32>
    %10 = arith.negf %9 : vector<2x32xf32>
    %11 = math.exp %10 : vector<2x32xf32>
    %cst_10 = arith.constant 1.000000e+00 : f32
    %12 = vector.broadcast %cst_10 : f32 to vector<2x32xf32>
    %13 = arith.addf %12, %11 : vector<2x32xf32>
    %14 = arith.divf %12, %13 : vector<2x32xf32>
    %15 = vector.extract_strided_slice %8 {offsets = [0, 32], sizes = [2, 32], strides = [1, 1]} : vector<2x128xf32> to vector<2x32xf32>
    %16 = arith.negf %15 : vector<2x32xf32>
    %17 = math.exp %16 : vector<2x32xf32>
    %cst_11 = arith.constant 1.000000e+00 : f32
    %18 = vector.broadcast %cst_11 : f32 to vector<2x32xf32>
    %19 = arith.addf %18, %17 : vector<2x32xf32>
    %20 = arith.divf %18, %19 : vector<2x32xf32>
    %21 = vector.extract_strided_slice %8 {offsets = [0, 64], sizes = [2, 32], strides = [1, 1]} : vector<2x128xf32> to vector<2x32xf32>
    %22 = math.tanh %21 : vector<2x32xf32>
    %23 = vector.extract_strided_slice %8 {offsets = [0, 96], sizes = [2, 32], strides = [1, 1]} : vector<2x128xf32> to vector<2x32xf32>
    %24 = arith.negf %23 : vector<2x32xf32>
    %25 = math.exp %24 : vector<2x32xf32>
    %cst_12 = arith.constant 1.000000e+00 : f32
    %26 = vector.broadcast %cst_12 : f32 to vector<2x32xf32>
    %27 = arith.addf %26, %25 : vector<2x32xf32>
    %28 = arith.divf %26, %27 : vector<2x32xf32>
    %29 = arith.mulf %20, %4 : vector<2x32xf32>
    %30 = arith.mulf %14, %22 : vector<2x32xf32>
    %31 = arith.addf %29, %30 : vector<2x32xf32>
    %32 = math.tanh %31 : vector<2x32xf32>
    %33 = arith.mulf %28, %32 : vector<2x32xf32>
    %34 = vector.broadcast %1 : vector<1x32xf32> to vector<2x32xf32>
    %35 = arith.mulf %33, %34 : vector<2x32xf32>
    %cst_13 = arith.constant dense<0.000000e+00> : vector<2xf32>
    %36 = vector.multi_reduction <add>, %35, %cst_13 [1] : vector<2x32xf32> to vector<2xf32>
    %37 = vector.shape_cast %36 : vector<2xf32> to vector<2x1xf32>
    %38 = vector.broadcast %2 : vector<1x1xf32> to vector<2x1xf32>
    %39 = arith.addf %37, %38 : vector<2x1xf32>
    %c0_14 = arith.constant 0 : index
    %c0_15 = arith.constant 0 : index
    %c0_16 = arith.constant 0 : index
    %40 = vector.load %arg5[%c0_14, %c0_15, %c0_16] : memref<8x2x1xf32, #tpu.memory_space<vmem>>, vector<1x2x1xf32>
    %41 = vector.shape_cast %40 : vector<1x2x1xf32> to vector<2x1xf32>
    %42 = vector.shape_cast %39 : vector<2x1xf32> to vector<1x2x1xf32>
    tpu.vector_store %arg5[%c0_14, %c0_15, %c0_16], %42 {strides = array<i32>} : memref<8x2x1xf32, #tpu.memory_space<vmem>>, vector<1x2x1xf32>,
    %c1 = arith.constant 1 : index
    %c0_17 = arith.constant 0 : index
    %c0_18 = arith.constant 0 : index
    %43 = vector.load %arg1[%c1, %c0_17, %c0_18] : memref<8x2x128xf32, #tpu.memory_space<vmem>>, vector<1x2x128xf32>
    %44 = vector.shape_cast %43 : vector<1x2x128xf32> to vector<2x128xf32>
    %cst_19 = arith.constant dense<0.000000e+00> : vector<2x128xf32>
    %45 = tpu.matmul %33, %0, %cst_19 {dimension_numbers = #tpu.dot_dimension_numbers<[1], [0], [0], [1], [0, 0, 1, 1], [], []>} : vector<2x32xf32>, vector<32x128xf32>, vector<2x128xf32> -> vector<2x128xf32>
    %46 = arith.addf %44, %45 : vector<2x128xf32>
    %47 = vector.extract_strided_slice %46 {offsets = [0, 0], sizes = [2, 32], strides = [1, 1]} : vector<2x128xf32> to vector<2x32xf32>
    %48 = arith.negf %47 : vector<2x32xf32>
    %49 = math.exp %48 : vector<2x32xf32>
    %cst_20 = arith.constant 1.000000e+00 : f32
    %50 = vector.broadcast %cst_20 : f32 to vector<2x32xf32>
    %51 = arith.addf %50, %49 : vector<2x32xf32>
    %52 = arith.divf %50, %51 : vector<2x32xf32>
    %53 = vector.extract_strided_slice %46 {offsets = [0, 32], sizes = [2, 32], strides = [1, 1]} : vector<2x128xf32> to vector<2x32xf32>
    %54 = arith.negf %53 : vector<2x32xf32>
    %55 = math.exp %54 : vector<2x32xf32>
    %cst_21 = arith.constant 1.000000e+00 : f32
    %56 = vector.broadcast %cst_21 : f32 to vector<2x32xf32>
    %57 = arith.addf %56, %55 : vector<2x32xf32>
    %58 = arith.divf %56, %57 : vector<2x32xf32>
    %59 = vector.extract_strided_slice %46 {offsets = [0, 64], sizes = [2, 32], strides = [1, 1]} : vector<2x128xf32> to vector<2x32xf32>
    %60 = math.tanh %59 : vector<2x32xf32>
    %61 = vector.extract_strided_slice %46 {offsets = [0, 96], sizes = [2, 32], strides = [1, 1]} : vector<2x128xf32> to vector<2x32xf32>
    %62 = arith.negf %61 : vector<2x32xf32>
    %63 = math.exp %62 : vector<2x32xf32>
    %cst_22 = arith.constant 1.000000e+00 : f32
    %64 = vector.broadcast %cst_22 : f32 to vector<2x32xf32>
    %65 = arith.addf %64, %63 : vector<2x32xf32>
    %66 = arith.divf %64, %65 : vector<2x32xf32>
    %67 = arith.mulf %58, %31 : vector<2x32xf32>
    %68 = arith.mulf %52, %60 : vector<2x32xf32>
    %69 = arith.addf %67, %68 : vector<2x32xf32>
    %70 = math.tanh %69 : vector<2x32xf32>
    %71 = arith.mulf %66, %70 : vector<2x32xf32>
    %72 = vector.broadcast %1 : vector<1x32xf32> to vector<2x32xf32>
    %73 = arith.mulf %71, %72 : vector<2x32xf32>
    %cst_23 = arith.constant dense<0.000000e+00> : vector<2xf32>
    %74 = vector.multi_reduction <add>, %73, %cst_23 [1] : vector<2x32xf32> to vector<2xf32>
    %75 = vector.shape_cast %74 : vector<2xf32> to vector<2x1xf32>
    %76 = vector.broadcast %2 : vector<1x1xf32> to vector<2x1xf32>
    %77 = arith.addf %75, %76 : vector<2x1xf32>
    %c1_24 = arith.constant 1 : index
    %c0_25 = arith.constant 0 : index
    %c0_26 = arith.constant 0 : index
    %78 = vector.load %arg5[%c1_24, %c0_25, %c0_26] : memref<8x2x1xf32, #tpu.memory_space<vmem>>, vector<1x2x1xf32>
    %79 = vector.shape_cast %78 : vector<1x2x1xf32> to vector<2x1xf32>
    %80 = vector.shape_cast %77 : vector<2x1xf32> to vector<1x2x1xf32>
    tpu.vector_store %arg5[%c1_24, %c0_25, %c0_26], %80 {strides = array<i32>} : memref<8x2x1xf32, #tpu.memory_space<vmem>>, vector<1x2x1xf32>,
    %c2 = arith.constant 2 : index
    %c0_27 = arith.constant 0 : index
    %c0_28 = arith.constant 0 : index
    %81 = vector.load %arg1[%c2, %c0_27, %c0_28] : memref<8x2x128xf32, #tpu.memory_space<vmem>>, vector<1x2x128xf32>
    %82 = vector.shape_cast %81 : vector<1x2x128xf32> to vector<2x128xf32>
    %cst_29 = arith.constant dense<0.000000e+00> : vector<2x128xf32>
    %83 = tpu.matmul %71, %0, %cst_29 {dimension_numbers = #tpu.dot_dimension_numbers<[1], [0], [0], [1], [0, 0, 1, 1], [], []>} : vector<2x32xf32>, vector<32x128xf32>, vector<2x128xf32> -> vector<2x128xf32>
    %84 = arith.addf %82, %83 : vector<2x128xf32>
    %85 = vector.extract_strided_slice %84 {offsets = [0, 0], sizes = [2, 32], strides = [1, 1]} : vector<2x128xf32> to vector<2x32xf32>
    %86 = arith.negf %85 : vector<2x32xf32>
    %87 = math.exp %86 : vector<2x32xf32>
    %cst_30 = arith.constant 1.000000e+00 : f32
    %88 = vector.broadcast %cst_30 : f32 to vector<2x32xf32>
    %89 = arith.addf %88, %87 : vector<2x32xf32>
    %90 = arith.divf %88, %89 : vector<2x32xf32>
    %91 = vector.extract_strided_slice %84 {offsets = [0, 32], sizes = [2, 32], strides = [1, 1]} : vector<2x128xf32> to vector<2x32xf32>
    %92 = arith.negf %91 : vector<2x32xf32>
    %93 = math.exp %92 : vector<2x32xf32>
    %cst_31 = arith.constant 1.000000e+00 : f32
    %94 = vector.broadcast %cst_31 : f32 to vector<2x32xf32>
    %95 = arith.addf %94, %93 : vector<2x32xf32>
    %96 = arith.divf %94, %95 : vector<2x32xf32>
    %97 = vector.extract_strided_slice %84 {offsets = [0, 64], sizes = [2, 32], strides = [1, 1]} : vector<2x128xf32> to vector<2x32xf32>
    %98 = math.tanh %97 : vector<2x32xf32>
    %99 = vector.extract_strided_slice %84 {offsets = [0, 96], sizes = [2, 32], strides = [1, 1]} : vector<2x128xf32> to vector<2x32xf32>
    %100 = arith.negf %99 : vector<2x32xf32>
    %101 = math.exp %100 : vector<2x32xf32>
    %cst_32 = arith.constant 1.000000e+00 : f32
    %102 = vector.broadcast %cst_32 : f32 to vector<2x32xf32>
    %103 = arith.addf %102, %101 : vector<2x32xf32>
    %104 = arith.divf %102, %103 : vector<2x32xf32>
    %105 = arith.mulf %96, %69 : vector<2x32xf32>
    %106 = arith.mulf %90, %98 : vector<2x32xf32>
    %107 = arith.addf %105, %106 : vector<2x32xf32>
    %108 = math.tanh %107 : vector<2x32xf32>
    %109 = arith.mulf %104, %108 : vector<2x32xf32>
    %110 = vector.broadcast %1 : vector<1x32xf32> to vector<2x32xf32>
    %111 = arith.mulf %109, %110 : vector<2x32xf32>
    %cst_33 = arith.constant dense<0.000000e+00> : vector<2xf32>
    %112 = vector.multi_reduction <add>, %111, %cst_33 [1] : vector<2x32xf32> to vector<2xf32>
    %113 = vector.shape_cast %112 : vector<2xf32> to vector<2x1xf32>
    %114 = vector.broadcast %2 : vector<1x1xf32> to vector<2x1xf32>
    %115 = arith.addf %113, %114 : vector<2x1xf32>
    %c2_34 = arith.constant 2 : index
    %c0_35 = arith.constant 0 : index
    %c0_36 = arith.constant 0 : index
    %116 = vector.load %arg5[%c2_34, %c0_35, %c0_36] : memref<8x2x1xf32, #tpu.memory_space<vmem>>, vector<1x2x1xf32>
    %117 = vector.shape_cast %116 : vector<1x2x1xf32> to vector<2x1xf32>
    %118 = vector.shape_cast %115 : vector<2x1xf32> to vector<1x2x1xf32>
    tpu.vector_store %arg5[%c2_34, %c0_35, %c0_36], %118 {strides = array<i32>} : memref<8x2x1xf32, #tpu.memory_space<vmem>>, vector<1x2x1xf32>,
    %c3 = arith.constant 3 : index
    %c0_37 = arith.constant 0 : index
    %c0_38 = arith.constant 0 : index
    %119 = vector.load %arg1[%c3, %c0_37, %c0_38] : memref<8x2x128xf32, #tpu.memory_space<vmem>>, vector<1x2x128xf32>
    %120 = vector.shape_cast %119 : vector<1x2x128xf32> to vector<2x128xf32>
    %cst_39 = arith.constant dense<0.000000e+00> : vector<2x128xf32>
    %121 = tpu.matmul %109, %0, %cst_39 {dimension_numbers = #tpu.dot_dimension_numbers<[1], [0], [0], [1], [0, 0, 1, 1], [], []>} : vector<2x32xf32>, vector<32x128xf32>, vector<2x128xf32> -> vector<2x128xf32>
    %122 = arith.addf %120, %121 : vector<2x128xf32>
    %123 = vector.extract_strided_slice %122 {offsets = [0, 0], sizes = [2, 32], strides = [1, 1]} : vector<2x128xf32> to vector<2x32xf32>
    %124 = arith.negf %123 : vector<2x32xf32>
    %125 = math.exp %124 : vector<2x32xf32>
    %cst_40 = arith.constant 1.000000e+00 : f32
    %126 = vector.broadcast %cst_40 : f32 to vector<2x32xf32>
    %127 = arith.addf %126, %125 : vector<2x32xf32>
    %128 = arith.divf %126, %127 : vector<2x32xf32>
    %129 = vector.extract_strided_slice %122 {offsets = [0, 32], sizes = [2, 32], strides = [1, 1]} : vector<2x128xf32> to vector<2x32xf32>
    %130 = arith.negf %129 : vector<2x32xf32>
    %131 = math.exp %130 : vector<2x32xf32>
    %cst_41 = arith.constant 1.000000e+00 : f32
    %132 = vector.broadcast %cst_41 : f32 to vector<2x32xf32>
    %133 = arith.addf %132, %131 : vector<2x32xf32>
    %134 = arith.divf %132, %133 : vector<2x32xf32>
    %135 = vector.extract_strided_slice %122 {offsets = [0, 64], sizes = [2, 32], strides = [1, 1]} : vector<2x128xf32> to vector<2x32xf32>
    %136 = math.tanh %135 : vector<2x32xf32>
    %137 = vector.extract_strided_slice %122 {offsets = [0, 96], sizes = [2, 32], strides = [1, 1]} : vector<2x128xf32> to vector<2x32xf32>
    %138 = arith.negf %137 : vector<2x32xf32>
    %139 = math.exp %138 : vector<2x32xf32>
    %cst_42 = arith.constant 1.000000e+00 : f32
    %140 = vector.broadcast %cst_42 : f32 to vector<2x32xf32>
    %141 = arith.addf %140, %139 : vector<2x32xf32>
    %142 = arith.divf %140, %141 : vector<2x32xf32>
    %143 = arith.mulf %134, %107 : vector<2x32xf32>
    %144 = arith.mulf %128, %136 : vector<2x32xf32>
    %145 = arith.addf %143, %144 : vector<2x32xf32>
    %146 = math.tanh %145 : vector<2x32xf32>
    %147 = arith.mulf %142, %146 : vector<2x32xf32>
    %148 = vector.broadcast %1 : vector<1x32xf32> to vector<2x32xf32>
    %149 = arith.mulf %147, %148 : vector<2x32xf32>
    %cst_43 = arith.constant dense<0.000000e+00> : vector<2xf32>
    %150 = vector.multi_reduction <add>, %149, %cst_43 [1] : vector<2x32xf32> to vector<2xf32>
    %151 = vector.shape_cast %150 : vector<2xf32> to vector<2x1xf32>
    %152 = vector.broadcast %2 : vector<1x1xf32> to vector<2x1xf32>
    %153 = arith.addf %151, %152 : vector<2x1xf32>
    %c3_44 = arith.constant 3 : index
    %c0_45 = arith.constant 0 : index
    %c0_46 = arith.constant 0 : index
    %154 = vector.load %arg5[%c3_44, %c0_45, %c0_46] : memref<8x2x1xf32, #tpu.memory_space<vmem>>, vector<1x2x1xf32>
    %155 = vector.shape_cast %154 : vector<1x2x1xf32> to vector<2x1xf32>
    %156 = vector.shape_cast %153 : vector<2x1xf32> to vector<1x2x1xf32>
    tpu.vector_store %arg5[%c3_44, %c0_45, %c0_46], %156 {strides = array<i32>} : memref<8x2x1xf32, #tpu.memory_space<vmem>>, vector<1x2x1xf32>,
    %c4 = arith.constant 4 : index
    %c0_47 = arith.constant 0 : index
    %c0_48 = arith.constant 0 : index
    %157 = vector.load %arg1[%c4, %c0_47, %c0_48] : memref<8x2x128xf32, #tpu.memory_space<vmem>>, vector<1x2x128xf32>
    %158 = vector.shape_cast %157 : vector<1x2x128xf32> to vector<2x128xf32>
    %cst_49 = arith.constant dense<0.000000e+00> : vector<2x128xf32>
    %159 = tpu.matmul %147, %0, %cst_49 {dimension_numbers = #tpu.dot_dimension_numbers<[1], [0], [0], [1], [0, 0, 1, 1], [], []>} : vector<2x32xf32>, vector<32x128xf32>, vector<2x128xf32> -> vector<2x128xf32>
    %160 = arith.addf %158, %159 : vector<2x128xf32>
    %161 = vector.extract_strided_slice %160 {offsets = [0, 0], sizes = [2, 32], strides = [1, 1]} : vector<2x128xf32> to vector<2x32xf32>
    %162 = arith.negf %161 : vector<2x32xf32>
    %163 = math.exp %162 : vector<2x32xf32>
    %cst_50 = arith.constant 1.000000e+00 : f32
    %164 = vector.broadcast %cst_50 : f32 to vector<2x32xf32>
    %165 = arith.addf %164, %163 : vector<2x32xf32>
    %166 = arith.divf %164, %165 : vector<2x32xf32>
    %167 = vector.extract_strided_slice %160 {offsets = [0, 32], sizes = [2, 32], strides = [1, 1]} : vector<2x128xf32> to vector<2x32xf32>
    %168 = arith.negf %167 : vector<2x32xf32>
    %169 = math.exp %168 : vector<2x32xf32>
    %cst_51 = arith.constant 1.000000e+00 : f32
    %170 = vector.broadcast %cst_51 : f32 to vector<2x32xf32>
    %171 = arith.addf %170, %169 : vector<2x32xf32>
    %172 = arith.divf %170, %171 : vector<2x32xf32>
    %173 = vector.extract_strided_slice %160 {offsets = [0, 64], sizes = [2, 32], strides = [1, 1]} : vector<2x128xf32> to vector<2x32xf32>
    %174 = math.tanh %173 : vector<2x32xf32>
    %175 = vector.extract_strided_slice %160 {offsets = [0, 96], sizes = [2, 32], strides = [1, 1]} : vector<2x128xf32> to vector<2x32xf32>
    %176 = arith.negf %175 : vector<2x32xf32>
    %177 = math.exp %176 : vector<2x32xf32>
    %cst_52 = arith.constant 1.000000e+00 : f32
    %178 = vector.broadcast %cst_52 : f32 to vector<2x32xf32>
    %179 = arith.addf %178, %177 : vector<2x32xf32>
    %180 = arith.divf %178, %179 : vector<2x32xf32>
    %181 = arith.mulf %172, %145 : vector<2x32xf32>
    %182 = arith.mulf %166, %174 : vector<2x32xf32>
    %183 = arith.addf %181, %182 : vector<2x32xf32>
    %184 = math.tanh %183 : vector<2x32xf32>
    %185 = arith.mulf %180, %184 : vector<2x32xf32>
    %186 = vector.broadcast %1 : vector<1x32xf32> to vector<2x32xf32>
    %187 = arith.mulf %185, %186 : vector<2x32xf32>
    %cst_53 = arith.constant dense<0.000000e+00> : vector<2xf32>
    %188 = vector.multi_reduction <add>, %187, %cst_53 [1] : vector<2x32xf32> to vector<2xf32>
    %189 = vector.shape_cast %188 : vector<2xf32> to vector<2x1xf32>
    %190 = vector.broadcast %2 : vector<1x1xf32> to vector<2x1xf32>
    %191 = arith.addf %189, %190 : vector<2x1xf32>
    %c4_54 = arith.constant 4 : index
    %c0_55 = arith.constant 0 : index
    %c0_56 = arith.constant 0 : index
    %192 = vector.load %arg5[%c4_54, %c0_55, %c0_56] : memref<8x2x1xf32, #tpu.memory_space<vmem>>, vector<1x2x1xf32>
    %193 = vector.shape_cast %192 : vector<1x2x1xf32> to vector<2x1xf32>
    %194 = vector.shape_cast %191 : vector<2x1xf32> to vector<1x2x1xf32>
    tpu.vector_store %arg5[%c4_54, %c0_55, %c0_56], %194 {strides = array<i32>} : memref<8x2x1xf32, #tpu.memory_space<vmem>>, vector<1x2x1xf32>,
    %c5 = arith.constant 5 : index
    %c0_57 = arith.constant 0 : index
    %c0_58 = arith.constant 0 : index
    %195 = vector.load %arg1[%c5, %c0_57, %c0_58] : memref<8x2x128xf32, #tpu.memory_space<vmem>>, vector<1x2x128xf32>
    %196 = vector.shape_cast %195 : vector<1x2x128xf32> to vector<2x128xf32>
    %cst_59 = arith.constant dense<0.000000e+00> : vector<2x128xf32>
    %197 = tpu.matmul %185, %0, %cst_59 {dimension_numbers = #tpu.dot_dimension_numbers<[1], [0], [0], [1], [0, 0, 1, 1], [], []>} : vector<2x32xf32>, vector<32x128xf32>, vector<2x128xf32> -> vector<2x128xf32>
    %198 = arith.addf %196, %197 : vector<2x128xf32>
    %199 = vector.extract_strided_slice %198 {offsets = [0, 0], sizes = [2, 32], strides = [1, 1]} : vector<2x128xf32> to vector<2x32xf32>
    %200 = arith.negf %199 : vector<2x32xf32>
    %201 = math.exp %200 : vector<2x32xf32>
    %cst_60 = arith.constant 1.000000e+00 : f32
    %202 = vector.broadcast %cst_60 : f32 to vector<2x32xf32>
    %203 = arith.addf %202, %201 : vector<2x32xf32>
    %204 = arith.divf %202, %203 : vector<2x32xf32>
    %205 = vector.extract_strided_slice %198 {offsets = [0, 32], sizes = [2, 32], strides = [1, 1]} : vector<2x128xf32> to vector<2x32xf32>
    %206 = arith.negf %205 : vector<2x32xf32>
    %207 = math.exp %206 : vector<2x32xf32>
    %cst_61 = arith.constant 1.000000e+00 : f32
    %208 = vector.broadcast %cst_61 : f32 to vector<2x32xf32>
    %209 = arith.addf %208, %207 : vector<2x32xf32>
    %210 = arith.divf %208, %209 : vector<2x32xf32>
    %211 = vector.extract_strided_slice %198 {offsets = [0, 64], sizes = [2, 32], strides = [1, 1]} : vector<2x128xf32> to vector<2x32xf32>
    %212 = math.tanh %211 : vector<2x32xf32>
    %213 = vector.extract_strided_slice %198 {offsets = [0, 96], sizes = [2, 32], strides = [1, 1]} : vector<2x128xf32> to vector<2x32xf32>
    %214 = arith.negf %213 : vector<2x32xf32>
    %215 = math.exp %214 : vector<2x32xf32>
    %cst_62 = arith.constant 1.000000e+00 : f32
    %216 = vector.broadcast %cst_62 : f32 to vector<2x32xf32>
    %217 = arith.addf %216, %215 : vector<2x32xf32>
    %218 = arith.divf %216, %217 : vector<2x32xf32>
    %219 = arith.mulf %210, %183 : vector<2x32xf32>
    %220 = arith.mulf %204, %212 : vector<2x32xf32>
    %221 = arith.addf %219, %220 : vector<2x32xf32>
    %222 = math.tanh %221 : vector<2x32xf32>
    %223 = arith.mulf %218, %222 : vector<2x32xf32>
    %224 = vector.broadcast %1 : vector<1x32xf32> to vector<2x32xf32>
    %225 = arith.mulf %223, %224 : vector<2x32xf32>
    %cst_63 = arith.constant dense<0.000000e+00> : vector<2xf32>
    %226 = vector.multi_reduction <add>, %225, %cst_63 [1] : vector<2x32xf32> to vector<2xf32>
    %227 = vector.shape_cast %226 : vector<2xf32> to vector<2x1xf32>
    %228 = vector.broadcast %2 : vector<1x1xf32> to vector<2x1xf32>
    %229 = arith.addf %227, %228 : vector<2x1xf32>
    %c5_64 = arith.constant 5 : index
    %c0_65 = arith.constant 0 : index
    %c0_66 = arith.constant 0 : index
    %230 = vector.load %arg5[%c5_64, %c0_65, %c0_66] : memref<8x2x1xf32, #tpu.memory_space<vmem>>, vector<1x2x1xf32>
    %231 = vector.shape_cast %230 : vector<1x2x1xf32> to vector<2x1xf32>
    %232 = vector.shape_cast %229 : vector<2x1xf32> to vector<1x2x1xf32>
    tpu.vector_store %arg5[%c5_64, %c0_65, %c0_66], %232 {strides = array<i32>} : memref<8x2x1xf32, #tpu.memory_space<vmem>>, vector<1x2x1xf32>,
    %c6 = arith.constant 6 : index
    %c0_67 = arith.constant 0 : index
    %c0_68 = arith.constant 0 : index
    %233 = vector.load %arg1[%c6, %c0_67, %c0_68] : memref<8x2x128xf32, #tpu.memory_space<vmem>>, vector<1x2x128xf32>
    %234 = vector.shape_cast %233 : vector<1x2x128xf32> to vector<2x128xf32>
    %cst_69 = arith.constant dense<0.000000e+00> : vector<2x128xf32>
    %235 = tpu.matmul %223, %0, %cst_69 {dimension_numbers = #tpu.dot_dimension_numbers<[1], [0], [0], [1], [0, 0, 1, 1], [], []>} : vector<2x32xf32>, vector<32x128xf32>, vector<2x128xf32> -> vector<2x128xf32>
    %236 = arith.addf %234, %235 : vector<2x128xf32>
    %237 = vector.extract_strided_slice %236 {offsets = [0, 0], sizes = [2, 32], strides = [1, 1]} : vector<2x128xf32> to vector<2x32xf32>
    %238 = arith.negf %237 : vector<2x32xf32>
    %239 = math.exp %238 : vector<2x32xf32>
    %cst_70 = arith.constant 1.000000e+00 : f32
    %240 = vector.broadcast %cst_70 : f32 to vector<2x32xf32>
    %241 = arith.addf %240, %239 : vector<2x32xf32>
    %242 = arith.divf %240, %241 : vector<2x32xf32>
    %243 = vector.extract_strided_slice %236 {offsets = [0, 32], sizes = [2, 32], strides = [1, 1]} : vector<2x128xf32> to vector<2x32xf32>
    %244 = arith.negf %243 : vector<2x32xf32>
    %245 = math.exp %244 : vector<2x32xf32>
    %cst_71 = arith.constant 1.000000e+00 : f32
    %246 = vector.broadcast %cst_71 : f32 to vector<2x32xf32>
    %247 = arith.addf %246, %245 : vector<2x32xf32>
    %248 = arith.divf %246, %247 : vector<2x32xf32>
    %249 = vector.extract_strided_slice %236 {offsets = [0, 64], sizes = [2, 32], strides = [1, 1]} : vector<2x128xf32> to vector<2x32xf32>
    %250 = math.tanh %249 : vector<2x32xf32>
    %251 = vector.extract_strided_slice %236 {offsets = [0, 96], sizes = [2, 32], strides = [1, 1]} : vector<2x128xf32> to vector<2x32xf32>
    %252 = arith.negf %251 : vector<2x32xf32>
    %253 = math.exp %252 : vector<2x32xf32>
    %cst_72 = arith.constant 1.000000e+00 : f32
    %254 = vector.broadcast %cst_72 : f32 to vector<2x32xf32>
    %255 = arith.addf %254, %253 : vector<2x32xf32>
    %256 = arith.divf %254, %255 : vector<2x32xf32>
    %257 = arith.mulf %248, %221 : vector<2x32xf32>
    %258 = arith.mulf %242, %250 : vector<2x32xf32>
    %259 = arith.addf %257, %258 : vector<2x32xf32>
    %260 = math.tanh %259 : vector<2x32xf32>
    %261 = arith.mulf %256, %260 : vector<2x32xf32>
    %262 = vector.broadcast %1 : vector<1x32xf32> to vector<2x32xf32>
    %263 = arith.mulf %261, %262 : vector<2x32xf32>
    %cst_73 = arith.constant dense<0.000000e+00> : vector<2xf32>
    %264 = vector.multi_reduction <add>, %263, %cst_73 [1] : vector<2x32xf32> to vector<2xf32>
    %265 = vector.shape_cast %264 : vector<2xf32> to vector<2x1xf32>
    %266 = vector.broadcast %2 : vector<1x1xf32> to vector<2x1xf32>
    %267 = arith.addf %265, %266 : vector<2x1xf32>
    %c6_74 = arith.constant 6 : index
    %c0_75 = arith.constant 0 : index
    %c0_76 = arith.constant 0 : index
    %268 = vector.load %arg5[%c6_74, %c0_75, %c0_76] : memref<8x2x1xf32, #tpu.memory_space<vmem>>, vector<1x2x1xf32>
    %269 = vector.shape_cast %268 : vector<1x2x1xf32> to vector<2x1xf32>
    %270 = vector.shape_cast %267 : vector<2x1xf32> to vector<1x2x1xf32>
    tpu.vector_store %arg5[%c6_74, %c0_75, %c0_76], %270 {strides = array<i32>} : memref<8x2x1xf32, #tpu.memory_space<vmem>>, vector<1x2x1xf32>,
    %c7 = arith.constant 7 : index
    %c0_77 = arith.constant 0 : index
    %c0_78 = arith.constant 0 : index
    %271 = vector.load %arg1[%c7, %c0_77, %c0_78] : memref<8x2x128xf32, #tpu.memory_space<vmem>>, vector<1x2x128xf32>
    %272 = vector.shape_cast %271 : vector<1x2x128xf32> to vector<2x128xf32>
    %cst_79 = arith.constant dense<0.000000e+00> : vector<2x128xf32>
    %273 = tpu.matmul %261, %0, %cst_79 {dimension_numbers = #tpu.dot_dimension_numbers<[1], [0], [0], [1], [0, 0, 1, 1], [], []>} : vector<2x32xf32>, vector<32x128xf32>, vector<2x128xf32> -> vector<2x128xf32>
    %274 = arith.addf %272, %273 : vector<2x128xf32>
    %275 = vector.extract_strided_slice %274 {offsets = [0, 0], sizes = [2, 32], strides = [1, 1]} : vector<2x128xf32> to vector<2x32xf32>
    %276 = arith.negf %275 : vector<2x32xf32>
    %277 = math.exp %276 : vector<2x32xf32>
    %cst_80 = arith.constant 1.000000e+00 : f32
    %278 = vector.broadcast %cst_80 : f32 to vector<2x32xf32>
    %279 = arith.addf %278, %277 : vector<2x32xf32>
    %280 = arith.divf %278, %279 : vector<2x32xf32>
    %281 = vector.extract_strided_slice %274 {offsets = [0, 32], sizes = [2, 32], strides = [1, 1]} : vector<2x128xf32> to vector<2x32xf32>
    %282 = arith.negf %281 : vector<2x32xf32>
    %283 = math.exp %282 : vector<2x32xf32>
    %cst_81 = arith.constant 1.000000e+00 : f32
    %284 = vector.broadcast %cst_81 : f32 to vector<2x32xf32>
    %285 = arith.addf %284, %283 : vector<2x32xf32>
    %286 = arith.divf %284, %285 : vector<2x32xf32>
    %287 = vector.extract_strided_slice %274 {offsets = [0, 64], sizes = [2, 32], strides = [1, 1]} : vector<2x128xf32> to vector<2x32xf32>
    %288 = math.tanh %287 : vector<2x32xf32>
    %289 = vector.extract_strided_slice %274 {offsets = [0, 96], sizes = [2, 32], strides = [1, 1]} : vector<2x128xf32> to vector<2x32xf32>
    %290 = arith.negf %289 : vector<2x32xf32>
    %291 = math.exp %290 : vector<2x32xf32>
    %cst_82 = arith.constant 1.000000e+00 : f32
    %292 = vector.broadcast %cst_82 : f32 to vector<2x32xf32>
    %293 = arith.addf %292, %291 : vector<2x32xf32>
    %294 = arith.divf %292, %293 : vector<2x32xf32>
    %295 = arith.mulf %286, %259 : vector<2x32xf32>
    %296 = arith.mulf %280, %288 : vector<2x32xf32>
    %297 = arith.addf %295, %296 : vector<2x32xf32>
    %298 = math.tanh %297 : vector<2x32xf32>
    %299 = arith.mulf %294, %298 : vector<2x32xf32>
    %300 = vector.broadcast %1 : vector<1x32xf32> to vector<2x32xf32>
    %301 = arith.mulf %299, %300 : vector<2x32xf32>
    %cst_83 = arith.constant dense<0.000000e+00> : vector<2xf32>
    %302 = vector.multi_reduction <add>, %301, %cst_83 [1] : vector<2x32xf32> to vector<2xf32>
    %303 = vector.shape_cast %302 : vector<2xf32> to vector<2x1xf32>
    %304 = vector.broadcast %2 : vector<1x1xf32> to vector<2x1xf32>
    %305 = arith.addf %303, %304 : vector<2x1xf32>
    %c7_84 = arith.constant 7 : index
    %c0_85 = arith.constant 0 : index
    %c0_86 = arith.constant 0 : index
    %306 = vector.load %arg5[%c7_84, %c0_85, %c0_86] : memref<8x2x1xf32, #tpu.memory_space<vmem>>, vector<1x2x1xf32>
    %307 = vector.shape_cast %306 : vector<1x2x1xf32> to vector<2x1xf32>
    %308 = vector.shape_cast %305 : vector<2x1xf32> to vector<1x2x1xf32>
    tpu.vector_store %arg5[%c7_84, %c0_85, %c0_86], %308 {strides = array<i32>} : memref<8x2x1xf32, #tpu.memory_space<vmem>>, vector<1x2x1xf32>,
    return
  }
  func.func @transform_0(%arg0: i32) -> (i32, i32, i32) {
    %c0_i32 = arith.constant 0 : i32
    %c0_i32_0 = arith.constant 0 : i32
    %c0_i32_1 = arith.constant 0 : i32
    %c0_i32_2 = arith.constant 0 : i32
    return %c0_i32, %c0_i32_0, %c0_i32_1 : i32, i32, i32
  }
  func.func @transform_1(%arg0: i32) -> (i32, i32) {
    %c0_i32 = arith.constant 0 : i32
    %c0_i32_0 = arith.constant 0 : i32
    %c0_i32_1 = arith.constant 0 : i32
    return %c0_i32, %c0_i32_0 : i32, i32
  }
  func.func @transform_2(%arg0: i32) -> (i32, i32) {
    %c0_i32 = arith.constant 0 : i32
    %c0_i32_0 = arith.constant 0 : i32
    %c0_i32_1 = arith.constant 0 : i32
    return %c0_i32, %c0_i32_0 : i32, i32
  }
  func.func @transform_3(%arg0: i32) -> (i32, i32) {
    %c0_i32 = arith.constant 0 : i32
    %c0_i32_0 = arith.constant 0 : i32
    %c0_i32_1 = arith.constant 0 : i32
    return %c0_i32, %c0_i32_0 : i32, i32
  }
  func.func @transform_4(%arg0: i32) -> (i32, i32, i32) {
    %c0_i32 = arith.constant 0 : i32
    %c0_i32_0 = arith.constant 0 : i32
    %c0_i32_1 = arith.constant 0 : i32
    %c0_i32_2 = arith.constant 0 : i32
    return %c0_i32, %c0_i32_0, %c0_i32_1 : i32, i32, i32
  }
}

</mosaic_0001>

<bundles_post_ra>
// kernel: cnn_lstm_critic_forward.3
= control target key start
LH: loop header
LB: loop body
LE: loop exit
PB: predicated region body
PF: predicated region fallthrough
CT: control target
= control target key end

     0   :  { %v1223_v0 = vmov 0.0|0.0   ;;  %vm1224_vm0 = vmmov 0   ;;  %v1225_v4 = vmov 0.0   ;;  %s1226_s24 = smov 64   ;;  %s1227_s25 = smov 32   ;;  %vm26_vm1 = vcmask 261120   ;;  %s1459_s1 = inlined_call_operand.vmem [shape: f32[32,128], index: 1, kind: input, shape index: {}]   ;;  %s1460_s0 = inlined_call_operand.vmem [shape: f32[8,2,128], index: 0, kind: input, shape index: {}]   ;;  %s1461_s2 = inlined_call_operand.vmem [shape: f32[1,32], index: 2, kind: input, shape index: {}]   ;;  %s1462_s3 = inlined_call_operand.<no memory space> [shape: f32[1,1], index: 3, kind: input, shape index: {}]   ;;  %s1463_s4 = inlined_call_operand.vmem [shape: f32[8,2,1], index: 4, kind: output, shape index: {}]  }
   0x1   :  { %1105 = vmatprep.subr.bf16.mxu0 %v1223_v0  ;;  %v19_v1 = vld [vmem:[%s1459_s1] sm:$0xff]  ;;  %v20_v2 = vld [vmem:[%s1459_s1 + $0x8] sm:$0xff]  ;;  %v21_v3 = vld [vmem:[%s1459_s1 + $0x10] sm:$0xff]  ;;  %1025 = vmatprep.mubr.msk.f32.mxu0 %vm1224_vm0, %v1225_v4  ;;  %s1228_s16 = smov 96   ;;  %vm138_vm2 = vcmask 254976   ;;  %vm149_vm3 = vcmask 1024  }
   0x2   :  { %v1266_v5 = vpack.c.bf16 %v20_v2, %v19_v1  ;;  %v22_v6 = vld [vmem:[%s1459_s1 + $0x18] sm:$0xff]  ;;  %1111 = vmatprep.subr.bf16.mxu1 %v1223_v0  ;;  %1036 = vmatprep.mubr.msk.f32.mxu1 %vm1224_vm0, %v1225_v4  ;;  %v25_v8 = vld [vmem:[%s1460_s0] sm:$0x3]  ;;  %v949_v26 = vld [vmem:[%s1460_s0 + $0x2] sm:$0x3] }
   0x3   :  { %v1275_v7 = vpack.c.bf16 %v22_v6, %v21_v3  ;;  %v953_v44 = vld [vmem:[%s1460_s0 + $0x4] sm:$0x3]  ;;  %v957_v62 = vld [vmem:[%s1460_s0 + $0x6] sm:$0x3] }
   0x4   :  { %1107 = vmatpush3.bf16.msra.mxu0 %v1266_v5  ;;  %1113 = vmatpush3.bf16.msra.mxu1 %v1266_v5 }
   0x5   :  { %1108 = vmatprep.subr.bf16.mxu0 %v1223_v0  ;;  %1114 = vmatprep.subr.bf16.mxu1 %v1223_v0 }
   0x8   :  { %1110 = vmatpush3.bf16.msra.mxu0 %v1275_v7  ;;  %1116 = vmatpush3.bf16.msra.mxu1 %v1275_v7 }
   0x9   :  { %1117 = vmatprep.subr.bf16.mxu0 %v1223_v0  ;;  %1123 = vmatprep.subr.bf16.mxu1 %v1223_v0 }
   0xb   :  { %1026 = vmatmul.mubr.f32.vlgmr.msra.gmra.mrb[0].mxu0 %v1225_v4 }
   0xc   :  { %1119 = vmatpush3.bf16.msra.mxu0 %v1266_v5  ;;  %1047 = vmatprep.mubr.msk.f32.mxu0 %vm1224_vm0, %v1225_v4 }
   0xd   :  { %1120 = vmatprep.subr.bf16.mxu0 %v1223_v0 }
  0x10   :  { %1122 = vmatpush3.bf16.msra.mxu0 %v1275_v7 }
  0x11   :  { %1129 = vmatprep.subr.bf16.mxu0 %v1223_v0 }
  0xde   :  { %v96_v9 = vpop.f32.mrb[0].mxu0 }
  0xdf   :  { %v100_v10 = vadd.f32 %v96_v9, %v25_v8  ;;  %v1027_v11 = vpop.f32.mrb[1].mxu0 }
  0xe1   :  { %1159 = vtanh.f32 %v100_v10  ;;  %v946_v13 = vmul.f32 -1.442695, %v100_v10 }
  0xe3   :  { %1161 = vpow2.f32 %v946_v13 }
  0xeb   :  { %v1160_v12 = vpop.eup %1159 }
  0xec   :  { %110 = vrot.lane.b32.xlu0 %v1160_v12, %s1226_s24 }
  0xed   :  { %v1162_v14 = vpop.eup %1161 }
  0xee   :  { %v104_v15 = vadd.f32 1.0, %v1162_v14 }
  0xf0   :  { %1163 = vrcp.f32 %v104_v15 }
  0xfa   :  { %v1164_v16 = vpop.eup %1163 }
  0xfb   :  { %v108_v19 = vmul.f32 0.0, %v1164_v16 }
 0x15e   :  { %v111_v17 = vpop.permute.xlu0 %110 }
 0x15f   :  { %v113_v18 = vmul.f32 %v1164_v16, %v111_v17 }
 0x161   :  { %115 = vrot.lane.b32.xlu0 %v113_v18, %s1227_s25 }
 0x1d3   :  { %v116_v20 = vpop.permute.xlu0 %115 }
 0x1d4   :  { %v118_v21 = vadd.f32 %v116_v20, %v108_v19  ;;  %v961_v20 = vld [vmem:[%s1460_s0 + $0x8] sm:$0x3] }
 0x1d6   :  { %1165 = vtanh.f32 %v118_v21 }
 0x1e0   :  { %v1166_v22 = vpop.eup %1165 }
 0x1e1   :  { %121 = vrot.lane.b32.xlu1 %v1166_v22, %s1226_s24 }
 0x253   :  { %v122_v23 = vpop.permute.xlu1 %121 }
 0x254   :  { %v1297_v24 = vmul.f32 %v1164_v16, %v122_v23 }
 0x256   :  { %154 = vrot.lane.b32.xlu1 %v1297_v24, %s1227_s25 }
 0x2c8   :  { %v155_v25 = vpop.permute.xlu1 %154 }
 0x2c9   :  { %1037 = vmatmul.mubr.msk.f32.vlgmr.msra.gmra.mrb[0].mxu1 %vm26_vm1, %v155_v25 }
 0x2ca   :  { %1125 = vmatpush3.bf16.msra.mxu1 %v1266_v5  ;;  %1058 = vmatprep.mubr.msk.f32.mxu1 %vm1224_vm0, %v1225_v4 }
 0x2cb   :  { %1126 = vmatprep.subr.bf16.mxu1 %v1223_v0 }
 0x2ce   :  { %1128 = vmatpush3.bf16.msra.mxu1 %v1275_v7 }
 0x2cf   :  { %1135 = vmatprep.subr.bf16.mxu1 %v1223_v0 }
 0x39c   :  { %v224_v27 = vpop.f32.mrb[0].mxu1 }
 0x39d   :  { %v228_v28 = vadd.f32 %v949_v26, %v224_v27  ;;  %v1038_v29 = vpop.f32.mrb[1].mxu1 }
 0x39f   :  { %1167 = vtanh.f32 %v228_v28  ;;  %v951_v31 = vmul.f32 -1.442695, %v228_v28 }
 0x3a1   :  { %1169 = vpow2.f32 %v951_v31 }
 0x3a9   :  { %v1168_v30 = vpop.eup %1167 }
 0x3aa   :  { %238 = vrot.lane.b32.xlu0 %v1168_v30, %s1226_s24 }
 0x3ab   :  { %v1170_v32 = vpop.eup %1169 }
 0x3ac   :  { %v232_v33 = vadd.f32 1.0, %v1170_v32 }
 0x3ae   :  { %1171 = vrcp.f32 %v232_v33 }
 0x3b8   :  { %v1172_v34 = vpop.eup %1171 }
 0x3b9   :  { %v236_v37 = vmul.f32 %v1172_v34, %v118_v21 }
 0x41c   :  { %v239_v35 = vpop.permute.xlu0 %238 }
 0x41d   :  { %v241_v36 = vmul.f32 %v1172_v34, %v239_v35 }
 0x41f   :  { %243 = vrot.lane.b32.xlu1 %v241_v36, %s1227_s25 }
 0x491   :  { %v244_v38 = vpop.permute.xlu1 %243 }
 0x492   :  { %v246_v39 = vadd.f32 %v244_v38, %v236_v37 }
 0x494   :  { %1173 = vtanh.f32 %v246_v39 }
 0x49e   :  { %v1174_v40 = vpop.eup %1173 }
 0x49f   :  { %249 = vrot.lane.b32.xlu0 %v1174_v40, %s1226_s24 }
 0x511   :  { %v250_v41 = vpop.permute.xlu0 %249 }
 0x512   :  { %v1314_v42 = vmul.f32 %v1172_v34, %v250_v41 }
 0x514   :  { %267 = vrot.lane.b32.xlu1 %v1314_v42, %s1227_s25 }
 0x586   :  { %v268_v43 = vpop.permute.xlu1 %267 }
 0x587   :  { %1048 = vmatmul.mubr.msk.f32.vlgmr.msra.gmra.mrb[2].mxu0 %vm26_vm1, %v268_v43 }
 0x588   :  { %1131 = vmatpush3.bf16.msra.mxu0 %v1266_v5  ;;  %1069 = vmatprep.mubr.msk.f32.mxu0 %vm1224_vm0, %v1225_v4 }
 0x589   :  { %1132 = vmatprep.subr.bf16.mxu0 %v1223_v0 }
 0x58c   :  { %1134 = vmatpush3.bf16.msra.mxu0 %v1275_v7 }
 0x58d   :  { %1141 = vmatprep.subr.bf16.mxu0 %v1223_v0 }
 0x65a   :  { %v337_v45 = vpop.f32.mrb[2].mxu0 }
 0x65b   :  { %v341_v46 = vadd.f32 %v953_v44, %v337_v45  ;;  %v1049_v47 = vpop.f32.mrb[3].mxu0 }
 0x65d   :  { %1175 = vtanh.f32 %v341_v46  ;;  %v955_v49 = vmul.f32 -1.442695, %v341_v46 }
 0x65f   :  { %1177 = vpow2.f32 %v955_v49 }
 0x667   :  { %v1176_v48 = vpop.eup %1175 }
 0x668   :  { %351 = vrot.lane.b32.xlu0 %v1176_v48, %s1226_s24 }
 0x669   :  { %v1178_v50 = vpop.eup %1177 }
 0x66a   :  { %v345_v51 = vadd.f32 1.0, %v1178_v50 }
 0x66c   :  { %1179 = vrcp.f32 %v345_v51 }
 0x676   :  { %v1180_v52 = vpop.eup %1179 }
 0x677   :  { %v349_v55 = vmul.f32 %v1180_v52, %v246_v39  ;;  %v965_v39 = vld [vmem:[%s1460_s0 + $0xa] sm:$0x3] }
 0x6da   :  { %v352_v53 = vpop.permute.xlu0 %351 }
 0x6db   :  { %v354_v54 = vmul.f32 %v1180_v52, %v352_v53 }
 0x6dd   :  { %356 = vrot.lane.b32.xlu1 %v354_v54, %s1227_s25  ;;  %v969_v54 = vld [vmem:[%s1460_s0 + $0xc] sm:$0x3] }
 0x74f   :  { %v357_v56 = vpop.permute.xlu1 %356 }
 0x750   :  { %v359_v57 = vadd.f32 %v357_v56, %v349_v55 }
 0x752   :  { %1181 = vtanh.f32 %v359_v57 }
 0x75c   :  { %v1182_v58 = vpop.eup %1181 }
 0x75d   :  { %362 = vrot.lane.b32.xlu0 %v1182_v58, %s1226_s24 }
 0x7cf   :  { %v363_v59 = vpop.permute.xlu0 %362 }
 0x7d0   :  { %v1331_v60 = vmul.f32 %v1180_v52, %v363_v59 }
 0x7d2   :  { %380 = vrot.lane.b32.xlu1 %v1331_v60, %s1227_s25 }
 0x844   :  { %v381_v61 = vpop.permute.xlu1 %380 }
 0x845   :  { %1059 = vmatmul.mubr.msk.f32.vlgmr.msra.gmra.mrb[2].mxu1 %vm26_vm1, %v381_v61 }
 0x846   :  { %1137 = vmatpush3.bf16.msra.mxu1 %v1266_v5  ;;  %1080 = vmatprep.mubr.msk.f32.mxu1 %vm1224_vm0, %v1225_v4 }
 0x847   :  { %1138 = vmatprep.subr.bf16.mxu1 %v1223_v0 }
 0x84a   :  { %1140 = vmatpush3.bf16.msra.mxu1 %v1275_v7 }
 0x84b   :  { %1147 = vmatprep.subr.bf16.mxu1 %v1223_v0 }
 0x918   :  { %v450_v63 = vpop.f32.mrb[2].mxu1 }
 0x919   :  { %v454_v1 = vadd.f32 %v957_v62, %v450_v63  ;;  %v1060_v2 = vpop.f32.mrb[3].mxu1 }
 0x91b   :  { %1183 = vtanh.f32 %v454_v1  ;;  %v959_v6 = vmul.f32 -1.442695, %v454_v1 }
 0x91d   :  { %1185 = vpow2.f32 %v959_v6 }
 0x925   :  { %v1184_v3 = vpop.eup %1183 }
 0x926   :  { %464 = vrot.lane.b32.xlu0 %v1184_v3, %s1226_s24 }
 0x927   :  { %v1186_v8 = vpop.eup %1185 }
 0x928   :  { %v458_v9 = vadd.f32 1.0, %v1186_v8 }
 0x92a   :  { %1187 = vrcp.f32 %v458_v9 }
 0x934   :  { %v1188_v10 = vpop.eup %1187 }
 0x935   :  { %v462_v13 = vmul.f32 %v1188_v10, %v359_v57 }
 0x998   :  { %v465_v11 = vpop.permute.xlu0 %464 }
 0x999   :  { %v467_v12 = vmul.f32 %v1188_v10, %v465_v11 }
 0x99b   :  { %469 = vrot.lane.b32.xlu1 %v467_v12, %s1227_s25 }
 0xa0d   :  { %v470_v14 = vpop.permute.xlu1 %469 }
 0xa0e   :  { %v472_v15 = vadd.f32 %v470_v14, %v462_v13  ;;  %v973_v13 = vld [vmem:[%s1460_s0 + $0xe] sm:$0x3] }
 0xa10   :  { %1189 = vtanh.f32 %v472_v15 }
 0xa1a   :  { %v1190_v16 = vpop.eup %1189 }
 0xa1b   :  { %475 = vrot.lane.b32.xlu0 %v1190_v16, %s1226_s24 }
 0xa8d   :  { %v476_v17 = vpop.permute.xlu0 %475 }
 0xa8e   :  { %v1348_v18 = vmul.f32 %v1188_v10, %v476_v17 }
 0xa90   :  { %493 = vrot.lane.b32.xlu1 %v1348_v18, %s1227_s25 }
 0xb02   :  { %v494_v19 = vpop.permute.xlu1 %493 }
 0xb03   :  { %1070 = vmatmul.mubr.msk.f32.vlgmr.msra.gmra.mrb[4].mxu0 %vm26_vm1, %v494_v19  ;;  %v947_v19 = vld [vmem:[%s1461_s2] ss:$0 sm:$0xff] }
 0xb04   :  { %1143 = vmatpush3.bf16.msra.mxu0 %v1266_v5  ;;  %1091 = vmatprep.mubr.msk.f32.mxu0 %vm1224_vm0, %v1225_v4 }
 0xb05   :  { %1144 = vmatprep.subr.bf16.mxu0 %v1223_v0 }
 0xb08   :  { %1146 = vmatpush3.bf16.msra.mxu0 %v1275_v7 }
 0xbd6   :  { %v563_v21 = vpop.f32.mrb[4].mxu0 }
 0xbd7   :  { %v567_v22 = vadd.f32 %v961_v20, %v563_v21  ;;  %v1071_v23 = vpop.f32.mrb[5].mxu0 }
 0xbd9   :  { %1191 = vtanh.f32 %v567_v22  ;;  %v963_v26 = vmul.f32 -1.442695, %v567_v22 }
 0xbdb   :  { %1193 = vpow2.f32 %v963_v26 }
 0xbe3   :  { %v1192_v25 = vpop.eup %1191 }
 0xbe4   :  { %577 = vrot.lane.b32.xlu0 %v1192_v25, %s1226_s24 }
 0xbe5   :  { %v1194_v27 = vpop.eup %1193 }
 0xbe6   :  { %v571_v28 = vadd.f32 1.0, %v1194_v27 }
 0xbe8   :  { %1195 = vrcp.f32 %v571_v28 }
 0xbf2   :  { %v1196_v29 = vpop.eup %1195 }
 0xbf3   :  { %v575_v32 = vmul.f32 %v1196_v29, %v472_v15 }
 0xc56   :  { %v578_v30 = vpop.permute.xlu0 %577 }
 0xc57   :  { %v580_v31 = vmul.f32 %v1196_v29, %v578_v30 }
 0xc59   :  { %582 = vrot.lane.b32.xlu1 %v580_v31, %s1227_s25 }
 0xccb   :  { %v583_v33 = vpop.permute.xlu1 %582 }
 0xccc   :  { %v585_v34 = vadd.f32 %v583_v33, %v575_v32 }
 0xcce   :  { %1197 = vtanh.f32 %v585_v34 }
 0xcd8   :  { %v1198_v35 = vpop.eup %1197 }
 0xcd9   :  { %588 = vrot.lane.b32.xlu0 %v1198_v35, %s1226_s24 }
 0xd4b   :  { %v589_v36 = vpop.permute.xlu0 %588 }
 0xd4c   :  { %v1364_v37 = vmul.f32 %v1196_v29, %v589_v36 }
 0xd4e   :  { %606 = vrot.lane.b32.xlu1 %v1364_v37, %s1227_s25 }
 0xdc0   :  { %v607_v38 = vpop.permute.xlu1 %606 }
 0xdc1   :  { %1081 = vmatmul.mubr.msk.f32.vlgmr.msra.gmra.mrb[4].mxu1 %vm26_vm1, %v607_v38 }
 0xdc2   :  { %1149 = vmatpush3.bf16.msra.mxu1 %v1266_v5  ;;  %1102 = vmatprep.mubr.msk.f32.mxu1 %vm1224_vm0, %v1225_v4 }
 0xdc3   :  { %1150 = vmatprep.subr.bf16.mxu1 %v1223_v0 }
 0xdc6   :  { %1152 = vmatpush3.bf16.msra.mxu1 %v1275_v7 }
 0xe94   :  { %v676_v40 = vpop.f32.mrb[4].mxu1 }
 0xe95   :  { %v680_v41 = vadd.f32 %v965_v39, %v676_v40  ;;  %v1082_v43 = vpop.f32.mrb[5].mxu1 }
 0xe97   :  { %1199 = vtanh.f32 %v680_v41  ;;  %v967_v45 = vmul.f32 -1.442695, %v680_v41 }
 0xe99   :  { %1201 = vpow2.f32 %v967_v45 }
 0xea1   :  { %v1200_v44 = vpop.eup %1199 }
 0xea2   :  { %690 = vrot.lane.b32.xlu0 %v1200_v44, %s1226_s24 }
 0xea3   :  { %v1202_v5 = vpop.eup %1201 }
 0xea4   :  { %v684_v46 = vadd.f32 1.0, %v1202_v5 }
 0xea6   :  { %1203 = vrcp.f32 %v684_v46 }
 0xeb0   :  { %v1204_v4 = vpop.eup %1203 }
 0xeb1   :  { %v688_v7 = vmul.f32 %v1204_v4, %v585_v34  ;;  %v9_v34 = vstv %s1462_s3 }
 0xeb2   :  { %10 = vst [vmem:[#allocation2] sm:$0x1] %v9_v34 }
 0xeb9   :  { %v948_v45 = vld [vmem:[#allocation2] ss:$0 sm:$0xff] }
 0xf14   :  { %v691_v0 = vpop.permute.xlu0 %690 }
 0xf15   :  { %v693_v47 = vmul.f32 %v1204_v4, %v691_v0 }
 0xf17   :  { %695 = vrot.lane.b32.xlu1 %v693_v47, %s1227_s25 }
 0xf89   :  { %v696_v48 = vpop.permute.xlu1 %695 }
 0xf8a   :  { %v698_v49 = vadd.f32 %v696_v48, %v688_v7 }
 0xf8c   :  { %1205 = vtanh.f32 %v698_v49 }
 0xf96   :  { %v1206_v50 = vpop.eup %1205 }
 0xf97   :  { %701 = vrot.lane.b32.xlu0 %v1206_v50, %s1226_s24 }
0x1009   :  { %v702_v51 = vpop.permute.xlu0 %701 }
0x100a   :  { %v1380_v52 = vmul.f32 %v1204_v4, %v702_v51 }
0x100c   :  { %719 = vrot.lane.b32.xlu1 %v1380_v52, %s1227_s25 }
0x107e   :  { %v720_v53 = vpop.permute.xlu1 %719 }
0x107f   :  { %1092 = vmatmul.mubr.msk.f32.vlgmr.msra.gmra.mrb[6].mxu0 %vm26_vm1, %v720_v53 }
0x1152   :  { %v789_v55 = vpop.f32.mrb[6].mxu0 }
0x1153   :  { %v793_v56 = vadd.f32 %v969_v54, %v789_v55  ;;  %v1093_v57 = vpop.f32.mrb[7].mxu0 }
0x1155   :  { %1207 = vtanh.f32 %v793_v56  ;;  %v971_v59 = vmul.f32 -1.442695, %v793_v56 }
0x1157   :  { %1209 = vpow2.f32 %v971_v59 }
0x115f   :  { %v1208_v58 = vpop.eup %1207 }
0x1160   :  { %803 = vrot.lane.b32.xlu0 %v1208_v58, %s1226_s24 }
0x1161   :  { %v1210_v61 = vpop.eup %1209 }
0x1162   :  { %v797_v62 = vadd.f32 1.0, %v1210_v61 }
0x1164   :  { %1211 = vrcp.f32 %v797_v62 }
0x116e   :  { %v1212_v63 = vpop.eup %1211 }
0x116f   :  { %v801_v3 = vmul.f32 %v1212_v63, %v698_v49 }
0x11d2   :  { %v804_v1 = vpop.permute.xlu0 %803 }
0x11d3   :  { %v806_v2 = vmul.f32 %v1212_v63, %v804_v1 }
0x11d5   :  { %808 = vrot.lane.b32.xlu1 %v806_v2, %s1227_s25 }
0x1247   :  { %v809_v6 = vpop.permute.xlu1 %808 }
0x1248   :  { %v811_v8 = vadd.f32 %v809_v6, %v801_v3 }
0x124a   :  { %1213 = vtanh.f32 %v811_v8 }
0x1254   :  { %v1214_v9 = vpop.eup %1213 }
0x1255   :  { %814 = vrot.lane.b32.xlu0 %v1214_v9, %s1226_s24 }
0x12c7   :  { %v815_v10 = vpop.permute.xlu0 %814 }
0x12c8   :  { %v817_v11 = vmul.f32 %v1212_v63, %v815_v10 }
0x12ca   :  { %832 = vrot.lane.b32.xlu1 %v817_v11, %s1227_s25 }
0x133c   :  { %v833_v12 = vpop.permute.xlu1 %832 }
0x133d   :  { %1103 = vmatmul.mubr.msk.f32.vlgmr.msra.gmra.mrb[6].mxu1 %vm26_vm1, %v833_v12 }
0x1410   :  { %v902_v14 = vpop.f32.mrb[6].mxu1 }
0x1411   :  { %v906_v15 = vadd.f32 %v973_v13, %v902_v14  ;;  %v1104_v16 = vpop.f32.mrb[7].mxu1 }
0x1413   :  { %1215 = vtanh.f32 %v906_v15  ;;  %v975_v20 = vmul.f32 -1.442695, %v906_v15 }
0x1415   :  { %1217 = vpow2.f32 %v975_v20 }
0x141d   :  { %v1216_v17 = vpop.eup %1215 }
0x141e   :  { %916 = vrot.lane.b32.xlu0 %v1216_v17, %s1226_s24 }
0x141f   :  { %v1218_v21 = vpop.eup %1217 }
0x1420   :  { %v910_v22 = vadd.f32 1.0, %v1218_v21 }
0x1422   :  { %130 = vrot.lane.b32.xlu0 %v947_v19, %s1228_s16  ;;  %1219 = vrcp.f32 %v910_v22 }
0x142c   :  { %v1220_v23 = vpop.eup %1219 }
0x142d   :  { %v914_v29 = vmul.f32 %v1220_v23, %v811_v8 }
0x1490   :  { %v917_v25 = vpop.permute.xlu0 %916 }
0x1491   :  { %v919_v26 = vmul.f32 %v1220_v23, %v917_v25 }
0x1493   :  { %921 = vrot.lane.b32.xlu1 %v919_v26, %s1227_s25 }
0x1494   :  { %v131_v27 = vpop.permute.xlu0 %130 }
0x1495   :  { %v133_v28 = vmul.f32 %v131_v27, %v1297_v24  ;;  %v253_v24 = vmul.f32 %v1314_v42, %v131_v27  ;;  %v366_v36 = vmul.f32 %v1331_v60, %v131_v27  ;;  %v592_v38 = vmul.f32 %v1364_v37, %v131_v27 }
0x1496   :  { %v705_v39 = vmul.f32 %v1380_v52, %v131_v27  ;;  %v818_v40 = vmul.f32 %v817_v11, %v131_v27  ;;  %v479_v49 = vmul.f32 %v1348_v18, %v131_v27 }
0x1497   :  { %135 = vrot.lane.b32.xlu1 %v133_v28, %s1227_s25 }
0x1505   :  { %v922_v30 = vpop.permute.xlu1 %921 }
0x1506   :  { %v924_v31 = vadd.f32 %v922_v30, %v914_v29 }
0x1508   :  { %1221 = vtanh.f32 %v924_v31 }
0x1509   :  { %v136_v32 = vpop.permute.xlu1 %135 }
0x150a   :  { %v139_v33 = vsel %vm138_vm2, %v136_v32, 0.0 }
0x150b   :  { %140 = vadd.xlane.f32.xlu0 %v139_v33 }
0x1512   :  { %v1222_v35 = vpop.eup %1221 }
0x1513   :  { %927 = vrot.lane.b32.xlu1 %v1222_v35, %s1226_s24 }
0x1517   :  { %255 = vrot.lane.b32.xlu1 %v253_v24, %s1227_s25 }
0x1521   :  { %368 = vrot.lane.b32.xlu0 %v366_v36, %s1227_s25 }
0x1525   :  { %594 = vrot.lane.b32.xlu0 %v592_v38, %s1227_s25 }
0x1529   :  { %707 = vrot.lane.b32.xlu0 %v705_v39, %s1227_s25 }
0x152d   :  { %820 = vrot.lane.b32.xlu0 %v818_v40, %s1227_s25 }
0x1585   :  { %v928_v41 = vpop.permute.xlu1 %927 }
0x1586   :  { %v930_v43 = vmul.f32 %v1220_v23, %v928_v41 }
0x1588   :  { %v931_v42 = vmul.f32 %v930_v43, %v131_v27 }
0x1589   :  { %v256_v44 = vpop.permute.xlu1 %255 }
0x158a   :  { %933 = vrot.lane.b32.xlu0 %v931_v42, %s1227_s25  ;;  %v258_v60 = vsel %vm138_vm2, %v256_v44, 0.0 }
0x158b   :  { %259 = vadd.xlane.f32.xlu1 %v258_v60 }
0x1598   :  { %v141_v37 = vpop.xlane.xlu0 %140 }
0x1599   :  { %v148_v5 = vadd.f32 %v948_v45, %v141_v37 }
0x159b   :  { %150 = vst.msk [vmem:[%s1463_s4] sm:$0x3] %vm149_vm3, %v148_v5 }
0x159c   :  { %v369_v46 = vpop.permute.xlu0 %368 }
0x159d   :  { %v371_v4 = vsel %vm138_vm2, %v369_v46, 0.0 }
0x159e   :  { %372 = vadd.xlane.f32.xlu1 %v371_v4 }
0x15a0   :  { %v595_v0 = vpop.permute.xlu0 %594 }
0x15a1   :  { %v597_v47 = vsel %vm138_vm2, %v595_v0, 0.0 }
0x15a4   :  { %v708_v7 = vpop.permute.xlu0 %707 }
0x15a5   :  { %v710_v48 = vsel %vm138_vm2, %v708_v7, 0.0 }
0x15a8   :  { %v821_v50 = vpop.permute.xlu0 %820 }
0x15a9   :  { %598 = vadd.xlane.f32.xlu0 %v597_v47  ;;  %v823_v58 = vsel %vm138_vm2, %v821_v50, 0.0 }
0x15ad   :  { %711 = vadd.xlane.f32.xlu0 %v710_v48 }
0x15af   :  { %481 = vrot.lane.b32.xlu1 %v479_v49, %s1227_s25 }
0x15fc   :  { %v934_v51 = vpop.permute.xlu0 %933 }
0x15fd   :  { %v936_v52 = vsel %vm138_vm2, %v934_v51, 0.0 }
0x15fe   :  { %937 = vadd.xlane.f32.xlu0 %v936_v52 }
0x1618   :  { %v260_v53 = vpop.xlane.xlu1 %259 }
0x1619   :  { %v261_v54 = vadd.f32 %v948_v45, %v260_v53 }
0x161b   :  { %952 = vst.msk [vmem:[%s1463_s4 + $0x2] sm:$0x3] %vm149_vm3, %v261_v54 }
0x162b   :  { %v373_v55 = vpop.xlane.xlu1 %372 }
0x162c   :  { %v374_v56 = vadd.f32 %v948_v45, %v373_v55 }
0x162e   :  { %956 = vst.msk [vmem:[%s1463_s4 + $0x4] sm:$0x3] %vm149_vm3, %v374_v56 }
0x162f   :  { %v482_v18 = vpop.permute.xlu1 %481 }
0x1630   :  { %v484_v57 = vsel %vm138_vm2, %v482_v18, 0.0 }
0x1631   :  { %485 = vadd.xlane.f32.xlu1 %v484_v57 }
0x1635   :  { %824 = vadd.xlane.f32.xlu1 %v823_v58 }
0x1636   :  { %v599_v59 = vpop.xlane.xlu0 %598 }
0x1637   :  { %v600_v61 = vadd.f32 %v948_v45, %v599_v59 }
0x1639   :  { %964 = vst.msk [vmem:[%s1463_s4 + $0x8] sm:$0x3] %vm149_vm3, %v600_v61 }
0x163a   :  { %v712_v62 = vpop.xlane.xlu0 %711 }
0x163b   :  { %v713_v63 = vadd.f32 %v948_v45, %v712_v62 }
0x163d   :  { %968 = vst.msk [vmem:[%s1463_s4 + $0xa] sm:$0x3] %vm149_vm3, %v713_v63 }
0x168b   :  { %v938_v1 = vpop.xlane.xlu0 %937 }
0x168c   :  { %v939_v2 = vadd.f32 %v948_v45, %v938_v1 }
0x168e   :  { %976 = vst.msk [vmem:[%s1463_s4 + $0xe] sm:$0x3] %vm149_vm3, %v939_v2 }
0x16be   :  { %v486_v3 = vpop.xlane.xlu1 %485 }
0x16bf   :  { %v487_v6 = vadd.f32 %v948_v45, %v486_v3 }
0x16c1   :  { %960 = vst.msk [vmem:[%s1463_s4 + $0x6] sm:$0x3] %vm149_vm3, %v487_v6 }
0x16c2   :  { %v825_v8 = vpop.xlane.xlu1 %824 }
0x16c3   :  { %v826_v9 = vadd.f32 %v948_v45, %v825_v8 }
0x16c5   :  { %972 = vst.msk [vmem:[%s1463_s4 + $0xc] sm:$0x3] %vm149_vm3, %v826_v9 }

// kernel: cnn_lstm_critic_forward.2
= control target key start
LH: loop header
LB: loop body
LE: loop exit
PB: predicated region body
PF: predicated region fallthrough
CT: control target
= control target key end

     0   :  { %s4516_s24 = smov 0   ;;  %s6061_s0 = inlined_call_operand.vmem [shape: f32[16,64,64], index: 0, kind: input, shape index: {}]   ;;  %s6062_s1 = inlined_call_operand.vmem [shape: f32[64,8], index: 1, kind: input, shape index: {}]   ;;  %s6063_s2 = inlined_call_operand.vmem [shape: f32[1,8], index: 2, kind: input, shape index: {}]   ;;  %s6064_s3 = inlined_call_operand.vmem [shape: f32[72,16], index: 3, kind: input, shape index: {}]   ;;  %s6065_s4 = inlined_call_operand.vmem [shape: f32[1,16], index: 4, kind: input, shape index: {}]   ;;  %s6066_s5 = inlined_call_operand.vmem [shape: f32[144,128], index: 5, kind: input, shape index: {}]   ;;  %s6067_s6 = inlined_call_operand.vmem [shape: f32[1,128], index: 6, kind: input, shape index: {}]   ;;  %s6068_s7 = inlined_call_operand.vmem [shape: f32[16,128], index: 7, kind: output, shape index: {}]  }
   0x1 LB: > { %s4522_s25 = sadd.s32 4294967295, %s4460_s24   ;;  %p3731_p0 = scmp.ge.s32.totalorder %s4460_s24, 1  ;;  %s4460_s24 = sphi %s4516_s24, %s17_s24  }
   0x2   : > { %p239_p1 = scmp.lt.s32.totalorder %s4460_s24, 3 }
   0x4   : > { %p240_p2 = pnand %p3731_p0, %p239_p1 }
   0x5   : > { %v346_v0 = vld [vmem:[%s6062_s1] sm:$0xff] (!%p240_p2)  ;;  %v347_v1 = vld [vmem:[%s6062_s1 + $0x8] sm:$0xff] (!%p240_p2)  ;;  %v348_v2 = vld [vmem:[%s6062_s1 + $0x10] sm:$0xff] (!%p240_p2)  ;;  %s3732_s9 = sshll.u32 (!%p240_p2), %s4522_s25, 3  ;;  %vm361_vm0 = vcmask (!%p240_p2), 523264   ;;  %vm6069_vm1 = vcmask (!%p240_p2), 64512  }
   0x6   : > { %243 = sbr.rel (%p240_p2) target bundleno = 1168 (0x490), region = 48  ;;  %v4279_v3 = vpack.c.bf16 (!%p240_p2), %v347_v1, %v346_v0  ;;  %v349_v4 = vld [vmem:[%s6062_s1 + $0x18] sm:$0xff] (!%p240_p2)  ;;  %p272_p3 = scmp.lt.s32.totalorder (!%p240_p2), %s3732_s9, 15  ;;  %v350_v6 = vld [vmem:[%s6062_s1 + $0x20] sm:$0xff] (!%p240_p2)  ;;  %v351_v7 = vld [vmem:[%s6062_s1 + $0x28] sm:$0xff] (!%p240_p2)  ;;  %vm1151_vm2 = vcmask (!%p240_p2), 1041409  }
   0x7   : > { %v4283_v5 = vpack.c.bf16 (!%p240_p2), %v349_v4, %v348_v2  ;;  %v4287_v8 = vpack.c.bf16 (!%p240_p2), %v351_v7, %v350_v6  ;;  %v352_v9 = vld [vmem:[%s6062_s1 + $0x30] sm:$0xff] (!%p240_p2)  ;;  %v353_v10 = vld [vmem:[%s6062_s1 + $0x38] sm:$0xff] (!%p240_p2)  ;;  %vm1154_vm3 = vcmask (!%p240_p2), 1042434   ;;  %vm1157_vm4 = vcmask (!%p240_p2), 1043459   ;;  %s4462_s30 = smov (!%p240_p2), 24   ;;  %s4463_s8 = smov (!%p240_p2), 8  }
   0x8   : > { %4280 = vmatprep.subr.bf16.mxu0 (!%p240_p2), %v4279_v3  ;;  %v4291_v12 = vpack.c.bf16 (!%p240_p2), %v353_v10, %v352_v9  ;;  %vm1160_vm5 = vcmask (!%p240_p2), 1044484   ;;  %vm1163_vm6 = vcmask (!%p240_p2), 1045509   ;;  %vm1166_vm7 = vcmask (!%p240_p2), 1046534   ;;  %s4465_s10 = smov (!%p240_p2), 16   ;;  %s4466_s11 = smov (!%p240_p2), 48  }
   0x9   : > { %4282 = vmatpush3.bf16.msra.mxu0 (!%p240_p2), %v4279_v3  ;;  %vm1169_vm8 = vcmask (!%p240_p2), 1047559   ;;  %s4467_s12 = smov (!%p240_p2), 40   ;;  %s4468_s13 = smov (!%p240_p2), 64   ;;  %vm4472_vm9 = vmmov (!%p240_p2), 0   ;;  %vm1373_vm10 = vcmask (!%p240_p2), 130048   ;;  %vm1375_vm11 = vcmask (!%p240_p2), 195584  }
   0xa   : > { %4284 = vmatprep.subr.bf16.mxu0 (!%p240_p2), %v4283_v5  ;;  %s4469_s14 = smov (!%p240_p2), 56   ;;  %vm1377_vm12 = vcmask (!%p240_p2), 261120   ;;  %vm1379_vm13 = vcmask (!%p240_p2), 326656   ;;  %vm1381_vm14 = vcmask (!%p240_p2), 392192   ;;  %vm1383_vm15 = vcmask (!%p240_p2), 457728   ;;  %s4473_s19 = smov (!%p240_p2), 80  }
   0xb   : > { %p278_p4 = scmp.lt.s32.totalorder (!%p240_p2), %s4522_s25, 1 }
   0xd   : > { %s6088_s9 = smov (!%p272_p3, %s3732_s9), 15  ;;  %4286 = vmatpush3.bf16.msra.mxu0 %v4283_v5  ;;  %s6090_s25 = smov (!%p278_p4, %s4522_s25), 1 }
   0xe   : > { %s3815_s16 = sshll.u32 %s6088_s9, 6  ;;  %4288 = vmatprep.subr.bf16.mxu0 %v4287_v8  ;;  %s4464_s9 = smov 32  }
   0xf   : > { %s4554_s23 = scalar_lea.vmem %s6061_s0, %s3815_s16  ;;  %s3735_s20 = sshll.u32 %s6090_s25, 3 }
  0x10   : > { %v282_v11 = vld [vmem:[%s4554_s23] sm:$0xff]  ;;  %v283_v13 = vld [vmem:[%s4554_s23 + $0x8] sm:$0xff]  ;;  %v284_v14 = vld [vmem:[%s4554_s23 + $0x10] sm:$0xff]  ;;  %s281_s27 = scalar_lea.vmem %s6068_s7, %s3735_s20 }
  0x11   : > { %3994 = vmatprep.mubr.msk.f32.mxu0 %vm361_vm0, %v282_v11  ;;  %4290 = vmatpush3.bf16.msra.mxu0 %v4287_v8  ;;  %v285_v15 = vld [vmem:[%s4554_s23 + $0x18] sm:$0xff]  ;;  %v286_v16 = vld [vmem:[%s4554_s23 + $0x20] sm:$0xff]  ;;  %v287_v17 = vld [vmem:[%s4554_s23 + $0x28] sm:$0xff] }
  0x12   : > { %4292 = vmatprep.subr.bf16.mxu0 %v4291_v12  ;;  %v288_v18 = vld [vmem:[%s4554_s23 + $0x30] sm:$0xff]  ;;  %v289_v19 = vld [vmem:[%s4554_s23 + $0x38] sm:$0xff]  ;;  %v290_v20 = vld [vmem:[%s4554_s23 + $0x40] sm:$0xff] }
  0x13   : > { %v291_v21 = vld [vmem:[%s4554_s23 + $0x48] sm:$0xff]  ;;  %v292_v22 = vld [vmem:[%s4554_s23 + $0x50] sm:$0xff]  ;;  %v293_v23 = vld [vmem:[%s4554_s23 + $0x58] sm:$0xff] }
  0x14   : > { %v294_v24 = vld [vmem:[%s4554_s23 + $0x60] sm:$0xff]  ;;  %v295_v25 = vld [vmem:[%s4554_s23 + $0x68] sm:$0xff]  ;;  %v296_v26 = vld [vmem:[%s4554_s23 + $0x70] sm:$0xff] }
  0x15   : > { %4294 = vmatpush3.bf16.msra.mxu0 %v4291_v12  ;;  %v297_v27 = vld [vmem:[%s4554_s23 + $0x78] sm:$0xff]  ;;  %v298_v28 = vld [vmem:[%s4554_s23 + $0x80] sm:$0xff]  ;;  %v299_v29 = vld [vmem:[%s4554_s23 + $0x88] sm:$0xff] }
  0x16   : > { %v300_v30 = vld [vmem:[%s4554_s23 + $0x90] sm:$0xff]  ;;  %v301_v31 = vld [vmem:[%s4554_s23 + $0x98] sm:$0xff]  ;;  %v302_v32 = vld [vmem:[%s4554_s23 + $0xa0] sm:$0xff] }
  0x17   : > { %v303_v33 = vld [vmem:[%s4554_s23 + $0xa8] sm:$0xff]  ;;  %v304_v34 = vld [vmem:[%s4554_s23 + $0xb0] sm:$0xff]  ;;  %v305_v35 = vld [vmem:[%s4554_s23 + $0xb8] sm:$0xff] }
  0x18   : > { %3995 = vmatmul.mubr.msk.f32.vlgmr.msra.gmra.mrb[0].mxu0 %vm361_vm0, %v283_v13  ;;  %v306_v36 = vld [vmem:[%s4554_s23 + $0xc0] sm:$0xff]  ;;  %v307_v37 = vld [vmem:[%s4554_s23 + $0xc8] sm:$0xff]  ;;  %v308_v38 = vld [vmem:[%s4554_s23 + $0xd0] sm:$0xff] }
  0x19   : > { %3997 = vmatprep.mubr.msk.f32.mxu0 %vm361_vm0, %v284_v14  ;;  %v309_v39 = vld [vmem:[%s4554_s23 + $0xd8] sm:$0xff]  ;;  %v310_v40 = vld [vmem:[%s4554_s23 + $0xe0] sm:$0xff]  ;;  %v311_v41 = vld [vmem:[%s4554_s23 + $0xe8] sm:$0xff] }
  0x1a   : > { %v312_v42 = vld [vmem:[%s4554_s23 + $0xf0] sm:$0xff]  ;;  %v313_v43 = vld [vmem:[%s4554_s23 + $0xf8] sm:$0xff]  ;;  %v314_v44 = vld [vmem:[%s4554_s23 + $0x100] sm:$0xff] }
  0x1b   : > { %v315_v45 = vld [vmem:[%s4554_s23 + $0x108] sm:$0xff]  ;;  %v316_v46 = vld [vmem:[%s4554_s23 + $0x110] sm:$0xff]  ;;  %v317_v47 = vld [vmem:[%s4554_s23 + $0x118] sm:$0xff] }
  0x1c   : > { %3998 = vmatmul.mubr.msk.f32.gmra.mrb[2].mxu0 %vm361_vm0, %v285_v15  ;;  %v318_v48 = vld [vmem:[%s4554_s23 + $0x120] sm:$0xff]  ;;  %v319_v49 = vld [vmem:[%s4554_s23 + $0x128] sm:$0xff]  ;;  %v320_v50 = vld [vmem:[%s4554_s23 + $0x130] sm:$0xff] }
  0x1d   : > { %4000 = vmatprep.mubr.msk.f32.mxu0 %vm361_vm0, %v286_v16  ;;  %v321_v51 = vld [vmem:[%s4554_s23 + $0x138] sm:$0xff]  ;;  %v322_v52 = vld [vmem:[%s4554_s23 + $0x140] sm:$0xff]  ;;  %v323_v53 = vld [vmem:[%s4554_s23 + $0x148] sm:$0xff] }
  0x1e   : > { %v324_v54 = vld [vmem:[%s4554_s23 + $0x150] sm:$0xff]  ;;  %v325_v55 = vld [vmem:[%s4554_s23 + $0x158] sm:$0xff]  ;;  %v326_v56 = vld [vmem:[%s4554_s23 + $0x160] sm:$0xff] }
  0x1f   : > { %v327_v57 = vld [vmem:[%s4554_s23 + $0x168] sm:$0xff]  ;;  %v328_v58 = vld [vmem:[%s4554_s23 + $0x170] sm:$0xff]  ;;  %v329_v59 = vld [vmem:[%s4554_s23 + $0x178] sm:$0xff] }
  0x20   : > { %4001 = vmatmul.mubr.msk.f32.gmra.mrb[4].mxu0 %vm361_vm0, %v287_v17  ;;  %v330_v60 = vld [vmem:[%s4554_s23 + $0x180] sm:$0xff]  ;;  %v331_v61 = vld [vmem:[%s4554_s23 + $0x188] sm:$0xff]  ;;  %v332_v62 = vld [vmem:[%s4554_s23 + $0x190] sm:$0xff] }
  0x21   : > { %4003 = vmatprep.mubr.msk.f32.mxu0 %vm361_vm0, %v288_v18  ;;  %v333_v63 = vld [vmem:[%s4554_s23 + $0x198] sm:$0xff]  ;;  %v334_v0 = vld [vmem:[%s4554_s23 + $0x1a0] sm:$0xff]  ;;  %v335_v1 = vld [vmem:[%s4554_s23 + $0x1a8] sm:$0xff] }
  0x22   : > { %v336_v2 = vld [vmem:[%s4554_s23 + $0x1b0] sm:$0xff]  ;;  %v337_v3 = vld [vmem:[%s4554_s23 + $0x1b8] sm:$0xff]  ;;  %v338_v4 = vld [vmem:[%s4554_s23 + $0x1c0] sm:$0xff] }
  0x23   : > { %v339_v5 = vld [vmem:[%s4554_s23 + $0x1c8] sm:$0xff]  ;;  %v340_v6 = vld [vmem:[%s4554_s23 + $0x1d0] sm:$0xff]  ;;  %v341_v7 = vld [vmem:[%s4554_s23 + $0x1d8] sm:$0xff] }
  0x24   : > { %4004 = vmatmul.mubr.msk.f32.gmra.mrb[6].mxu0 %vm361_vm0, %v289_v19  ;;  %v342_v8 = vld [vmem:[%s4554_s23 + $0x1e0] sm:$0xff]  ;;  %v343_v9 = vld [vmem:[%s4554_s23 + $0x1e8] sm:$0xff]  ;;  %v344_v10 = vld [vmem:[%s4554_s23 + $0x1f0] sm:$0xff] }
  0x25   : > { %4006 = vmatprep.mubr.msk.f32.mxu0 %vm361_vm0, %v290_v20  ;;  %v345_v11 = vld [vmem:[%s4554_s23 + $0x1f8] sm:$0xff]  ;;  %v4687_v12 = vld [vmem:[%s6063_s2] ss:$0 sm:$0xff] }
  0x28   : > { %4007 = vmatmul.mubr.msk.f32.gmra.mrb[8].mxu0 %vm361_vm0, %v291_v21 }
  0x29   : > { %4009 = vmatprep.mubr.msk.f32.mxu0 %vm361_vm0, %v292_v22 }
  0x2c   : > { %4010 = vmatmul.mubr.msk.f32.gmra.mrb[10].mxu0 %vm361_vm0, %v293_v23 }
  0x2d   : > { %4012 = vmatprep.mubr.msk.f32.mxu0 %vm361_vm0, %v294_v24 }
  0x30   : > { %4013 = vmatmul.mubr.msk.f32.gmra.mrb[12].mxu0 %vm361_vm0, %v295_v25 }
  0x31   : > { %4015 = vmatprep.mubr.msk.f32.mxu0 %vm361_vm0, %v296_v26 }
  0x34   : > { %4016 = vmatmul.mubr.msk.f32.gmra.mrb[14].mxu0 %vm361_vm0, %v297_v27 }
  0x35   : > { %4018 = vmatprep.mubr.msk.f32.mxu0 %vm361_vm0, %v298_v28 }
  0x38   : > { %4019 = vmatmul.mubr.msk.f32.gmra.mrb[16].mxu0 %vm361_vm0, %v299_v29 }
  0x39   : > { %4021 = vmatprep.mubr.msk.f32.mxu0 %vm361_vm0, %v300_v30 }
  0x3c   : > { %4022 = vmatmul.mubr.msk.f32.gmra.mrb[18].mxu0 %vm361_vm0, %v301_v31 }
  0x3d   : > { %4024 = vmatprep.mubr.msk.f32.mxu0 %vm361_vm0, %v302_v32 }
  0x40   : > { %4025 = vmatmul.mubr.msk.f32.gmra.mrb[20].mxu0 %vm361_vm0, %v303_v33 }
  0x41   : > { %4027 = vmatprep.mubr.msk.f32.mxu0 %vm361_vm0, %v304_v34 }
  0x44   : > { %4028 = vmatmul.mubr.msk.f32.gmra.mrb[22].mxu0 %vm361_vm0, %v305_v35 }
  0x45   : > { %4030 = vmatprep.mubr.msk.f32.mxu0 %vm361_vm0, %v306_v36 }
  0x48   : > { %4031 = vmatmul.mubr.msk.f32.gmra.mrb[24].mxu0 %vm361_vm0, %v307_v37 }
  0x49   : > { %4033 = vmatprep.mubr.msk.f32.mxu0 %vm361_vm0, %v308_v38 }
  0x4c   : > { %4034 = vmatmul.mubr.msk.f32.gmra.mrb[26].mxu0 %vm361_vm0, %v309_v39 }
  0x4d   : > { %4036 = vmatprep.mubr.msk.f32.mxu0 %vm361_vm0, %v310_v40 }
  0x50   : > { %4037 = vmatmul.mubr.msk.f32.gmra.mrb[28].mxu0 %vm361_vm0, %v311_v41 }
  0x51   : > { %4039 = vmatprep.mubr.msk.f32.mxu0 %vm361_vm0, %v312_v42 }
  0x54   : > { %4040 = vmatmul.mubr.msk.f32.gmra.mrb[30].mxu0 %vm361_vm0, %v313_v43 }
  0x55   : > { %4042 = vmatprep.mubr.msk.f32.mxu0 %vm361_vm0, %v314_v44 }
  0x58   : > { %4043 = vmatmul.mubr.msk.f32.gmra.mrb[32].mxu0 %vm361_vm0, %v315_v45 }
  0x59   : > { %4045 = vmatprep.mubr.msk.f32.mxu0 %vm361_vm0, %v316_v46 }
  0x5c   : > { %4046 = vmatmul.mubr.msk.f32.gmra.mrb[34].mxu0 %vm361_vm0, %v317_v47 }
  0x5d   : > { %4048 = vmatprep.mubr.msk.f32.mxu0 %vm361_vm0, %v318_v48 }
  0x60   : > { %4049 = vmatmul.mubr.msk.f32.gmra.mrb[36].mxu0 %vm361_vm0, %v319_v49 }
  0x61   : > { %4051 = vmatprep.mubr.msk.f32.mxu0 %vm361_vm0, %v320_v50 }
  0x64   : > { %4052 = vmatmul.mubr.msk.f32.gmra.mrb[38].mxu0 %vm361_vm0, %v321_v51 }
  0x65   : > { %4054 = vmatprep.mubr.msk.f32.mxu0 %vm361_vm0, %v322_v52 }
  0x68   : > { %4055 = vmatmul.mubr.msk.f32.gmra.mrb[40].mxu0 %vm361_vm0, %v323_v53 }
  0x69   : > { %4057 = vmatprep.mubr.msk.f32.mxu0 %vm361_vm0, %v324_v54 }
  0x6c   : > { %4058 = vmatmul.mubr.msk.f32.gmra.mrb[42].mxu0 %vm361_vm0, %v325_v55 }
  0x6d   : > { %4060 = vmatprep.mubr.msk.f32.mxu0 %vm361_vm0, %v326_v56 }
  0x70   : > { %4061 = vmatmul.mubr.msk.f32.gmra.mrb[44].mxu0 %vm361_vm0, %v327_v57 }
  0x71   : > { %4063 = vmatprep.mubr.msk.f32.mxu0 %vm361_vm0, %v328_v58 }
  0x74   : > { %4064 = vmatmul.mubr.msk.f32.gmra.mrb[46].mxu0 %vm361_vm0, %v329_v59 }
  0x75   : > { %4066 = vmatprep.mubr.msk.f32.mxu0 %vm361_vm0, %v330_v60 }
  0x78   : > { %4067 = vmatmul.mubr.msk.f32.gmra.mrb[48].mxu0 %vm361_vm0, %v331_v61 }
  0x79   : > { %4069 = vmatprep.mubr.msk.f32.mxu0 %vm361_vm0, %v332_v62 }
  0x7c   : > { %4070 = vmatmul.mubr.msk.f32.gmra.mrb[50].mxu0 %vm361_vm0, %v333_v63 }
  0x7d   : > { %4072 = vmatprep.mubr.msk.f32.mxu0 %vm361_vm0, %v334_v0 }
  0x80   : > { %4073 = vmatmul.mubr.msk.f32.gmra.mrb[52].mxu0 %vm361_vm0, %v335_v1 }
  0x81   : > { %4075 = vmatprep.mubr.msk.f32.mxu0 %vm361_vm0, %v336_v2 }
  0x84   : > { %4076 = vmatmul.mubr.msk.f32.gmra.mrb[54].mxu0 %vm361_vm0, %v337_v3 }
  0x85   : > { %4078 = vmatprep.mubr.msk.f32.mxu0 %vm361_vm0, %v338_v4 }
  0x88   : > { %4079 = vmatmul.mubr.msk.f32.gmra.mrb[56].mxu0 %vm361_vm0, %v339_v5 }
  0x89   : > { %4081 = vmatprep.mubr.msk.f32.mxu0 %vm361_vm0, %v340_v6 }
  0x8c   : > { %4082 = vmatmul.mubr.msk.f32.gmra.mrb[58].mxu0 %vm361_vm0, %v341_v7 }
  0x8d   : > { %4084 = vmatprep.mubr.msk.f32.mxu0 %vm361_vm0, %v342_v8 }
  0x90   : > { %4085 = vmatmul.mubr.msk.f32.gmra.mrb[60].mxu0 %vm361_vm0, %v343_v9 }
  0x91   : > { %4087 = vmatprep.mubr.msk.f32.mxu0 %vm361_vm0, %v344_v10 }
  0x94   : > { %4088 = vmatmul.mubr.msk.f32.gmra.mrb[62].mxu0 %vm361_vm0, %v345_v11 }
  0xeb   : > { %v3996_v13 = vpop.f32.mrb[0].mxu0 }
  0xec   : > { %v626_v14 = vadd.f32 %v3996_v13, %v4687_v12  ;;  %v620_v15 = vpop.f32.mrb[1].mxu0 }
  0xed   : > { %v621_v16 = vadd.f32 %v4687_v12, %v620_v15 }
  0xee   : > { %v940_v17 = vmax.f32 %v626_v14, 0.0 }
  0xef   : > { %v939_v18 = vmax.f32 %v621_v16, 0.0  ;;  %v3999_v19 = vpop.f32.mrb[2].mxu0 }
  0xf0   : > { %1005 = vst.msk [vmem:[#allocation2 + $0x8] sm:$0xff] %vm6069_vm1, %v940_v17  ;;  %v636_v20 = vadd.f32 %v3999_v19, %v4687_v12  ;;  %v630_v21 = vpop.f32.mrb[3].mxu0 }
  0xf1   : > { %1004 = vst.msk [vmem:[#allocation2] sm:$0xff] %vm6069_vm1, %v939_v18  ;;  %v631_v22 = vadd.f32 %v4687_v12, %v630_v21 }
  0xf2   : > { %v942_v23 = vmax.f32 %v636_v20, 0.0 }
  0xf3   : > { %v941_v24 = vmax.f32 %v631_v22, 0.0  ;;  %v4002_v25 = vpop.f32.mrb[4].mxu0 }
  0xf4   : > { %1007 = vst.msk [vmem:[#allocation2 + $0x18] sm:$0xff] %vm6069_vm1, %v942_v23  ;;  %v646_v26 = vadd.f32 %v4002_v25, %v4687_v12  ;;  %v640_v27 = vpop.f32.mrb[5].mxu0 }
  0xf5   : > { %1006 = vst.msk [vmem:[#allocation2 + $0x10] sm:$0xff] %vm6069_vm1, %v941_v24  ;;  %v641_v28 = vadd.f32 %v4687_v12, %v640_v27 }
  0xf6   : > { %v944_v29 = vmax.f32 %v646_v26, 0.0 }
  0xf7   : > { %v943_v30 = vmax.f32 %v641_v28, 0.0  ;;  %v4005_v31 = vpop.f32.mrb[6].mxu0 }
  0xf8   : > { %1009 = vst.msk [vmem:[#allocation2 + $0x28] sm:$0xff] %vm6069_vm1, %v944_v29  ;;  %v650_v32 = vpop.f32.mrb[7].mxu0 }
  0xf9   : > { %1008 = vst.msk [vmem:[#allocation2 + $0x20] sm:$0xff] %vm6069_vm1, %v943_v30  ;;  %v651_v33 = vadd.f32 %v4687_v12, %v650_v32 }
  0xfb   : > { %v945_v34 = vmax.f32 %v651_v33, 0.0  ;;  %v4008_v35 = vpop.f32.mrb[8].mxu0 }
  0xfc   : > { %v666_v36 = vadd.f32 %v4008_v35, %v4687_v12  ;;  %v660_v37 = vpop.f32.mrb[9].mxu0 }
  0xfd   : > { %1010 = vst.msk [vmem:[#allocation2 + $0x30] sm:$0xff] %vm6069_vm1, %v945_v34  ;;  %v661_v38 = vadd.f32 %v4687_v12, %v660_v37 }
  0xfe   : > { %v948_v39 = vmax.f32 %v666_v36, 0.0 }
  0xff   : > { %v947_v40 = vmax.f32 %v661_v38, 0.0  ;;  %v4011_v41 = vpop.f32.mrb[10].mxu0 }
 0x100   : > { %1013 = vst.msk [vmem:[#allocation2 + $0x48] sm:$0xff] %vm6069_vm1, %v948_v39  ;;  %v676_v42 = vadd.f32 %v4011_v41, %v4687_v12  ;;  %v670_v43 = vpop.f32.mrb[11].mxu0 }
 0x101   : > { %1012 = vst.msk [vmem:[#allocation2 + $0x40] sm:$0xff] %vm6069_vm1, %v947_v40  ;;  %v671_v44 = vadd.f32 %v4687_v12, %v670_v43 }
 0x102   : > { %v950_v45 = vmax.f32 %v676_v42, 0.0 }
 0x103   : > { %v949_v46 = vmax.f32 %v671_v44, 0.0  ;;  %v4014_v47 = vpop.f32.mrb[12].mxu0 }
 0x104   : > { %1015 = vst.msk [vmem:[#allocation2 + $0x58] sm:$0xff] %vm6069_vm1, %v950_v45  ;;  %v686_v48 = vadd.f32 %v4014_v47, %v4687_v12  ;;  %v680_v49 = vpop.f32.mrb[13].mxu0 }
 0x105   : > { %1014 = vst.msk [vmem:[#allocation2 + $0x50] sm:$0xff] %vm6069_vm1, %v949_v46  ;;  %v681_v50 = vadd.f32 %v4687_v12, %v680_v49 }
 0x106   : > { %v952_v51 = vmax.f32 %v686_v48, 0.0 }
 0x107   : > { %v951_v52 = vmax.f32 %v681_v50, 0.0  ;;  %v4017_v53 = vpop.f32.mrb[14].mxu0  ;;  %v1094_v49 = vld [vmem:[#allocation2 + $0x48] sm:$0x1]  ;;  %v1102_v50 = vld [vmem:[#allocation2 + $0x49] sm:$0x1] }
 0x108   : > { %1017 = vst.msk [vmem:[#allocation2 + $0x68] sm:$0xff] %vm6069_vm1, %v952_v51  ;;  %v690_v54 = vpop.f32.mrb[15].mxu0  ;;  %v1077_v53 = vld [vmem:[#allocation2 + $0x41] sm:$0x1] }
 0x109   : > { %1016 = vst.msk [vmem:[#allocation2 + $0x60] sm:$0xff] %vm6069_vm1, %v951_v52  ;;  %v691_v55 = vadd.f32 %v4687_v12, %v690_v54  ;;  %v1085_v54 = vld [vmem:[#allocation2 + $0x42] sm:$0x1] }
 0x10b   : > { %v953_v56 = vmax.f32 %v691_v55, 0.0  ;;  %v4020_v57 = vpop.f32.mrb[16].mxu0 }
 0x10c   : > { %v706_v58 = vadd.f32 %v4020_v57, %v4687_v12  ;;  %v700_v59 = vpop.f32.mrb[17].mxu0  ;;  %v1110_v57 = vld [vmem:[#allocation2 + $0x4a] sm:$0x1] }
 0x10d   : > { %1018 = vst.msk [vmem:[#allocation2 + $0x70] sm:$0xff] %vm6069_vm1, %v953_v56  ;;  %v701_v60 = vadd.f32 %v4687_v12, %v700_v59 }
 0x10e   : > { %v956_v61 = vmax.f32 %v706_v58, 0.0  ;;  %v1486_v58 = vld [vmem:[#allocation2 + $0x44] sm:$0x1] }
 0x10f   : > { %v955_v62 = vmax.f32 %v701_v60, 0.0  ;;  %v4023_v63 = vpop.f32.mrb[18].mxu0  ;;  %v1230_v60 = vrot.slane %v1094_v49, 7  ;;  %v1493_v49 = vld [vmem:[#allocation2 + $0xb] sm:$0x1] }
 0x110   : > { %1021 = vst.msk [vmem:[#allocation2 + $0x88] sm:$0xff] %vm6069_vm1, %v956_v61  ;;  %v716_v0 = vadd.f32 %v4023_v63, %v4687_v12  ;;  %v710_v1 = vpop.f32.mrb[19].mxu0  ;;  %v1119_v61 = vld [vmem:[#allocation2 + $0x50] sm:$0x1] }
 0x111   : > { %1020 = vst.msk [vmem:[#allocation2 + $0x80] sm:$0xff] %vm6069_vm1, %v955_v62  ;;  %v711_v2 = vadd.f32 %v4687_v12, %v710_v1  ;;  %v1478_v62 = vld [vmem:[#allocation2 + $0x43] sm:$0x1]  ;;  %v1180_v1 = vrot.slane %v1077_v53, 7  ;;  %v1797_v53 = vld [vmem:[#allocation2 + $0x55] sm:$0x1] }
 0x112   : > { %v958_v3 = vmax.f32 %v716_v0, 0.0  ;;  %v1093_v0 = vld [vmem:[#allocation2 + $0x8] sm:$0x1] }
 0x113   : > { %v957_v4 = vmax.f32 %v711_v2, 0.0  ;;  %v4026_v5 = vpop.f32.mrb[20].mxu0  ;;  %v1255_v2 = vrot.slane %v1102_v50, 7 }
 0x114   : > { %1023 = vst.msk [vmem:[#allocation2 + $0x98] sm:$0xff] %vm6069_vm1, %v958_v3  ;;  %v726_v6 = vadd.f32 %v4026_v5, %v4687_v12  ;;  %v720_v7 = vpop.f32.mrb[21].mxu0  ;;  %v1205_v3 = vrot.slane %v1085_v54, 7 }
 0x115   : > { %1022 = vst.msk [vmem:[#allocation2 + $0x90] sm:$0xff] %vm6069_vm1, %v957_v4  ;;  %v721_v8 = vadd.f32 %v4687_v12, %v720_v7  ;;  %v1135_v4 = vld [vmem:[#allocation2 + $0x52] sm:$0x1]  ;;  %v1076_v7 = vld [vmem:[#allocation2 + $0x1] sm:$0x1] }
 0x116   : > { %v960_v9 = vmax.f32 %v726_v6, 0.0 }
 0x117   : > { %v959_v10 = vmax.f32 %v721_v8, 0.0  ;;  %v4029_v11 = vpop.f32.mrb[22].mxu0  ;;  %v1101_v8 = vld [vmem:[#allocation2 + $0x9] sm:$0x1] }
 0x118   : > { %1025 = vst.msk [vmem:[#allocation2 + $0xa8] sm:$0xff] %vm6069_vm1, %v960_v9  ;;  %v730_v13 = vpop.f32.mrb[23].mxu0  ;;  %v1280_v9 = vrot.slane %v1110_v57, 7  ;;  %v1559_v11 = vrot.slane %v1486_v58, 7 }
 0x119   : > { %1024 = vst.msk [vmem:[#allocation2 + $0xa0] sm:$0xff] %vm6069_vm1, %v959_v10  ;;  %v731_v14 = vadd.f32 %v4687_v12, %v730_v13  ;;  %v1127_v10 = vld [vmem:[#allocation2 + $0x51] sm:$0x1] }
 0x11b   : > { %v961_v15 = vmax.f32 %v731_v14, 0.0  ;;  %v4032_v16 = vpop.f32.mrb[24].mxu0  ;;  %v1084_v14 = vld [vmem:[#allocation2 + $0x2] sm:$0x1] }
 0x11c   : > { %v746_v17 = vadd.f32 %v4032_v16, %v4687_v12  ;;  %v740_v18 = vpop.f32.mrb[25].mxu0  ;;  %v1109_v16 = vld [vmem:[#allocation2 + $0xa] sm:$0x1] }
 0x11d   : > { %1026 = vst.msk [vmem:[#allocation2 + $0xb0] sm:$0xff] %vm6069_vm1, %v961_v15  ;;  %v741_v19 = vadd.f32 %v4687_v12, %v740_v18  ;;  %v1305_v15 = vrot.slane %v1119_v61, 7  ;;  %v1534_v18 = vrot.slane %v1478_v62, 7 }
 0x11e   : > { %v964_v20 = vmax.f32 %v746_v17, 0.0  ;;  %v1485_v17 = vld [vmem:[#allocation2 + $0x4] sm:$0x1] }
 0x11f   : > { %v963_v21 = vmax.f32 %v741_v19, 0.0  ;;  %v4035_v22 = vpop.f32.mrb[26].mxu0 }
 0x120   : > { %1029 = vst.msk [vmem:[#allocation2 + $0xc8] sm:$0xff] %vm6069_vm1, %v964_v20  ;;  %v756_v23 = vadd.f32 %v4035_v22, %v4687_v12  ;;  %v750_v24 = vpop.f32.mrb[27].mxu0  ;;  %v4759_v20 = vsel %vm1151_vm2, %v1230_v60, %v1093_v0  ;;  %v1355_v22 = vrot.slane %v1135_v4, 7  ;;  %v2061_v60 = vld [vmem:[#allocation2 + $0x59] sm:$0x1] }
 0x121   : > { %1028 = vst.msk [vmem:[#allocation2 + $0xc0] sm:$0xff] %vm6069_vm1, %v963_v21  ;;  %v751_v25 = vadd.f32 %v4687_v12, %v750_v24  ;;  %v1118_v21 = vld [vmem:[#allocation2 + $0x10] sm:$0x1]  ;;  %v1494_v24 = vld [vmem:[#allocation2 + $0x4b] sm:$0x1] }
 0x122   : > { %v966_v26 = vmax.f32 %v756_v23, 0.0  ;;  %v1477_v23 = vld [vmem:[#allocation2 + $0x3] sm:$0x1]  ;;  %v1509_v0 = vld [vmem:[#allocation2 + $0x13] sm:$0x1] }
 0x123   : > { %v965_v27 = vmax.f32 %v751_v25, 0.0  ;;  %v4038_v28 = vpop.f32.mrb[28].mxu0  ;;  %v1502_v25 = vld [vmem:[#allocation2 + $0x4c] sm:$0x1]  ;;  %v2053_v4 = vld [vmem:[#allocation2 + $0x58] sm:$0x1] }
 0x124   : > { %1031 = vst.msk [vmem:[#allocation2 + $0xd8] sm:$0xff] %vm6069_vm1, %v966_v26  ;;  %v766_v29 = vadd.f32 %v4038_v28, %v4687_v12  ;;  %v760_v30 = vpop.f32.mrb[29].mxu0  ;;  %v4762_v26 = vsel %vm1151_vm2, %v1180_v1, %v1076_v7  ;;  %v1134_v28 = vld [vmem:[#allocation2 + $0x12] sm:$0x1]  ;;  %v1612_v50 = vrot.slane %v1502_v25, 7 }
 0x125   : > { %1030 = vst.msk [vmem:[#allocation2 + $0xd0] sm:$0xff] %vm6069_vm1, %v965_v27  ;;  %v761_v31 = vadd.f32 %v4687_v12, %v760_v30  ;;  %v4765_v27 = vsel %vm1151_vm2, %v1255_v2, %v1101_v8  ;;  %v1518_v30 = vld [vmem:[#allocation2 + $0x54] sm:$0x1]  ;;  %v1772_v1 = vld [vmem:[#allocation2 + $0x6] sm:$0x1] }
 0x126   : > { %v968_v32 = vmax.f32 %v766_v29, 0.0  ;;  %v1330_v29 = vrot.slane %v1127_v10, 7  ;;  %v1764_v8 = vld [vmem:[#allocation2 + $0x5] sm:$0x1]  ;;  %v1788_v10 = vld [vmem:[#allocation2 + $0xe] sm:$0x1] }
 0x127   : > { %v967_v33 = vmax.f32 %v761_v31, 0.0  ;;  %v4041_v34 = vpop.f32.mrb[30].mxu0  ;;  %v4767_v31 = vld [vmem:[#allocation2 + $0x53] sm:$0x1]  ;;  %v1103_v25 = vld [vmem:[#allocation2 + $0x89] sm:$0x1] }
 0x128   : > { %1033 = vst.msk [vmem:[#allocation2 + $0xe8] sm:$0xff] %vm6069_vm1, %v968_v32  ;;  %v770_v35 = vpop.f32.mrb[31].mxu0  ;;  %v4770_v34 = vsel %vm1151_vm2, %v1205_v3, %v1084_v14  ;;  %v1640_v57 = vrot.slane %v4767_v31, 7  ;;  %v2116_v31 = vrot.slane %v2053_v4, 7 }
 0x129   : > { %1032 = vst.msk [vmem:[#allocation2 + $0xe0] sm:$0xff] %vm6069_vm1, %v967_v33  ;;  %v771_v36 = vadd.f32 %v4687_v12, %v770_v35  ;;  %v4773_v35 = vsel %vm1151_vm2, %v1280_v9, %v1109_v16  ;;  %v1780_v9 = vld [vmem:[#allocation2 + $0xd] sm:$0x1] }
 0x12b   : > { %v969_v37 = vmax.f32 %v771_v36, 0.0  ;;  %v4044_v38 = vpop.f32.mrb[32].mxu0  ;;  %v4776_v36 = vsel %vm1151_vm2, %v1559_v11, %v1485_v17 }
 0x12c   : > { %v786_v39 = vadd.f32 %v4044_v38, %v4687_v12  ;;  %v780_v40 = vpop.f32.mrb[33].mxu0  ;;  %v4778_v38 = vld [vmem:[#allocation2 + $0x45] sm:$0x1] }
 0x12d   : > { %1034 = vst.msk [vmem:[#allocation2 + $0xf0] sm:$0xff] %vm6069_vm1, %v969_v37  ;;  %v781_v41 = vadd.f32 %v4687_v12, %v780_v40  ;;  %v1773_v37 = vld [vmem:[#allocation2 + $0x46] sm:$0x1] }
 0x12e   : > { %v972_v42 = vmax.f32 %v786_v39, 0.0  ;;  %v1846_v58 = vrot.slane %v1773_v37, 7  ;;  %v1086_v37 = vld [vmem:[#allocation2 + $0x82] sm:$0x1] }
 0x12f   : > { %v971_v43 = vmax.f32 %v781_v41, 0.0  ;;  %v4047_v44 = vpop.f32.mrb[34].mxu0  ;;  %v4782_v41 = vsel %vm1151_vm2, %v1305_v15, %v1118_v21  ;;  %v1095_v15 = vld [vmem:[#allocation2 + $0x88] sm:$0x1]  ;;  %v2141_v21 = vrot.slane %v2061_v60, 7  ;;  %v1207_v60 = vrot.slane %v1086_v37, 6 }
 0x130   : > { %1037 = vst.msk [vmem:[#allocation2 + $0x108] sm:$0xff] %vm6069_vm1, %v972_v42  ;;  %v796_v45 = vadd.f32 %v4047_v44, %v4687_v12  ;;  %v790_v46 = vpop.f32.mrb[35].mxu0  ;;  %v1126_v42 = vld [vmem:[#allocation2 + $0x11] sm:$0x1]  ;;  %v1587_v44 = vrot.slane %v1494_v24, 7 }
 0x131   : > { %1036 = vst.msk [vmem:[#allocation2 + $0x100] sm:$0xff] %vm6069_vm1, %v971_v43  ;;  %v791_v47 = vadd.f32 %v4687_v12, %v790_v46  ;;  %v4785_v43 = vsel %vm1151_vm2, %v1534_v18, %v1477_v23  ;;  %v1789_v46 = vld [vmem:[#allocation2 + $0x4e] sm:$0x1]  ;;  %v1804_v18 = vld [vmem:[#allocation2 + $0x16] sm:$0x1] }
 0x132   : > { %v974_v48 = vmax.f32 %v796_v45, 0.0  ;;  %v1781_v45 = vld [vmem:[#allocation2 + $0x4d] sm:$0x1]  ;;  %v1899_v3 = vrot.slane %v1789_v46, 7  ;;  %v4800_v7 = vsel %vm1151_vm2, %v1587_v44, %v1493_v49  ;;  %v1078_v24 = vld [vmem:[#allocation2 + $0x81] sm:$0x1] }
 0x133   : > { %v973_v51 = vmax.f32 %v791_v47, 0.0  ;;  %v4050_v52 = vpop.f32.mrb[36].mxu0  ;;  %v1874_v2 = vrot.slane %v1781_v45, 7  ;;  %v1232_v46 = vrot.slane %v1095_v15, 6  ;;  %v1479_v49 = vld [vmem:[#allocation2 + $0x83] sm:$0x1] }
 0x134   : > { %1039 = vst.msk [vmem:[#allocation2 + $0x118] sm:$0xff] %vm6069_vm1, %v974_v48  ;;  %v806_v55 = vadd.f32 %v4050_v52, %v4687_v12  ;;  %v800_v56 = vpop.f32.mrb[37].mxu0  ;;  %v4790_v48 = vsel %vm1151_vm2, %v1355_v22, %v1134_v28  ;;  %v1805_v52 = vld [vmem:[#allocation2 + $0x56] sm:$0x1]  ;;  %v2078_v22 = vld [vmem:[#allocation2 + $0x60] sm:$0x1]  ;;  %v4811_v28 = vsel %vm1151_vm2, %v1640_v57, %v1509_v0 }
 0x135   : > { %1038 = vst.msk [vmem:[#allocation2 + $0x110] sm:$0xff] %vm6069_vm1, %v973_v51  ;;  %v801_v59 = vadd.f32 %v4687_v12, %v800_v56  ;;  %v1665_v51 = vrot.slane %v1518_v30, 7  ;;  %v1517_v56 = vld [vmem:[#allocation2 + $0x14] sm:$0x1]  ;;  %v1952_v11 = vrot.slane %v1805_v52, 7  ;;  %v2191_v0 = vrot.slane %v2078_v22, 7 }
 0x136   : > { %v976_v63 = vmax.f32 %v806_v55, 0.0  ;;  %v1501_v55 = vld [vmem:[#allocation2 + $0xc] sm:$0x1]  ;;  %v2060_v30 = vld [vmem:[#allocation2 + $0x19] sm:$0x1]  ;;  %v1536_v4 = vrot.slane %v1479_v49, 6 }
 0x137   : > { %v975_v5 = vmax.f32 %v801_v59, 0.0  ;;  %v4053_v6 = vpop.f32.mrb[38].mxu0  ;;  %v1821_v59 = vrot.slane %v4778_v38, 7  ;;  %v4805_v16 = vsel %vm1151_vm2, %v1612_v50, %v1501_v55  ;;  %v4808_v17 = vsel %vm1151_vm2, %v1665_v51, %v1517_v56  ;;  %v1111_v38 = vld [vmem:[#allocation2 + $0x8a] sm:$0x1] }
 0x138   : > { %1041 = vst.msk [vmem:[#allocation2 + $0x128] sm:$0xff] %vm6069_vm1, %v976_v63  ;;  %v810_v13 = vpop.f32.mrb[39].mxu0  ;;  %v4795_v63 = vsel %vm1151_vm2, %v1330_v29, %v1126_v42  ;;  %v4814_v29 = vsel %vm1151_vm2, %v1846_v58, %v1772_v1  ;;  %v4823_v42 = vsel %vm1151_vm2, %v1899_v3, %v1788_v10  ;;  %v4828_v50 = vsel %vm1151_vm2, %v1952_v11, %v1804_v18  ;;  %v2052_v52 = vld [vmem:[#allocation2 + $0x18] sm:$0x1]  ;;  %v1120_v56 = vld [vmem:[#allocation2 + $0x90] sm:$0x1] }
 0x139   : > { %1040 = vst.msk [vmem:[#allocation2 + $0x120] sm:$0xff] %vm6069_vm1, %v975_v5  ;;  %v811_v19 = vadd.f32 %v4687_v12, %v810_v13  ;;  %v1927_v13 = vrot.slane %v1797_v53, 7  ;;  %v1257_v55 = vrot.slane %v1103_v25, 6  ;;  %v1136_v57 = vld [vmem:[#allocation2 + $0x92] sm:$0x1]  ;;  %v4836_v58 = vsel %vm1151_vm2, %v2141_v21, %v2060_v30 }
 0x13a   : > { %v1307_v10 = vrot.slane %v1120_v56, 6  ;;  %v1357_v11 = vrot.slane %v1136_v57, 6  ;;  %v1503_v21 = vld [vmem:[#allocation2 + $0x8c] sm:$0x1]  ;;  %v1519_v22 = vld [vmem:[#allocation2 + $0x94] sm:$0x1] }
 0x13b   : > { %v977_v32 = vmax.f32 %v811_v19, 0.0  ;;  %v4056_v33 = vpop.f32.mrb[40].mxu0  ;;  %v1796_v19 = vld [vmem:[#allocation2 + $0x15] sm:$0x1]  ;;  %v4854_v18 = vsel %vm1154_vm3, %v1257_v55, %v4765_v27  ;;  %v1774_v25 = vld [vmem:[#allocation2 + $0x86] sm:$0x1] }
 0x13c   : > { %v826_v39 = vadd.f32 %v4056_v33, %v4687_v12  ;;  %v820_v40 = vpop.f32.mrb[41].mxu0  ;;  %v4831_v51 = vsel %vm1151_vm2, %v1927_v13, %v1796_v19  ;;  %v2077_v13 = vld [vmem:[#allocation2 + $0x20] sm:$0x1]  ;;  %v1782_v37 = vld [vmem:[#allocation2 + $0x8d] sm:$0x1]  ;;  %v1848_v56 = vrot.slane %v1774_v25, 6 }
 0x13d   : > { %1042 = vst.msk [vmem:[#allocation2 + $0x130] sm:$0xff] %vm6069_vm1, %v977_v32  ;;  %v821_v47 = vadd.f32 %v4687_v12, %v820_v40  ;;  %v4820_v40 = vsel %vm1151_vm2, %v1874_v2, %v1780_v9  ;;  %v4844_v9 = vsel %vm1154_vm3, %v1232_v46, %v4759_v20  ;;  %v4858_v20 = vsel %vm1154_vm3, %v1207_v60, %v4770_v34 }
 0x13e   : > { %v980_v54 = vmax.f32 %v826_v39, 0.0  ;;  %v4817_v39 = vsel %vm1151_vm2, %v1821_v59, %v1764_v8  ;;  %v4861_v30 = vsel %vm1151_vm2, %v2191_v0, %v2077_v13  ;;  %v4873_v34 = vsel %vm1154_vm3, %v1536_v4, %v4785_v43  ;;  %v1104_v13 = vld [vmem:[#allocation2 + $0xc9] sm:$0x1] }
 0x13f   : > { %v979_v61 = vmax.f32 %v821_v47, 0.0  ;;  %v4059_v62 = vpop.f32.mrb[42].mxu0  ;;  %v1487_v47 = vld [vmem:[#allocation2 + $0x84] sm:$0x1]  ;;  %v1614_v46 = vrot.slane %v1503_v21, 6  ;;  %v1876_v57 = vrot.slane %v1782_v37, 6  ;;  %v4912_v25 = vsel %vm1154_vm3, %v1848_v56, %v4814_v29 }
 0x140   : > { %1045 = vst.msk [vmem:[#allocation2 + $0x148] sm:$0xff] %vm6069_vm1, %v980_v54  ;;  %v836_v5 = vadd.f32 %v4059_v62, %v4687_v12  ;;  %v830_v6 = vpop.f32.mrb[43].mxu0  ;;  %v1182_v54 = vrot.slane %v1078_v24, 6  ;;  %v1128_v62 = vld [vmem:[#allocation2 + $0x91] sm:$0x1]  ;;  %v1561_v3 = vrot.slane %v1487_v47, 6 }
 0x141   : > { %1044 = vst.msk [vmem:[#allocation2 + $0x140] sm:$0xff] %vm6069_vm1, %v979_v61  ;;  %v831_v14 = vadd.f32 %v4687_v12, %v830_v6  ;;  %v1282_v61 = vrot.slane %v1111_v38, 6  ;;  %v4839_v6 = vsel %vm1151_vm2, %v2116_v31, %v2052_v52  ;;  %v1332_v19 = vrot.slane %v1128_v62, 6  ;;  %v1511_v24 = vld [vmem:[#allocation2 + $0x93] sm:$0x1] }
 0x142   : > { %v982_v23 = vmax.f32 %v836_v5, 0.0  ;;  %v1495_v5 = vld [vmem:[#allocation2 + $0x8b] sm:$0x1]  ;;  %v4850_v15 = vsel %vm1154_vm3, %v1182_v54, %v4762_v26  ;;  %v4869_v27 = vsel %vm1154_vm3, %v1561_v3, %v4776_v36  ;;  %v1790_v36 = vld [vmem:[#allocation2 + $0x8e] sm:$0x1]  ;;  %v1667_v52 = vrot.slane %v1519_v22, 6 }
 0x143   : > { %v981_v32 = vmax.f32 %v831_v14, 0.0  ;;  %v4062_v33 = vpop.f32.mrb[44].mxu0  ;;  %v1806_v47 = vld [vmem:[#allocation2 + $0x96] sm:$0x1]  ;;  %v4888_v49 = vsel %vm1154_vm3, %v1332_v19, %v4795_v63  ;;  %v2062_v54 = vld [vmem:[#allocation2 + $0x99] sm:$0x1]  ;;  %v4898_v4 = vsel %vm1154_vm3, %v1614_v46, %v4805_v16 }
 0x144   : > { %1047 = vst.msk [vmem:[#allocation2 + $0x158] sm:$0xff] %vm6069_vm1, %v982_v23  ;;  %v846_v44 = vadd.f32 %v4062_v33, %v4687_v12  ;;  %v840_v45 = vpop.f32.mrb[45].mxu0  ;;  %v1589_v23 = vrot.slane %v1495_v5, 6  ;;  %v1766_v33 = vld [vmem:[#allocation2 + $0x85] sm:$0x1]  ;;  %v1259_v46 = vrot.slane %v1104_v13, 5 }
 0x145   : > { %1046 = vst.msk [vmem:[#allocation2 + $0x150] sm:$0xff] %vm6069_vm1, %v981_v32  ;;  %v841_v53 = vadd.f32 %v4687_v12, %v840_v45  ;;  %v4865_v32 = vsel %vm1154_vm3, %v1282_v61, %v4773_v35  ;;  %v4878_v45 = vsel %vm1154_vm3, %v1307_v10, %v4782_v41  ;;  %v4882_v35 = vsel %vm1154_vm3, %v1357_v11, %v4790_v48  ;;  %v1798_v41 = vld [vmem:[#allocation2 + $0x95] sm:$0x1]  ;;  %v1096_v62 = vld [vmem:[#allocation2 + $0xc8] sm:$0x1] }
 0x146   : > { %v984_v59 = vmax.f32 %v846_v44, 0.0  ;;  %v1823_v48 = vrot.slane %v1766_v33, 6  ;;  %v4892_v0 = vsel %vm1154_vm3, %v1589_v23, %v4800_v7  ;;  %v1929_v5 = vrot.slane %v1798_v41, 6  ;;  %v2079_v10 = vld [vmem:[#allocation2 + $0xa0] sm:$0x1] }
 0x147   : > { %v983_v1 = vmax.f32 %v841_v53, 0.0  ;;  %v4065_v2 = vpop.f32.mrb[46].mxu0  ;;  %v1642_v53 = vrot.slane %v1511_v24, 6  ;;  %v1079_v7 = vld [vmem:[#allocation2 + $0xc1] sm:$0x1]  ;;  %v1234_v22 = vrot.slane %v1096_v62, 5 }
 0x148   : > { %1049 = vst.msk [vmem:[#allocation2 + $0x168] sm:$0xff] %vm6069_vm1, %v984_v59  ;;  %v850_v8 = vpop.f32.mrb[47].mxu0  ;;  %v2054_v59 = vld [vmem:[#allocation2 + $0x98] sm:$0x1]  ;;  %v1954_v2 = vrot.slane %v1806_v47, 6  ;;  %v2193_v41 = vrot.slane %v2079_v10, 6 }
 0x149   : > { %1048 = vst.msk [vmem:[#allocation2 + $0x160] sm:$0xff] %vm6069_vm1, %v983_v1  ;;  %v851_v14 = vadd.f32 %v4687_v12, %v850_v8  ;;  %v1901_v1 = vrot.slane %v1790_v36, 6  ;;  %v2143_v8 = vrot.slane %v2062_v54, 6  ;;  %v4908_v19 = vsel %vm1154_vm3, %v1642_v53, %v4811_v28  ;;  %v1087_v23 = vld [vmem:[#allocation2 + $0xc2] sm:$0x1] }
 0x14a   : > { %v2118_v21 = vrot.slane %v2054_v59, 6  ;;  %v1112_v24 = vld [vmem:[#allocation2 + $0xca] sm:$0x1]  ;;  %v1488_v33 = vld [vmem:[#allocation2 + $0xc4] sm:$0x1]  ;;  %v4920_v28 = vsel %vm1154_vm3, %v1876_v57, %v4820_v40  ;;  %v4928_v29 = vsel %vm1154_vm3, %v1954_v2, %v4828_v50  ;;  %v4936_v40 = vsel %vm1154_vm3, %v1929_v5, %v4831_v51 }
 0x14b   : > { %v985_v31 = vmax.f32 %v851_v14, 0.0  ;;  %v4068_v26 = vpop.f32.mrb[48].mxu0  ;;  %v4904_v14 = vsel %vm1154_vm3, %v1667_v52, %v4808_v17  ;;  %v1480_v37 = vld [vmem:[#allocation2 + $0xc3] sm:$0x1]  ;;  %v1121_v36 = vld [vmem:[#allocation2 + $0xd0] sm:$0x1]  ;;  %v4956_v2 = vsel %vm1157_vm4, %v1259_v46, %v4854_v18 }
 0x14c   : > { %v866_v38 = vadd.f32 %v4068_v26, %v4687_v12  ;;  %v860_v44 = vpop.f32.mrb[49].mxu0  ;;  %v4932_v47 = vld [vmem:[#allocation2 + $0xd2] sm:$0x1]  ;;  %v1209_v52 = vrot.slane %v1087_v23, 5  ;;  %v1129_v53 = vld [vmem:[#allocation2 + $0xd1] sm:$0x1]  ;;  %v4946_v51 = vsel %vm1154_vm3, %v2118_v21, %v4839_v6 }
 0x14d   : > { %1050 = vst.msk [vmem:[#allocation2 + $0x170] sm:$0xff] %vm6069_vm1, %v985_v31  ;;  %v861_v43 = vadd.f32 %v4687_v12, %v860_v44  ;;  %v4916_v31 = vsel %vm1154_vm3, %v1823_v48, %v4817_v39  ;;  %v1563_v56 = vrot.slane %v1488_v33, 5  ;;  %v1496_v48 = vld [vmem:[#allocation2 + $0xcb] sm:$0x1]  ;;  %v1504_v6 = vld [vmem:[#allocation2 + $0xcc] sm:$0x1] }
 0x14e   : > { %v988_v55 = vmax.f32 %v866_v38, 0.0  ;;  %v4924_v38 = vsel %vm1154_vm3, %v1901_v1, %v4823_v42  ;;  %v4940_v42 = vsel %vm1154_vm3, %v2143_v8, %v4836_v58  ;;  %v1309_v58 = vrot.slane %v1121_v36, 5  ;;  %v4970_v18 = vld [vmem:[#allocation2 + $0xc5] sm:$0x1]  ;;  %v4984_v21 = vld [vmem:[#allocation2 + $0xcd] sm:$0x1] }
 0x14f   : > { %v987_v60 = vmax.f32 %v861_v43, 0.0  ;;  %v4071_v61 = vpop.f32.mrb[50].mxu0  ;;  %v1184_v43 = vrot.slane %v1079_v7, 5  ;;  %v4952_v1 = vsel %vm1157_vm4, %v1234_v22, %v4844_v9  ;;  %v4966_v10 = vsel %vm1157_vm4, %v1209_v52, %v4858_v20  ;;  %v1512_v9 = vld [vmem:[#allocation2 + $0xd3] sm:$0x1] }
 0x150   : > { %1053 = vst.msk [vmem:[#allocation2 + $0x188] sm:$0xff] %vm6069_vm1, %v988_v55  ;;  %v876_v63 = vadd.f32 %v4071_v61, %v4687_v12  ;;  %v870_v3 = vpop.f32.mrb[51].mxu0  ;;  %v1284_v55 = vrot.slane %v1112_v24, 5  ;;  %v1538_v61 = vrot.slane %v1480_v37, 5  ;;  %v4974_v7 = vsel %vm1154_vm3, %v2193_v41, %v4861_v30  ;;  %v5009_v41 = vld [vmem:[#allocation2 + $0x109] sm:$0x1] }
 0x151   : > { %1052 = vst.msk [vmem:[#allocation2 + $0x180] sm:$0xff] %vm6069_vm1, %v987_v60  ;;  %v871_v11 = vadd.f32 %v4687_v12, %v870_v3  ;;  %v1359_v60 = vrot.slane %v4932_v47, 5  ;;  %v1520_v3 = vld [vmem:[#allocation2 + $0xd4] sm:$0x1]  ;;  %v4962_v8 = vsel %vm1157_vm4, %v1184_v43, %v4850_v15  ;;  %v4982_v15 = vsel %vm1157_vm4, %v1563_v56, %v4869_v27  ;;  %v5005_v43 = vld [vmem:[#allocation2 + $0xd9] sm:$0x1] }
 0x152   : > { %v990_v16 = vmax.f32 %v876_v63, 0.0  ;;  %v1334_v63 = vrot.slane %v1129_v53, 5  ;;  %v4978_v13 = vsel %vm1157_vm4, %v1284_v55, %v4865_v32  ;;  %v1591_v20 = vrot.slane %v1496_v48, 5  ;;  %v5007_v53 = vld [vmem:[#allocation2 + $0x101] sm:$0x1] }
 0x153   : > { %v989_v26 = vmax.f32 %v871_v11, 0.0  ;;  %v4074_v17 = vpop.f32.mrb[52].mxu0  ;;  %v4968_v11 = vld [vmem:[#allocation2 + $0xc6] sm:$0x1]  ;;  %v4990_v30 = vsel %vm1157_vm4, %v1538_v61, %v4873_v34  ;;  %v1616_v24 = vrot.slane %v1504_v6, 5  ;;  %v1644_v27 = vrot.slane %v1512_v9, 5 }
 0x154   : > { %1055 = vst.msk [vmem:[#allocation2 + $0x198] sm:$0xff] %vm6069_vm1, %v990_v16  ;;  %v886_v39 = vadd.f32 %v4074_v17, %v4687_v12  ;;  %v880_v44 = vpop.f32.mrb[53].mxu0  ;;  %v4986_v16 = vld [vmem:[#allocation2 + $0xce] sm:$0x1]  ;;  %v1807_v17 = vld [vmem:[#allocation2 + $0xd6] sm:$0x1]  ;;  %v5001_v36 = vsel %vm1157_vm4, %v1309_v58, %v4878_v45  ;;  %v5017_v45 = vsel %vm1157_vm4, %v1334_v63, %v4888_v49 }
 0x155   : > { %1054 = vst.msk [vmem:[#allocation2 + $0x190] sm:$0xff] %vm6069_vm1, %v989_v26  ;;  %v881_v50 = vadd.f32 %v4687_v12, %v880_v44  ;;  %v1669_v26 = vrot.slane %v1520_v3, 5  ;;  %v1850_v37 = vrot.slane %v4968_v11, 5  ;;  %v4995_v44 = vld [vmem:[#allocation2 + $0xd5] sm:$0x1]  ;;  %v1878_v47 = vrot.slane %v4984_v21, 5 }
 0x156   : > { %v992_v54 = vmax.f32 %v886_v39, 0.0  ;;  %v1825_v39 = vrot.slane %v4970_v18, 5  ;;  %v1097_v34 = vld [vmem:[#allocation2 + $0x108] sm:$0x1]  ;;  %v1956_v55 = vrot.slane %v1807_v17, 5  ;;  %v5025_v58 = vsel %vm1157_vm4, %v1616_v24, %v4898_v4 }
 0x157   : > { %v991_v57 = vmax.f32 %v881_v50, 0.0  ;;  %v4077_v59 = vpop.f32.mrb[54].mxu0  ;;  %v1903_v50 = vrot.slane %v4986_v16, 5  ;;  %v1931_v63 = vrot.slane %v4995_v44, 5  ;;  %v5037_v6 = vld [vmem:[#allocation2 + $0xe0] sm:$0x1]  ;;  %v5047_v11 = vsel %vm1157_vm4, %v1644_v27, %v4908_v19 }
 0x158   : > { %1057 = vst.msk [vmem:[#allocation2 + $0x1a8] sm:$0xff] %vm6069_vm1, %v992_v54  ;;  %v890_v62 = vpop.f32.mrb[55].mxu0  ;;  %v5013_v54 = vsel %vm1157_vm4, %v1359_v60, %v4882_v35  ;;  %v5021_v59 = vsel %vm1157_vm4, %v1591_v20, %v4892_v0  ;;  %v5029_v35 = vsel %vm1157_vm4, %v1669_v26, %v4904_v14  ;;  %v5031_v60 = vld [vmem:[#allocation2 + $0xd8] sm:$0x1]  ;;  %v2145_v0 = vrot.slane %v5005_v43, 5 }
 0x159   : > { %1056 = vst.msk [vmem:[#allocation2 + $0x1a0] sm:$0xff] %vm6069_vm1, %v991_v57  ;;  %v891_v5 = vadd.f32 %v4687_v12, %v890_v62  ;;  %v1098_v57 = vld [vmem:[#allocation2 + $0x148] sm:$0x1]  ;;  %v1236_v62 = vrot.slane %v1097_v34, 4  ;;  %v1081_v14 = vld [vmem:[#allocation2 + $0x141] sm:$0x1]  ;;  %v5063_v19 = vsel %vm1157_vm4, %v1878_v47, %v4920_v28 }
 0x15a   : > { %v1186_v3 = vrot.slane %v5007_v53, 4  ;;  %v5043_v9 = vld [vmem:[#allocation2 + $0x102] sm:$0x1]  ;;  %v1099_v20 = vld [vmem:[#allocation2 + $0x188] sm:$0x1]  ;;  %v1238_v21 = vrot.slane %v1098_v57, 3 }
 0x15b   : > { %v993_v22 = vmax.f32 %v891_v5, 0.0  ;;  %v4080_v23 = vpop.f32.mrb[56].mxu0  ;;  %v1261_v5 = vrot.slane %v5009_v41, 4  ;;  %v5049_v16 = vld [vmem:[#allocation2 + $0x149] sm:$0x1]  ;;  %v1240_v34 = vrot.slane %v1099_v20, 2 }
 0x15c   : > { %v906_v32 = vadd.f32 %v4080_v23, %v4687_v12  ;;  %v900_v33 = vpop.f32.mrb[57].mxu0  ;;  %v5057_v23 = vsel %vm1157_vm4, %v1825_v39, %v4916_v31  ;;  %v1082_v17 = vld [vmem:[#allocation2 + $0x181] sm:$0x1]  ;;  %v2120_v39 = vrot.slane %v5031_v60, 5  ;;  %v1211_v47 = vrot.slane %v5043_v9, 4 }
 0x15d   : > { %1058 = vst.msk [vmem:[#allocation2 + $0x1b0] sm:$0xff] %vm6069_vm1, %v993_v22  ;;  %v901_v46 = vadd.f32 %v4687_v12, %v900_v33  ;;  %v5053_v22 = vsel %vm1157_vm4, %v1850_v37, %v4912_v25  ;;  %v5067_v33 = vsel %vm1157_vm4, %v1903_v50, %v4924_v38  ;;  %v5071_v25 = vsel %vm1157_vm4, %v1956_v55, %v4928_v29  ;;  %v1107_v29 = vld [vmem:[#allocation2 + $0x189] sm:$0x1]  ;;  %v1090_v41 = vld [vmem:[#allocation2 + $0x182] sm:$0x1] }
 0x15e   : > { %v996_v52 = vmax.f32 %v906_v32, 0.0  ;;  %v5059_v32 = vld [vmem:[#allocation2 + $0x142] sm:$0x1]  ;;  %v1188_v37 = vrot.slane %v1081_v14, 3  ;;  %v1237_v38 = vsel %vm1160_vm5, %v1236_v62, %v4952_v1  ;;  %v1263_v53 = vrot.slane %v5049_v16, 3 }
 0x15f   : > { %v995_v56 = vmax.f32 %v901_v46, 0.0  ;;  %v4083_v48 = vpop.f32.mrb[58].mxu0  ;;  %v2195_v46 = vrot.slane %v5037_v6, 5  ;;  %v1213_v55 = vrot.slane %v5059_v32, 3  ;;  %v1187_v1 = vsel %vm1160_vm5, %v1186_v3, %v4962_v8  ;;  %v4452_v14 = vld [vmem:[%s6063_s2] ss:$0 sm:$0xff] }
 0x160   : > { %1061 = vst.msk [vmem:[#allocation2 + $0x1c8] sm:$0xff] %vm6069_vm1, %v996_v52  ;;  %v916_v49 = vadd.f32 %v4083_v48, %v4687_v12  ;;  %v910_v61 = vpop.f32.mrb[59].mxu0  ;;  %v1190_v52 = vrot.slane %v1082_v17, 2  ;;  %v1262_v62 = vsel %vm1160_vm5, %v1261_v5, %v4956_v2  ;;  %v1189_v16 = vsel %vm1163_vm6, %v1188_v37, %v1187_v1 }
 0x161   : > { %1060 = vst.msk [vmem:[#allocation2 + $0x1c0] sm:$0xff] %vm6069_vm1, %v995_v56  ;;  %v911_v4 = vadd.f32 %v4687_v12, %v910_v61  ;;  %v1122_v56 = vld [vmem:[#allocation2 + $0x110] sm:$0x1]  ;;  %v1215_v5 = vrot.slane %v1090_v41, 2  ;;  %v1264_v41 = vsel %vm1163_vm6, %v1263_v53, %v1262_v62  ;;  %v5224_v60 = vsel %vm1157_vm4, %v2195_v46, %v4974_v7  ;;  %v1769_v46 = vld [vmem:[#allocation2 + $0x145] sm:$0x1] }
 0x162   : > { %v998_v18 = vmax.f32 %v916_v49, 0.0  ;;  %v1191_v32 = vsel %vm1166_vm7, %v1190_v52, %v1189_v16  ;;  %v1212_v52 = vsel %vm1160_vm5, %v1211_v47, %v4966_v10  ;;  %v1140_v47 = vld [vmem:[#allocation2 + $0x192] sm:$0x1] }
 0x163   : > { %v997_v24 = vmax.f32 %v911_v4, 0.0  ;;  %v4086_v26 = vpop.f32.mrb[60].mxu0  ;;  %v1113_v4 = vld [vmem:[#allocation2 + $0x10a] sm:$0x1] }
 0x164   : > { %1063 = vst.msk [vmem:[#allocation2 + $0x1d8] sm:$0xff] %vm6069_vm1, %v998_v18  ;;  %v926_v31 = vadd.f32 %v4086_v26, %v4687_v12  ;;  %v920_v27 = vpop.f32.mrb[61].mxu0  ;;  %v1123_v26 = vld [vmem:[#allocation2 + $0x150] sm:$0x1]  ;;  %v1286_v1 = vrot.slane %v1113_v4, 4 }
 0x165   : > { %1062 = vst.msk [vmem:[#allocation2 + $0x1d0] sm:$0xff] %vm6069_vm1, %v997_v24  ;;  %v921_v28 = vadd.f32 %v4687_v12, %v920_v27  ;;  %v1239_v12 = vsel %vm1163_vm6, %v1238_v21, %v1237_v38  ;;  %v1265_v21 = vrot.slane %v1107_v29, 2  ;;  %v1124_v27 = vld [vmem:[#allocation2 + $0x190] sm:$0x1]  ;;  %v1138_v38 = vld [vmem:[#allocation2 + $0x112] sm:$0x1] }
 0x166   : > { %v1000_v50 = vmax.f32 %v926_v31, 0.0  ;;  %v1241_v3 = vsel %vm1166_vm7, %v1240_v34, %v1239_v12  ;;  %v1311_v34 = vrot.slane %v1122_v56, 4  ;;  %v1315_v56 = vrot.slane %v1124_v27, 2  ;;  %v1489_v27 = vld [vmem:[#allocation2 + $0x104] sm:$0x1] }
 0x167   : > { %v999_v48 = vmax.f32 %v921_v28, 0.0  ;;  %v4089_v57 = vpop.f32.mrb[62].mxu0  ;;  %v1100_v49 = vld [vmem:[#allocation2 + $0x1c8] sm:$0x1]  ;;  %v1108_v61 = vld [vmem:[#allocation2 + $0x1c9] sm:$0x1] }
 0x168   : > { %1065 = vst.msk [vmem:[#allocation2 + $0x1e8] sm:$0xff] %vm6069_vm1, %v1000_v50  ;;  %v930_v9 = vpop.f32.mrb[63].mxu0  ;;  %v1242_v18 = vrot.slane %v1100_v49, 1  ;;  %v1083_v20 = vld [vmem:[#allocation2 + $0x1c1] sm:$0x1]  ;;  %v1267_v31 = vrot.slane %v1108_v61, 1  ;;  %v1266_v61 = vsel %vm1166_vm7, %v1265_v21, %v1264_v41 }
 0x169   : > { %1064 = vst.msk [vmem:[#allocation2 + $0x1e0] sm:$0xff] %vm6069_vm1, %v999_v48  ;;  %v931_v8 = vadd.f32 %v4452_v14, %v930_v9  ;;  %v1192_v24 = vrot.slane %v1083_v20, 1  ;;  %v1091_v2 = vld [vmem:[#allocation2 + $0x1c2] sm:$0x1]  ;;  %v1114_v28 = vld [vmem:[#allocation2 + $0x14a] sm:$0x1]  ;;  %v1214_v14 = vsel %vm1163_vm6, %v1213_v55, %v1212_v52  ;;  %v1312_v55 = vsel %vm1160_vm5, %v1311_v34, %v5001_v36 }
 0x16a   : > { %v1243_v17 = vsel %vm1169_vm8, %v1242_v18, %v1241_v3  ;;  %v1217_v29 = vrot.slane %v1091_v2, 1  ;;  %v1115_v48 = vld [vmem:[#allocation2 + $0x18a] sm:$0x1]  ;;  %v1313_v49 = vrot.slane %v1123_v26, 3  ;;  %v1288_v9 = vrot.slane %v1114_v28, 3 }
 0x16b   : > { %v1001_v50 = vmax.f32 %v931_v8, 0.0  ;;  %1244 = vrot.lane.b32.xlu1 %v1243_v17, %s4462_s30  ;;  %v1193_v37 = vsel %vm1169_vm8, %v1192_v24, %v1191_v32  ;;  %v1116_v12 = vld [vmem:[#allocation2 + $0x1ca] sm:$0x1]  ;;  %v1139_v18 = vld [vmem:[#allocation2 + $0x152] sm:$0x1]  ;;  %v1268_v16 = vsel %vm1169_vm8, %v1267_v31, %v1266_v61  ;;  %v1216_v53 = vsel %vm1166_vm7, %v1215_v5, %v1214_v14 }
 0x16c   : > { %1194 = vrot.lane.b32.xlu0 %v1193_v37, %s4463_s8  ;;  %v1125_v57 = vld [vmem:[#allocation2 + $0x1d0] sm:$0x1]  ;;  %v1130_v20 = vld [vmem:[#allocation2 + $0x111] sm:$0x1]  ;;  %v1290_v10 = vrot.slane %v1115_v48, 2  ;;  %v5111_v4 = vsel %vm1169_vm8, %v1217_v29, %v1216_v53  ;;  %v1292_v21 = vrot.slane %v1116_v12, 1  ;;  %v1314_v5 = vsel %vm1163_vm6, %v1313_v49, %v1312_v55 }
 0x16d   : > { %1066 = vst.msk [vmem:[#allocation2 + $0x1f0] sm:$0xff] %vm6069_vm1, %v1001_v50  ;;  %v1317_v62 = vrot.slane %v1125_v57, 1  ;;  %v1131_v8 = vld [vmem:[#allocation2 + $0x151] sm:$0x1]  ;;  %v1141_v3 = vld [vmem:[#allocation2 + $0x1d2] sm:$0x1]  ;;  %v1287_v26 = vsel %vm1160_vm5, %v1286_v1, %v4978_v13  ;;  %v1316_v28 = vsel %vm1166_vm7, %v1315_v56, %v1314_v5 }
 0x16e   : > { %v1361_v24 = vrot.slane %v1138_v38, 4  ;;  %v1132_v2 = vld [vmem:[#allocation2 + $0x191] sm:$0x1]  ;;  %v1363_v17 = vrot.slane %v1139_v18, 3  ;;  %v1336_v31 = vrot.slane %v1130_v20, 4  ;;  %v1289_v36 = vsel %vm1163_vm6, %v1288_v9, %v1287_v26 }
 0x16f   : > { %1269 = vrot.lane.b32.xlu1 %v1268_v16, %s4464_s9  ;;  %v1133_v32 = vld [vmem:[#allocation2 + $0x1d1] sm:$0x1]  ;;  %v1365_v50 = vrot.slane %v1140_v47, 2  ;;  %v1338_v38 = vrot.slane %v1131_v8, 3  ;;  %v1490_v37 = vld [vmem:[#allocation2 + $0x144] sm:$0x1]  ;;  %v5123_v34 = vsel %vm1169_vm8, %v1317_v62, %v1316_v28  ;;  %v1291_v48 = vsel %vm1166_vm7, %v1290_v10, %v1289_v36 }
 0x170   : > { %1219 = vrot.lane.b32.xlu0 %v5111_v4, %s4465_s10  ;;  %v1481_v29 = vld [vmem:[#allocation2 + $0x103] sm:$0x1]  ;;  %v1367_v41 = vrot.slane %v1141_v3, 1  ;;  %v1340_v52 = vrot.slane %v1132_v2, 2  ;;  %v1491_v13 = vld [vmem:[#allocation2 + $0x184] sm:$0x1]  ;;  %v5129_v49 = vsel %vm1169_vm8, %v1292_v21, %v1291_v48  ;;  %v1362_v12 = vsel %vm1160_vm5, %v1361_v24, %v5013_v54 }
 0x171   : > { %v1482_v57 = vld [vmem:[#allocation2 + $0x143] sm:$0x1]  ;;  %v1342_v1 = vrot.slane %v1133_v32, 1  ;;  %v1492_v61 = vld [vmem:[#allocation2 + $0x1c4] sm:$0x1]  ;;  %v1565_v14 = vrot.slane %v1489_v27, 4  ;;  %v1364_v9 = vsel %vm1163_vm6, %v1363_v17, %v1362_v12  ;;  %v1337_v18 = vsel %vm1160_vm5, %v1336_v31, %v5017_v45 }
 0x172   : > { %v1483_v56 = vld [vmem:[#allocation2 + $0x183] sm:$0x1]  ;;  %v1567_v20 = vrot.slane %v1490_v37, 3  ;;  %v1540_v53 = vrot.slane %v1481_v29, 4  ;;  %v1497_v62 = vld [vmem:[#allocation2 + $0x10b] sm:$0x1]  ;;  %v1366_v10 = vsel %vm1166_vm7, %v1365_v50, %v1364_v9  ;;  %v1339_v54 = vsel %vm1163_vm6, %v1338_v38, %v1337_v18 }
 0x173   : > { %1319 = vrot.lane.b32.xlu1 %v5123_v34, %s4466_s11  ;;  %v1484_v16 = vld [vmem:[#allocation2 + $0x1c3] sm:$0x1]  ;;  %v1569_v47 = vrot.slane %v1491_v13, 2  ;;  %v1542_v8 = vrot.slane %v1482_v57, 3  ;;  %v1498_v55 = vld [vmem:[#allocation2 + $0x14b] sm:$0x1]  ;;  %v5143_v3 = vsel %vm1169_vm8, %v1367_v41, %v1366_v10  ;;  %v1341_v24 = vsel %vm1166_vm7, %v1340_v52, %v1339_v54 }
 0x174   : > { %1294 = vrot.lane.b32.xlu0 %v5129_v49, %s4467_s12  ;;  %v5140_v21 = vld [vmem:[#allocation2 + $0x10c] sm:$0x1]  ;;  %v1571_v2 = vrot.slane %v1492_v61, 1  ;;  %v1544_v45 = vrot.slane %v1483_v56, 2  ;;  %v1499_v5 = vld [vmem:[#allocation2 + $0x18b] sm:$0x1]  ;;  %v5151_v17 = vsel %vm1169_vm8, %v1342_v1, %v1341_v24  ;;  %v1566_v32 = vsel %vm1160_vm5, %v1565_v14, %v4982_v15 }
 0x175   : > { %v5146_v26 = vld [vmem:[#allocation2 + $0x114] sm:$0x1]  ;;  %v1546_v31 = vrot.slane %v1484_v16, 1  ;;  %v1500_v27 = vld [vmem:[#allocation2 + $0x1cb] sm:$0x1]  ;;  %v1593_v28 = vrot.slane %v1497_v62, 4  ;;  %v1568_v50 = vsel %vm1163_vm6, %v1567_v20, %v1566_v32  ;;  %v1541_v38 = vsel %vm1160_vm5, %v1540_v53, %v4990_v30 }
 0x176   : > { %v1513_v36 = vld [vmem:[#allocation2 + $0x113] sm:$0x1]  ;;  %v1595_v37 = vrot.slane %v1498_v55, 3  ;;  %v1618_v29 = vrot.slane %v5140_v21, 4  ;;  %v1776_v48 = vld [vmem:[#allocation2 + $0x106] sm:$0x1]  ;;  %v1570_v15 = vsel %vm1166_vm7, %v1569_v47, %v1568_v50  ;;  %v1543_v52 = vsel %vm1163_vm6, %v1542_v8, %v1541_v38 }
 0x177   : > { %1369 = vrot.lane.b32.xlu1 %v5143_v3, %s4468_s13  ;;  %v5161_v41 = vld [vmem:[#allocation2 + $0x105] sm:$0x1]  ;;  %v1597_v13 = vrot.slane %v1499_v5, 2  ;;  %v1671_v57 = vrot.slane %v5146_v26, 4  ;;  %v5166_v12 = vld [vmem:[#allocation2 + $0x10d] sm:$0x1]  ;;  %v5171_v61 = vsel %vm1169_vm8, %v1571_v2, %v1570_v15  ;;  %v1545_v30 = vsel %vm1166_vm7, %v1544_v45, %v1543_v52 }
 0x178   : > { %1344 = vrot.lane.b32.xlu0 %v5151_v17, %s4469_s14  ;;  %v5168_v1 = vld [vmem:[#allocation2 + $0x10e] sm:$0x1]  ;;  %v1599_v14 = vrot.slane %v1500_v27, 1  ;;  %v1506_v56 = vld [vmem:[#allocation2 + $0x14c] sm:$0x1]  ;;  %v1646_v9 = vrot.slane %v1513_v36, 4  ;;  %v1547_v20 = vsel %vm1169_vm8, %v1546_v31, %v1545_v30  ;;  %v1594_v16 = vsel %vm1160_vm5, %v1593_v28, %v5021_v59 }
 0x179   : > { %v5174_v18 = vld [vmem:[#allocation2 + $0x116] sm:$0x1]  ;;  %v1507_v53 = vld [vmem:[#allocation2 + $0x18c] sm:$0x1]  ;;  %v1852_v62 = vrot.slane %v1776_v48, 4  ;;  %v1827_v10 = vrot.slane %v5161_v41, 4  ;;  %v1596_v47 = vsel %vm1163_vm6, %v1595_v37, %v1594_v16  ;;  %v5192_v59 = vsel %vm1157_vm4, %v1931_v63, %v4936_v40 }
 0x17a   : > { %v5182_v54 = vld [vmem:[#allocation2 + $0x115] sm:$0x1]  ;;  %v1508_v8 = vld [vmem:[#allocation2 + $0x1cc] sm:$0x1]  ;;  %v1880_v55 = vrot.slane %v5166_v12, 4  ;;  %v1905_v21 = vrot.slane %v5168_v1, 4  ;;  %v1598_v2 = vsel %vm1166_vm7, %v1597_v13, %v1596_v47  ;;  %v5202_v32 = vsel %vm1157_vm4, %v2145_v0, %v4940_v42 }
 0x17b   : > { %1573 = vrot.lane.b32.xlu1 %v5171_v61, %s4465_s10  ;;  %v5194_v24 = vld [vmem:[#allocation2 + $0x119] sm:$0x1]  ;;  %v1620_v45 = vrot.slane %v1506_v56, 3  ;;  %v1522_v5 = vld [vmem:[#allocation2 + $0x154] sm:$0x1]  ;;  %v1958_v26 = vrot.slane %v5174_v18, 4  ;;  %v1600_v44 = vsel %vm1169_vm8, %v1599_v14, %v1598_v2  ;;  %v5212_v36 = vsel %vm1157_vm4, %v2120_v39, %v4946_v51 }
 0x17c   : > { %1548 = vrot.lane.b32.xlu0 %v1547_v20, %s4463_s8  ;;  %v5204_v31 = vld [vmem:[#allocation2 + $0x118] sm:$0x1]  ;;  %v1622_v40 = vrot.slane %v1507_v53, 2  ;;  %v1523_v63 = vld [vmem:[#allocation2 + $0x194] sm:$0x1]  ;;  %v1933_v28 = vrot.slane %v5182_v54, 4  ;;  %v1619_v42 = vsel %vm1160_vm5, %v1618_v29, %v5025_v58  ;;  %v1672_v51 = vsel %vm1160_vm5, %v1671_v57, %v5029_v35 }
 0x17d   : > { %v1514_v27 = vld [vmem:[#allocation2 + $0x153] sm:$0x1]  ;;  %v5214_v50 = vld [vmem:[#allocation2 + $0x120] sm:$0x1]  ;;  %v1624_v43 = vrot.slane %v1508_v8, 1  ;;  %v2147_v37 = vrot.slane %v5194_v24, 4  ;;  %v1647_v58 = vsel %vm1160_vm5, %v1646_v9, %v5047_v11  ;;  %v1621_v15 = vsel %vm1163_vm6, %v1620_v45, %v1619_v42 }
 0x17e   : > { %v1524_v0 = vld [vmem:[#allocation2 + $0x1d4] sm:$0x1]  ;;  %v1515_v38 = vld [vmem:[#allocation2 + $0x193] sm:$0x1]  ;;  %v1673_v39 = vrot.slane %v1522_v5, 3  ;;  %v2122_v41 = vrot.slane %v5204_v31, 4  ;;  %v1853_v7 = vsel %vm1160_vm5, %v1852_v62, %v5053_v22  ;;  %v1623_v35 = vsel %vm1166_vm7, %v1622_v40, %v1621_v15 }
 0x17f   : > { %1601 = vrot.lane.b32.xlu1 %v1600_v44, %s4464_s9  ;;  %v1516_v48 = vld [vmem:[#allocation2 + $0x1d3] sm:$0x1]  ;;  %v1777_v29 = vld [vmem:[#allocation2 + $0x146] sm:$0x1]  ;;  %v1675_v6 = vrot.slane %v1523_v63, 2  ;;  %v1648_v52 = vrot.slane %v1514_v27, 3  ;;  %v1828_v11 = vsel %vm1160_vm5, %v1827_v10, %v5057_v23  ;;  %v5246_v30 = vsel %vm1169_vm8, %v1624_v43, %v1623_v35 }
 0x180   : > { %1576 = vrot.lane.b32.xlu0 %v5129_v49, %s4462_s30  ;;  %v5236_v49 = vld [vmem:[#allocation2 + $0x14d] sm:$0x1]  ;;  %v1677_v13 = vrot.slane %v1524_v0, 1  ;;  %v1650_v57 = vrot.slane %v1515_v38, 2  ;;  %v1778_v12 = vld [vmem:[#allocation2 + $0x186] sm:$0x1]  ;;  %v1881_v9 = vsel %vm1160_vm5, %v1880_v55, %v5063_v19  ;;  %v1674_v23 = vsel %vm1163_vm6, %v1673_v39, %v1672_v51 }
 0x181   : > { %v5241_v1 = vld [vmem:[#allocation2 + $0x14e] sm:$0x1]  ;;  %v1652_v22 = vrot.slane %v1516_v48, 1  ;;  %v1779_v14 = vld [vmem:[#allocation2 + $0x1c6] sm:$0x1]  ;;  %v2197_v20 = vrot.slane %v5214_v50, 4  ;;  %v1906_v10 = vsel %vm1160_vm5, %v1905_v21, %v5067_v33  ;;  %v1676_v8 = vsel %vm1166_vm7, %v1675_v6, %v1674_v23 }
 0x182   : > { %v1770_v56 = vld [vmem:[#allocation2 + $0x185] sm:$0x1]  ;;  %v1854_v16 = vrot.slane %v1777_v29, 3  ;;  %v1829_v62 = vrot.slane %v1769_v46, 3  ;;  %v1809_v47 = vld [vmem:[#allocation2 + $0x156] sm:$0x1]  ;;  %v1649_v24 = vsel %vm1163_vm6, %v1648_v52, %v1647_v58  ;;  %v5260_v45 = vsel %vm1169_vm8, %v1677_v13, %v1676_v8 }
 0x183   : > { %1629 = vrot.lane.b32.xlu1 %v5143_v3, %s4466_s11  ;;  %v1771_v53 = vld [vmem:[#allocation2 + $0x1c5] sm:$0x1]  ;;  %v1856_v2 = vrot.slane %v1778_v12, 2  ;;  %v1882_v19 = vrot.slane %v5236_v49, 3  ;;  %v1801_v55 = vld [vmem:[#allocation2 + $0x155] sm:$0x1]  ;;  %v1651_v5 = vsel %vm1166_vm7, %v1650_v57, %v1649_v24  ;;  %v1959_v51 = vsel %vm1160_vm5, %v1958_v26, %v5071_v25 }
 0x184   : > { %1626 = vrot.lane.b32.xlu0 %v5246_v30, %s4467_s12  ;;  %v1858_v44 = vrot.slane %v1779_v14, 1  ;;  %v1831_v40 = vrot.slane %v1770_v56, 2  ;;  %v1786_v63 = vld [vmem:[#allocation2 + $0x18d] sm:$0x1]  ;;  %v2065_v27 = vld [vmem:[#allocation2 + $0x159] sm:$0x1]  ;;  %v5266_v33 = vsel %vm1169_vm8, %v1652_v22, %v1651_v5  ;;  %v1855_v0 = vsel %vm1163_vm6, %v1854_v16, %v1853_v7 }
 0x185   : > { %v1833_v21 = vrot.slane %v1771_v53, 1  ;;  %v1787_v50 = vld [vmem:[#allocation2 + $0x1cd] sm:$0x1]  ;;  %v1907_v42 = vrot.slane %v5241_v1, 3  ;;  %v1960_v43 = vrot.slane %v1809_v47, 3  ;;  %v1934_v39 = vsel %vm1160_vm5, %v1933_v28, %v5192_v59 }
 0x186   : > { %v1794_v38 = vld [vmem:[#allocation2 + $0x18e] sm:$0x1]  ;;  %v2148_v48 = vsel %vm1160_vm5, %v2147_v37, %v5202_v32  ;;  %v2057_v58 = vld [vmem:[#allocation2 + $0x158] sm:$0x1]  ;;  %v2082_v29 = vld [vmem:[#allocation2 + $0x160] sm:$0x1]  ;;  %v1857_v15 = vsel %vm1166_vm7, %v1856_v2, %v1855_v0  ;;  %v1830_v6 = vsel %vm1163_vm6, %v1829_v62, %v1828_v11  ;;  %v1883_v57 = vsel %vm1163_vm6, %v1882_v19, %v1881_v9 }
 0x187   : > { %1679 = vrot.lane.b32.xlu1 %v5260_v45, %s4468_s13  ;;  %v1884_v52 = vrot.slane %v1786_v63, 2  ;;  %v1810_v7 = vld [vmem:[#allocation2 + $0x196] sm:$0x1]  ;;  %v1802_v46 = vld [vmem:[#allocation2 + $0x195] sm:$0x1]  ;;  %v1935_v18 = vrot.slane %v1801_v55, 3  ;;  %v1859_v25 = vsel %vm1169_vm8, %v1858_v44, %v1857_v15  ;;  %v1832_v26 = vsel %vm1166_vm7, %v1831_v40, %v1830_v6 }
 0x188   : > { %1654 = vrot.lane.b32.xlu0 %v5266_v33, %s4469_s14  ;;  %v1886_v54 = vrot.slane %v1787_v50, 1  ;;  %v2066_v49 = vld [vmem:[#allocation2 + $0x199] sm:$0x1]  ;;  %v2149_v59 = vrot.slane %v2065_v27, 3  ;;  %v1834_v32 = vsel %vm1169_vm8, %v1833_v21, %v1832_v26  ;;  %v1909_v28 = vrot.slane %v1794_v38, 2  ;;  %v1386_v9 = vld [vmem:[%s6064_s3] sm:$0xff] }
 0x189   : > { %v2058_v37 = vld [vmem:[#allocation2 + $0x198] sm:$0x1]  ;;  %v2124_v35 = vrot.slane %v2057_v58, 3  ;;  %v2199_v13 = vrot.slane %v2082_v29, 3  ;;  %v1795_v12 = vld [vmem:[#allocation2 + $0x1ce] sm:$0x1]  ;;  %v2123_v22 = vsel %vm1160_vm5, %v2122_v41, %v5212_v36  ;;  %v1885_v56 = vsel %vm1166_vm7, %v1884_v52, %v1883_v57 }
 0x18a   : > { %v1962_v11 = vrot.slane %v1810_v7, 2  ;;  %v1937_v1 = vrot.slane %v1802_v46, 2  ;;  %v2083_v14 = vld [vmem:[#allocation2 + $0x1a0] sm:$0x1]  ;;  %v1908_v23 = vsel %vm1163_vm6, %v1907_v42, %v1906_v10  ;;  %v2151_v16 = vrot.slane %v2066_v49, 2  ;;  %v1387_v31 = vld [vmem:[%s6064_s3 + $0x8] sm:$0xff] }
 0x18b   : > { %1860 = vrot.lane.b32.xlu1 %v1859_v25, %s4465_s10  ;;  %v2198_v53 = vsel %vm1160_vm5, %v2197_v20, %v5224_v60  ;;  %v2069_v62 = vld [vmem:[#allocation2 + $0x5a] sm:$0x1]  ;;  %v1887_v36 = vsel %vm1169_vm8, %v1886_v54, %v1885_v56  ;;  %v1811_v41 = vld [vmem:[#allocation2 + $0x1d6] sm:$0x1]  ;;  %v1961_v47 = vsel %vm1163_vm6, %v1960_v43, %v1959_v51  ;;  %v1936_v10 = vsel %vm1163_vm6, %v1935_v18, %v1934_v39  ;;  %v1803_v19 = vld [vmem:[#allocation2 + $0x1d5] sm:$0x1] }
 0x18c   : > { %1835 = vrot.lane.b32.xlu0 %v1834_v32, %s4463_s8  ;;  %v2126_v8 = vrot.slane %v2058_v37, 2  ;;  %v5307_v24 = vld [vmem:[#allocation2 + $0x9a] sm:$0x1]  ;;  %v1388_v60 = vld [vmem:[%s6064_s3 + $0x10] sm:$0xff]  ;;  %v1911_v2 = vrot.slane %v1795_v12, 1  ;;  %v2150_v5 = vsel %vm1163_vm6, %v2149_v59, %v2148_v48  ;;  %v2125_v44 = vsel %vm1163_vm6, %v2124_v35, %v2123_v22  ;;  %v1390_v0 = vld [vmem:[%s6064_s3 + $0x20] sm:$0xff] }
 0x18d   : > { %v1389_v20 = vld [vmem:[%s6064_s3 + $0x18] sm:$0xff]  ;;  %v2201_v40 = vrot.slane %v2083_v14, 2  ;;  %v1910_v27 = vsel %vm1166_vm7, %v1909_v28, %v1908_v23  ;;  %v1963_v21 = vsel %vm1166_vm7, %v1962_v11, %v1961_v47  ;;  %v1938_v50 = vsel %vm1166_vm7, %v1937_v1, %v1936_v10  ;;  %v1391_v38 = vld [vmem:[%s6064_s3 + $0x28] sm:$0xff]  ;;  %v2084_v39 = vld [vmem:[#allocation2 + $0x1e0] sm:$0x1] }
 0x18e   : > { %v2067_v55 = vld [vmem:[#allocation2 + $0x1d9] sm:$0x1]  ;;  %v5318_v63 = vld [vmem:[#allocation2 + $0xda] sm:$0x1]  ;;  %v2059_v42 = vld [vmem:[#allocation2 + $0x1d8] sm:$0x1]  ;;  %v2200_v43 = vsel %vm1163_vm6, %v2199_v13, %v2198_v53  ;;  %v5333_v58 = vpack.c.bf16 %v1387_v31, %v1386_v9  ;;  %v2127_v7 = vsel %vm1166_vm7, %v2126_v8, %v2125_v44  ;;  %v5342_v26 = vpack.c.bf16 %v1389_v20, %v1388_v60 }
 0x18f   : > { %1888 = vrot.lane.b32.xlu1 %v1887_v36, %s4464_s9  ;;  %v1964_v51 = vrot.slane %v1811_v41, 1  ;;  %v2166_v48 = vrot.slane %v2069_v62, 7  ;;  %v1392_v29 = vld [vmem:[%s6064_s3 + $0x30] sm:$0xff]  ;;  %v1393_v15 = vld [vmem:[%s6064_s3 + $0x38] sm:$0xff]  ;;  %v1939_v6 = vrot.slane %v1803_v19, 1  ;;  %v2153_v52 = vrot.slane %v2067_v55, 1 }
 0x190   : > { %1863 = vrot.lane.b32.xlu0 %v5246_v30, %s4462_s30  ;;  %v2152_v30 = vsel %vm1166_vm7, %v2151_v16, %v2150_v5  ;;  %v2068_v46 = vld [vmem:[#allocation2 + $0x1a] sm:$0x1]  ;;  %v2094_v25 = vld [vmem:[#allocation2 + $0x62] sm:$0x1]  ;;  %v1912_v54 = vsel %vm1169_vm8, %v1911_v2, %v1910_v27  ;;  %v2128_v49 = vrot.slane %v2059_v42, 1  ;;  %v2202_v59 = vsel %vm1166_vm7, %v2201_v40, %v2200_v43 }
 0x191   : > { %v2072_v18 = vld [vmem:[#allocation2 + $0x11a] sm:$0x1]  ;;  %v2168_v28 = vrot.slane %v5307_v24, 6  ;;  %v2095_v37 = vld [vmem:[#allocation2 + $0xa2] sm:$0x1]  ;;  %v2203_v35 = vrot.slane %v2084_v39, 1  ;;  %v5351_v1 = vpack.c.bf16 %v1391_v38, %v1390_v0  ;;  %v5353_v22 = vpack.c.bf16 %v1393_v15, %v1392_v29 }
 0x192   : > { %v2073_v32 = vld [vmem:[#allocation2 + $0x15a] sm:$0x1]  ;;  %v2170_v57 = vrot.slane %v5318_v63, 5  ;;  %v2096_v12 = vld [vmem:[#allocation2 + $0xe2] sm:$0x1]  ;;  %v5356_v14 = vsel %vm1169_vm8, %v1964_v51, %v1963_v21  ;;  %v2167_v23 = vsel %vm1151_vm2, %v2166_v48, %v2068_v46  ;;  %v2172_v16 = vrot.slane %v2072_v18, 4 }
 0x193   : > { %1916 = vrot.lane.b32.xlu1 %v5260_v45, %s4466_s11  ;;  %v2074_v13 = vld [vmem:[#allocation2 + $0x19a] sm:$0x1]  ;;  %v2086_v11 = vld [vmem:[#allocation2 + $0x61] sm:$0x1]  ;;  %v2097_v53 = vld [vmem:[#allocation2 + $0x122] sm:$0x1]  ;;  %v5360_v31 = vsel %vm1169_vm8, %v1939_v6, %v1938_v50  ;;  %v2154_v36 = vsel %vm1169_vm8, %v2153_v52, %v2152_v30  ;;  %v2129_v60 = vsel %vm1169_vm8, %v2128_v49, %v2127_v7  ;;  %v2169_v20 = vsel %vm1154_vm3, %v2168_v28, %v2167_v23 }
 0x194   : > { %1913 = vrot.lane.b32.xlu0 %v1912_v54, %s4467_s12  ;;  %v2075_v56 = vld [vmem:[#allocation2 + $0x1da] sm:$0x1]  ;;  %v2241_v62 = vrot.slane %v2094_v25, 7  ;;  %v2087_v9 = vld [vmem:[#allocation2 + $0xa1] sm:$0x1]  ;;  %v2174_v41 = vrot.slane %v2073_v32, 3  ;;  %v5370_v44 = vsel %vm1169_vm8, %v2203_v35, %v2202_v59  ;;  %v2171_v40 = vsel %vm1157_vm4, %v2170_v57, %v2169_v20 }
 0x195   : > { %v2093_v47 = vld [vmem:[#allocation2 + $0x22] sm:$0x1]  ;;  %v2243_v8 = vrot.slane %v2095_v37, 6  ;;  %v2088_v24 = vld [vmem:[#allocation2 + $0xe1] sm:$0x1]  ;;  %v2176_v2 = vrot.slane %v2074_v13, 2  ;;  %v2173_v42 = vsel %vm1160_vm5, %v2172_v16, %v2171_v40 }
 0x196   : > { %v2098_v10 = vld [vmem:[#allocation2 + $0x162] sm:$0x1]  ;;  %v2245_v55 = vrot.slane %v2096_v12, 5  ;;  %v2089_v5 = vld [vmem:[#allocation2 + $0x121] sm:$0x1]  ;;  %v2178_v63 = vrot.slane %v2075_v56, 1  ;;  %v2242_v43 = vsel %vm1151_vm2, %v2241_v62, %v2093_v47  ;;  %v2175_v48 = vsel %vm1163_vm6, %v2174_v41, %v2173_v42 }
 0x197   : > { %1966 = vrot.lane.b32.xlu1 %v5356_v14, %s4468_s13  ;;  %v2099_v19 = vld [vmem:[#allocation2 + $0x1a2] sm:$0x1]  ;;  %v2247_v21 = vrot.slane %v2097_v53, 4  ;;  %v2090_v50 = vld [vmem:[#allocation2 + $0x161] sm:$0x1]  ;;  %v2249_v0 = vrot.slane %v2098_v10, 3  ;;  %v2244_v29 = vsel %vm1154_vm3, %v2243_v8, %v2242_v43  ;;  %v2177_v18 = vsel %vm1166_vm7, %v2176_v2, %v2175_v48 }
 0x198   : > { %1941 = vrot.lane.b32.xlu0 %v5360_v31, %s4469_s14  ;;  %v2100_v27 = vld [vmem:[#allocation2 + $0x1e2] sm:$0x1]  ;;  %v2091_v38 = vld [vmem:[#allocation2 + $0x1a1] sm:$0x1]  ;;  %v2216_v30 = vrot.slane %v2086_v11, 7  ;;  %v2251_v15 = vrot.slane %v2099_v19, 2  ;;  %v2246_v25 = vsel %vm1157_vm4, %v2245_v55, %v2244_v29  ;;  %v5384_v28 = vsel %vm1169_vm8, %v2178_v63, %v2177_v18 }
 0x199   : > { %v5375_v51 = vld [vmem:[#allocation2 + $0x1e1] sm:$0x1]  ;;  %v2341_v39 = vld [vmem:[#allocation2 + $0x5b] sm:$0x1]  ;;  %v2218_v52 = vrot.slane %v2087_v9, 6  ;;  %v2253_v54 = vrot.slane %v2100_v27, 1  ;;  %v2248_v37 = vsel %vm1160_vm5, %v2247_v21, %v2246_v25 }
 0x19a   : > { %v2085_v6 = vld [vmem:[#allocation2 + $0x21] sm:$0x1]  ;;  %v2342_v7 = vld [vmem:[#allocation2 + $0x9b] sm:$0x1]  ;;  %v2220_v49 = vrot.slane %v2088_v24, 5  ;;  %v2222_v35 = vrot.slane %v2089_v5, 4  ;;  %v2250_v11 = vsel %vm1163_vm6, %v2249_v0, %v2248_v37 }
 0x19b   : > { %v2343_v46 = vld [vmem:[#allocation2 + $0xdb] sm:$0x1]  ;;  %2155 = vrot.lane.b32.xlu1 %v2154_v36, %s4464_s9  ;;  %v2390_v57 = vrot.slane %v2341_v39, 7  ;;  %v2349_v12 = vld [vmem:[#allocation2 + $0x5c] sm:$0x1]  ;;  %v2217_v56 = vsel %vm1151_vm2, %v2216_v30, %v2085_v6  ;;  %v2224_v23 = vrot.slane %v2090_v50, 3  ;;  %v2252_v24 = vsel %vm1166_vm7, %v2251_v15, %v2250_v11 }
 0x19c   : > { %v2344_v59 = vld [vmem:[#allocation2 + $0x11b] sm:$0x1]  ;;  %2130 = vrot.lane.b32.xlu0 %v2129_v60, %s4462_s30  ;;  %v2392_v62 = vrot.slane %v2342_v7, 6  ;;  %v2350_v9 = vld [vmem:[#allocation2 + $0x9c] sm:$0x1]  ;;  %v2219_v36 = vsel %vm1154_vm3, %v2218_v52, %v2217_v56  ;;  %v2226_v41 = vrot.slane %v2091_v38, 2  ;;  %v5404_v5 = vsel %vm1169_vm8, %v2253_v54, %v2252_v24 }
 0x19d   : > { %v2345_v32 = vld [vmem:[#allocation2 + $0x15b] sm:$0x1]  ;;  %v2228_v47 = vrot.slane %v5375_v51, 1  ;;  %v2394_v10 = vrot.slane %v2343_v46, 5  ;;  %v2351_v8 = vld [vmem:[#allocation2 + $0xdc] sm:$0x1]  ;;  %v2221_v60 = vsel %vm1157_vm4, %v2220_v49, %v2219_v36 }
 0x19e   : > { %v5387_v13 = vld [vmem:[#allocation2 + $0x19b] sm:$0x1]  ;;  %v2396_v20 = vrot.slane %v2344_v59, 4  ;;  %v2352_v2 = vld [vmem:[#allocation2 + $0x11c] sm:$0x1]  ;;  %v2415_v55 = vrot.slane %v2349_v12, 7  ;;  %v2223_v40 = vsel %vm1160_vm5, %v2222_v35, %v2221_v60 }
 0x19f   : > { %v2340_v16 = vld [vmem:[#allocation2 + $0x1b] sm:$0x1]  ;;  %2105 = vrot.lane.b32.xlu1 %v5143_v3, %s4465_s10  ;;  %v5399_v19 = vld [vmem:[#allocation2 + $0x15c] sm:$0x1]  ;;  %v2398_v27 = vrot.slane %v2345_v32, 3  ;;  %v2225_v0 = vsel %vm1163_vm6, %v2224_v23, %v2223_v40  ;;  %v2417_v51 = vrot.slane %v2350_v9, 6 }
 0x1a0   : > { %v5391_v53 = vld [vmem:[#allocation2 + $0x1db] sm:$0x1]  ;;  %2102 = vrot.lane.b32.xlu0 %v5151_v17, %s4463_s8  ;;  %v2391_v63 = vsel %vm1151_vm2, %v2390_v57, %v2340_v16  ;;  %v2348_v21 = vld [vmem:[#allocation2 + $0x1c] sm:$0x1]  ;;  %v2365_v43 = vld [vmem:[#allocation2 + $0x64] sm:$0x1]  ;;  %v2227_v48 = vsel %vm1166_vm7, %v2226_v41, %v2225_v0 }
 0x1a1   : > { %v5408_v50 = vld [vmem:[#allocation2 + $0x19c] sm:$0x1]  ;;  %v2393_v38 = vsel %vm1154_vm3, %v2392_v62, %v2391_v63  ;;  %v2400_v17 = vrot.slane %v5387_v13, 2  ;;  %v2366_v30 = vld [vmem:[#allocation2 + $0xa4] sm:$0x1]  ;;  %v2402_v15 = vrot.slane %v5391_v53, 1  ;;  %v5421_v46 = vsel %vm1169_vm8, %v2228_v47, %v2227_v48 }
 0x1a2   : > { %v5410_v42 = vld [vmem:[#allocation2 + $0x1dc] sm:$0x1]  ;;  %v2367_v39 = vld [vmem:[#allocation2 + $0xe4] sm:$0x1]  ;;  %v2395_v29 = vsel %vm1157_vm4, %v2394_v10, %v2393_v38  ;;  %v2419_v6 = vrot.slane %v2351_v8, 5  ;;  %v2416_v25 = vsel %vm1151_vm2, %v2415_v55, %v2348_v21  ;;  %v2468_v49 = vrot.slane %v2365_v43, 7 }
 0x1a3   : > { %v2368_v52 = vld [vmem:[#allocation2 + $0x124] sm:$0x1]  ;;  %2205 = vrot.lane.b32.xlu1 %v5370_v44, %s4466_s11  ;;  %v2397_v18 = vsel %vm1160_vm5, %v2396_v20, %v2395_v29  ;;  %v2357_v59 = vld [vmem:[#allocation2 + $0x63] sm:$0x1]  ;;  %v2421_v37 = vrot.slane %v2352_v2, 4  ;;  %v2423_v35 = vrot.slane %v5399_v19, 3  ;;  %v2418_v56 = vsel %vm1154_vm3, %v2417_v51, %v2416_v25 }
 0x1a4   : > { %v2369_v7 = vld [vmem:[#allocation2 + $0x164] sm:$0x1]  ;;  %2180 = vrot.lane.b32.xlu0 %v5384_v28, %s4467_s12  ;;  %v2399_v32 = vsel %vm1163_vm6, %v2398_v27, %v2397_v18  ;;  %v2470_v12 = vrot.slane %v2366_v30, 6  ;;  %v2358_v11 = vld [vmem:[#allocation2 + $0xa3] sm:$0x1]  ;;  %v2425_v23 = vrot.slane %v5408_v50, 2  ;;  %v2420_v36 = vsel %vm1157_vm4, %v2419_v6, %v2418_v56 }
 0x1a5   : > { %v2370_v54 = vld [vmem:[#allocation2 + $0x1a4] sm:$0x1]  ;;  %v2427_v16 = vrot.slane %v5410_v42, 1  ;;  %v2472_v53 = vrot.slane %v2367_v39, 5  ;;  %v2359_v62 = vld [vmem:[#allocation2 + $0xe3] sm:$0x1]  ;;  %v2401_v9 = vsel %vm1166_vm7, %v2400_v17, %v2399_v32  ;;  %v2422_v63 = vsel %vm1160_vm5, %v2421_v37, %v2420_v36 }
 0x1a6   : > { %v2364_v13 = vld [vmem:[#allocation2 + $0x24] sm:$0x1]  ;;  %v2474_v41 = vrot.slane %v2368_v52, 4  ;;  %v2360_v47 = vld [vmem:[#allocation2 + $0x123] sm:$0x1]  ;;  %v2443_v8 = vrot.slane %v2357_v59, 7  ;;  %v2403_v24 = vsel %vm1169_vm8, %v2402_v15, %v2401_v9  ;;  %v2424_v0 = vsel %vm1163_vm6, %v2423_v35, %v2422_v63 }
 0x1a7   : > { %v2371_v57 = vld [vmem:[#allocation2 + $0x1e4] sm:$0x1]  ;;  %v2361_v10 = vld [vmem:[#allocation2 + $0x163] sm:$0x1]  ;;  %2255 = vrot.lane.b32.xlu1 %v5404_v5, %s4468_s13  ;;  %v2469_v60 = vsel %vm1151_vm2, %v2468_v49, %v2364_v13  ;;  %v2476_v20 = vrot.slane %v2369_v7, 3  ;;  %v2445_v55 = vrot.slane %v2358_v11, 6  ;;  %v2426_v18 = vsel %vm1166_vm7, %v2425_v23, %v2424_v0 }
 0x1a8   : > { %v2356_v2 = vld [vmem:[#allocation2 + $0x23] sm:$0x1]  ;;  %v2568_v40 = vld [vmem:[#allocation2 + $0x5d] sm:$0x1]  ;;  %2230 = vrot.lane.b32.xlu0 %v5421_v46, %s4469_s14  ;;  %v2471_v27 = vsel %vm1154_vm3, %v2470_v12, %v2469_v60  ;;  %v2478_v21 = vrot.slane %v2370_v54, 2  ;;  %v2447_v42 = vrot.slane %v2359_v62, 5  ;;  %v5460_v35 = vsel %vm1169_vm8, %v2427_v16, %v2426_v18 }
 0x1a9   : > { %v2362_v19 = vld [vmem:[#allocation2 + $0x1a3] sm:$0x1]  ;;  %v2569_v43 = vld [vmem:[#allocation2 + $0x9d] sm:$0x1]  ;;  %v2473_v38 = vsel %vm1157_vm4, %v2472_v53, %v2471_v27  ;;  %v2480_v17 = vrot.slane %v2371_v57, 1  ;;  %v2449_v51 = vrot.slane %v2360_v47, 4  ;;  %v2444_v29 = vsel %vm1151_vm2, %v2443_v8, %v2356_v2 }
 0x1aa   : > { %v2363_v50 = vld [vmem:[#allocation2 + $0x1e3] sm:$0x1]  ;;  %v2570_v30 = vld [vmem:[#allocation2 + $0xdd] sm:$0x1]  ;;  %v2475_v48 = vsel %vm1160_vm5, %v2474_v41, %v2473_v38  ;;  %v2451_v15 = vrot.slane %v2361_v10, 3  ;;  %v2617_v7 = vrot.slane %v2568_v40, 7  ;;  %v2446_v54 = vsel %vm1154_vm3, %v2445_v55, %v2444_v29 }
 0x1ab   : > { %v2571_v39 = vld [vmem:[#allocation2 + $0x11d] sm:$0x1]  ;;  %2376 = vrot.lane.b32.xlu1 %v5260_v45, %s4465_s10  ;;  %v2477_v25 = vsel %vm1163_vm6, %v2476_v20, %v2475_v48  ;;  %v2453_v49 = vrot.slane %v2362_v19, 2  ;;  %v2576_v37 = vld [vmem:[#allocation2 + $0x5e] sm:$0x1]  ;;  %v2448_v57 = vsel %vm1157_vm4, %v2447_v42, %v2446_v54  ;;  %v2619_v12 = vrot.slane %v2569_v43, 6 }
 0x1ac   : > { %v5446_v6 = vld [vmem:[#allocation2 + $0x15d] sm:$0x1]  ;;  %2373 = vrot.lane.b32.xlu0 %v5266_v33, %s4463_s8  ;;  %v2479_v13 = vsel %vm1166_vm7, %v2478_v21, %v2477_v25  ;;  %v2577_v11 = vld [vmem:[#allocation2 + $0x9e] sm:$0x1]  ;;  %v2450_v53 = vsel %vm1160_vm5, %v2449_v51, %v2448_v57  ;;  %v2455_v62 = vrot.slane %v2363_v50, 1  ;;  %v2621_v9 = vrot.slane %v2570_v30, 5 }
 0x1ad   : > { %v5448_v52 = vld [vmem:[#allocation2 + $0x19d] sm:$0x1]  ;;  %v2578_v56 = vld [vmem:[#allocation2 + $0xde] sm:$0x1]  ;;  %v5465_v23 = vsel %vm1169_vm8, %v2480_v17, %v2479_v13  ;;  %v2452_v33 = vsel %vm1163_vm6, %v2451_v15, %v2450_v53  ;;  %v2623_v47 = vrot.slane %v2571_v39, 4  ;;  %v2642_v8 = vrot.slane %v2576_v37, 7 }
 0x1ae   : > { %v2567_v59 = vld [vmem:[#allocation2 + $0x1d] sm:$0x1]  ;;  %v2579_v36 = vld [vmem:[#allocation2 + $0x11e] sm:$0x1]  ;;  %v2592_v60 = vld [vmem:[#allocation2 + $0x66] sm:$0x1]  ;;  %v2454_v20 = vsel %vm1166_vm7, %v2453_v49, %v2452_v33 }
 0x1af   : > { %v5455_v32 = vld [vmem:[#allocation2 + $0x1dd] sm:$0x1]  ;;  %v2580_v41 = vld [vmem:[#allocation2 + $0x15e] sm:$0x1]  ;;  %v2618_v16 = vsel %vm1151_vm2, %v2617_v7, %v2567_v59  ;;  %2404 = vrot.lane.b32.xlu1 %v2403_v24, %s4464_s9  ;;  %v2625_v2 = vrot.slane %v5446_v6, 3  ;;  %v2627_v19 = vrot.slane %v5448_v52, 2  ;;  %v5483_v43 = vsel %vm1169_vm8, %v2455_v62, %v2454_v20 }
 0x1b0   : > { %v5470_v10 = vld [vmem:[#allocation2 + $0x19e] sm:$0x1]  ;;  %v2644_v63 = vrot.slane %v2577_v11, 6  ;;  %v2593_v27 = vld [vmem:[#allocation2 + $0xa6] sm:$0x1]  ;;  %2379 = vrot.lane.b32.xlu0 %v5384_v28, %s4462_s30  ;;  %v2620_v21 = vsel %vm1154_vm3, %v2619_v12, %v2618_v16  ;;  %v2629_v50 = vrot.slane %v5455_v32, 1 }
 0x1b1   : > { %v2575_v55 = vld [vmem:[#allocation2 + $0x1e] sm:$0x1]  ;;  %v2646_v42 = vrot.slane %v2578_v56, 5  ;;  %v2594_v24 = vld [vmem:[#allocation2 + $0xe6] sm:$0x1]  ;;  %v2622_v0 = vsel %vm1157_vm4, %v2621_v9, %v2620_v21  ;;  %v2648_v38 = vrot.slane %v2579_v36, 4 }
 0x1b2   : > { %v5476_v40 = vld [vmem:[#allocation2 + $0x1de] sm:$0x1]  ;;  %v2595_v17 = vld [vmem:[#allocation2 + $0x126] sm:$0x1]  ;;  %v2695_v30 = vrot.slane %v2592_v60, 7  ;;  %v4470_v39 = vmov 0.0|0.0   ;;  %v2624_v28 = vsel %vm1160_vm5, %v2623_v47, %v2622_v0  ;;  %v2643_v48 = vsel %vm1151_vm2, %v2642_v8, %v2575_v55 }
 0x1b3   : > { %v2596_v51 = vld [vmem:[#allocation2 + $0x166] sm:$0x1]  ;;  %4295 = vmatprep.subr.bf16.mxu1 %v4470_v39  ;;  %4403 = vmatprep.subr.bf16.mxu0 %v4470_v39  ;;  %v2650_v29 = vrot.slane %v2580_v41, 3  ;;  %v2697_v52 = vrot.slane %v2593_v27, 6  ;;  %v2584_v7 = vld [vmem:[#allocation2 + $0x65] sm:$0x1]  ;;  %v2626_v18 = vsel %vm1163_vm6, %v2625_v2, %v2624_v28  ;;  %v2645_v25 = vsel %vm1154_vm3, %v2644_v63, %v2643_v48 }
 0x1b4   : > { %v2591_v15 = vld [vmem:[#allocation2 + $0x26] sm:$0x1]  ;;  %4297 = vmatpush3.bf16.msra.mxu1 %v5333_v58  ;;  %2432 = vrot.lane.b32.xlu1 %v5404_v5, %s4466_s11  ;;  %v2652_v54 = vrot.slane %v5470_v10, 2  ;;  %v2699_v59 = vrot.slane %v2594_v24, 5  ;;  %v2585_v32 = vld [vmem:[#allocation2 + $0xa5] sm:$0x1]  ;;  %v2628_v13 = vsel %vm1166_vm7, %v2627_v19, %v2626_v18  ;;  %v2647_v57 = vsel %vm1157_vm4, %v2646_v42, %v2645_v25 }
 0x1b5   : > { %v5490_v6 = vld [vmem:[#allocation2 + $0x1a6] sm:$0x1]  ;;  %v2586_v37 = vld [vmem:[#allocation2 + $0xe5] sm:$0x1]  ;;  %4298 = vmatprep.subr.bf16.mxu1 %v4470_v39  ;;  %2429 = vrot.lane.b32.xlu0 %v5460_v35, %s4467_s12  ;;  %v2654_v12 = vrot.slane %v5476_v40, 1  ;;  %v2701_v11 = vrot.slane %v2595_v17, 4  ;;  %v2649_v62 = vsel %vm1160_vm5, %v2648_v38, %v2647_v57  ;;  %v2696_v9 = vsel %vm1151_vm2, %v2695_v30, %v2591_v15 }
 0x1b6   : > { %v5498_v49 = vld [vmem:[#allocation2 + $0x1e6] sm:$0x1]  ;;  %v2587_v56 = vld [vmem:[#allocation2 + $0x125] sm:$0x1]  ;;  %v2703_v36 = vrot.slane %v2596_v51, 3  ;;  %v2670_v16 = vrot.slane %v2584_v7, 7  ;;  %v5513_v47 = vsel %vm1169_vm8, %v2629_v50, %v2628_v13  ;;  %v2651_v10 = vsel %vm1163_vm6, %v2650_v29, %v2649_v62 }
 0x1b7   : > { %v2588_v53 = vld [vmem:[#allocation2 + $0x165] sm:$0x1]  ;;  %v2698_v8 = vsel %vm1154_vm3, %v2697_v52, %v2696_v9  ;;  %v2672_v20 = vrot.slane %v2585_v32, 6  ;;  %v2804_v2 = vld [vmem:[#allocation2 + $0x69] sm:$0x1]  ;;  %v2653_v55 = vsel %vm1166_vm7, %v2652_v54, %v2651_v10  ;;  %v2705_v63 = vrot.slane %v5490_v6, 2 }
 0x1b8   : > { %v5508_v41 = vld [vmem:[#allocation2 + $0x1a5] sm:$0x1]  ;;  %v2805_v19 = vld [vmem:[#allocation2 + $0xa9] sm:$0x1]  ;;  %4300 = vmatpush3.bf16.msra.mxu1 %v5342_v26  ;;  %2482 = vrot.lane.b32.xlu1 %v5465_v23, %s4468_s13  ;;  %v2700_v40 = vsel %vm1157_vm4, %v2699_v59, %v2698_v8  ;;  %v2674_v27 = vrot.slane %v2586_v37, 5  ;;  %v5527_v42 = vsel %vm1169_vm8, %v2654_v12, %v2653_v55  ;;  %v2707_v0 = vrot.slane %v5498_v49, 1 }
 0x1b9   : > { %v5510_v33 = vld [vmem:[#allocation2 + $0x1e5] sm:$0x1]  ;;  %v2806_v21 = vld [vmem:[#allocation2 + $0xe9] sm:$0x1]  ;;  %4301 = vmatprep.subr.bf16.mxu1 %v4470_v39  ;;  %2457 = vrot.lane.b32.xlu0 %v5483_v43, %s4469_s14  ;;  %v2702_v24 = vsel %vm1160_vm5, %v2701_v11, %v2700_v40  ;;  %v2676_v38 = vrot.slane %v2587_v56, 4  ;;  %v2678_v48 = vrot.slane %v2588_v53, 3 }
 0x1ba   : > { %v2583_v60 = vld [vmem:[#allocation2 + $0x25] sm:$0x1]  ;;  %v2807_v50 = vld [vmem:[#allocation2 + $0x129] sm:$0x1]  ;;  %v2796_v51 = vld [vmem:[#allocation2 + $0x68] sm:$0x1]  ;;  %v2704_v30 = vsel %vm1163_vm6, %v2703_v36, %v2702_v24 }
 0x1bb   : > { %v2808_v17 = vld [vmem:[#allocation2 + $0x169] sm:$0x1]  ;;  %v2671_v28 = vsel %vm1151_vm2, %v2670_v16, %v2583_v60  ;;  %v2884_v15 = vrot.slane %v2804_v2, 7  ;;  %v2797_v6 = vld [vmem:[#allocation2 + $0xa8] sm:$0x1]  ;;  %v2680_v7 = vrot.slane %v5508_v41, 2  ;;  %v2706_v59 = vsel %vm1166_vm7, %v2705_v63, %v2704_v30 }
 0x1bc   : > { %v5533_v29 = vld [vmem:[#allocation2 + $0x1a9] sm:$0x1]  ;;  %v2673_v52 = vsel %vm1154_vm3, %v2672_v20, %v2671_v28  ;;  %v2682_v18 = vrot.slane %v5510_v33, 1  ;;  %v2886_v54 = vrot.slane %v2805_v19, 6  ;;  %v2798_v49 = vld [vmem:[#allocation2 + $0xe8] sm:$0x1]  ;;  %4303 = vmatpush3.bf16.msra.mxu1 %v5351_v1  ;;  %2603 = vrot.lane.b32.xlu1 %v5356_v14, %s4465_s10  ;;  %v5549_v11 = vsel %vm1169_vm8, %v2707_v0, %v2706_v59 }
 0x1bd   : > { %v2803_v25 = vld [vmem:[#allocation2 + $0x29] sm:$0x1]  ;;  %v2675_v32 = vsel %vm1157_vm4, %v2674_v27, %v2673_v52  ;;  %v2888_v13 = vrot.slane %v2806_v21, 5  ;;  %v2799_v57 = vld [vmem:[#allocation2 + $0x128] sm:$0x1]  ;;  %v2859_v12 = vrot.slane %v2796_v51, 7  ;;  %4304 = vmatprep.subr.bf16.mxu1 %v4470_v39  ;;  %2600 = vrot.lane.b32.xlu0 %v5360_v31, %s4463_s8 }
 0x1be   : > { %v5543_v37 = vld [vmem:[#allocation2 + $0x1e9] sm:$0x1]  ;;  %v2677_v56 = vsel %vm1160_vm5, %v2676_v38, %v2675_v32  ;;  %v2890_v14 = vrot.slane %v2807_v50, 4  ;;  %v2795_v53 = vld [vmem:[#allocation2 + $0x28] sm:$0x1]  ;;  %v2861_v36 = vrot.slane %v2797_v6, 6  ;;  %v2885_v33 = vsel %vm1151_vm2, %v2884_v15, %v2803_v25 }
 0x1bf   : > { %v2800_v62 = vld [vmem:[#allocation2 + $0x168] sm:$0x1]  ;;  %v2679_v41 = vsel %vm1163_vm6, %v2678_v48, %v2677_v56  ;;  %v2892_v16 = vrot.slane %v2808_v17, 3  ;;  %v2863_v8 = vrot.slane %v2798_v49, 5  ;;  %v2821_v60 = vld [vmem:[#allocation2 + $0x70] sm:$0x1]  ;;  %v2887_v20 = vsel %vm1154_vm3, %v2886_v54, %v2885_v33 }
 0x1c0   : > { %v2801_v9 = vld [vmem:[#allocation2 + $0x1a8] sm:$0x1]  ;;  %v2681_v31 = vsel %vm1166_vm7, %v2680_v7, %v2679_v41  ;;  %v2894_v2 = vrot.slane %v5533_v29, 2  ;;  %v2865_v19 = vrot.slane %v2799_v57, 4  ;;  %v2822_v55 = vld [vmem:[#allocation2 + $0xb0] sm:$0x1]  ;;  %4306 = vmatpush3.bf16.msra.mxu1 %v5353_v22  ;;  %2631 = vrot.lane.b32.xlu1 %v5513_v47, %s4464_s9  ;;  %v2889_v63 = vsel %vm1157_vm4, %v2888_v13, %v2887_v20 }
 0x1c1   : > { %v5554_v10 = vld [vmem:[#allocation2 + $0x1e8] sm:$0x1]  ;;  %v2823_v40 = vld [vmem:[#allocation2 + $0xf0] sm:$0x1]  ;;  %v2896_v27 = vrot.slane %v5543_v37, 1  ;;  %v2860_v21 = vsel %vm1151_vm2, %v2859_v12, %v2795_v53  ;;  %v2867_v50 = vrot.slane %v2800_v62, 3  ;;  %2606 = vrot.lane.b32.xlu0 %v5460_v35, %s4462_s30  ;;  %v5570_v38 = vsel %vm1169_vm8, %v2682_v18, %v2681_v31 }
 0x1c2   : > { %v2824_v24 = vld [vmem:[#allocation2 + $0x130] sm:$0x1]  ;;  %v2891_v17 = vsel %vm1160_vm5, %v2890_v14, %v2889_v63  ;;  %v2862_v47 = vsel %vm1154_vm3, %v2861_v36, %v2860_v21  ;;  %v2934_v30 = vrot.slane %v2821_v60, 7  ;;  %v2812_v28 = vld [vmem:[#allocation2 + $0x6a] sm:$0x1]  ;;  %v5579_v48 = vld [vmem:[%s6064_s3 + $0x40] sm:$0xff] }
 0x1c3   : > { %v5565_v0 = vld [vmem:[#allocation2 + $0x170] sm:$0x1]  ;;  %v2893_v29 = vsel %vm1163_vm6, %v2892_v16, %v2891_v17  ;;  %v2864_v35 = vsel %vm1157_vm4, %v2863_v8, %v2862_v47  ;;  %v2869_v15 = vrot.slane %v2801_v9, 2  ;;  %v2936_v7 = vrot.slane %v2822_v55, 6  ;;  %v2813_v18 = vld [vmem:[#allocation2 + $0xaa] sm:$0x1] }
 0x1c4   : > { %v5574_v51 = vld [vmem:[#allocation2 + $0x1b0] sm:$0x1]  ;;  %v2895_v25 = vsel %vm1166_vm7, %v2894_v2, %v2893_v29  ;;  %v2866_v54 = vsel %vm1160_vm5, %v2865_v19, %v2864_v35  ;;  %v2871_v49 = vrot.slane %v5554_v10, 1  ;;  %v2938_v59 = vrot.slane %v2823_v40, 5  ;;  %v2814_v32 = vld [vmem:[#allocation2 + $0xea] sm:$0x1]  ;;  %2659 = vrot.lane.b32.xlu1 %v5465_v23, %s4466_s11 }
 0x1c5   : > { %v2820_v6 = vld [vmem:[#allocation2 + $0x30] sm:$0x1]  ;;  %v2815_v37 = vld [vmem:[#allocation2 + $0x12a] sm:$0x1]  ;;  %v2868_v13 = vsel %vm1163_vm6, %v2867_v50, %v2866_v54  ;;  %v2940_v57 = vrot.slane %v2824_v24, 4  ;;  %v2909_v56 = vrot.slane %v2812_v28, 7  ;;  %2656 = vrot.lane.b32.xlu0 %v5527_v42, %s4467_s12  ;;  %v2897_v10 = vsel %vm1169_vm8, %v2896_v27, %v2895_v25 }
 0x1c6   : > { %v2827_v52 = vld [vmem:[#allocation2 + $0x1f0] sm:$0x1]  ;;  %v5589_v12 = vld [vmem:[#allocation2 + $0x16a] sm:$0x1]  ;;  %v2935_v14 = vsel %vm1151_vm2, %v2934_v30, %v2820_v6  ;;  %v2942_v53 = vrot.slane %v5565_v0, 3  ;;  %v2911_v41 = vrot.slane %v2813_v18, 6  ;;  %v2870_v8 = vsel %vm1166_vm7, %v2869_v15, %v2868_v13 }
 0x1c7   : > { %v2811_v62 = vld [vmem:[#allocation2 + $0x2a] sm:$0x1]  ;;  %v2837_v33 = vld [vmem:[#allocation2 + $0x72] sm:$0x1]  ;;  %v4471_v16 = vmov 0.0   ;;  %v2937_v42 = vsel %vm1154_vm3, %v2936_v7, %v2935_v14  ;;  %v2944_v60 = vrot.slane %v5574_v51, 2  ;;  %v2872_v2 = vsel %vm1169_vm8, %v2871_v49, %v2870_v8 }
 0x1c8   : > { %v5595_v9 = vld [vmem:[#allocation2 + $0x1aa] sm:$0x1]  ;;  %4106 = vmatprep.subr.mxu1 %v4471_v16  ;;  %v2838_v31 = vld [vmem:[#allocation2 + $0xb2] sm:$0x1]  ;;  %4108 = vmatprep.mubr.msk.f32.mxu1 %vm4472_vm9, %v4471_v16  ;;  %v2939_v19 = vsel %vm1157_vm4, %v2938_v59, %v2937_v42  ;;  %v2946_v55 = vrot.slane %v2827_v52, 1  ;;  %v2913_v40 = vrot.slane %v2814_v32, 5  ;;  %v2910_v50 = vsel %vm1151_vm2, %v2909_v56, %v2811_v62 }
 0x1c9   : > { %v5597_v36 = vld [vmem:[#allocation2 + $0x1ea] sm:$0x1]  ;;  %v2839_v20 = vld [vmem:[#allocation2 + $0xf2] sm:$0x1]  ;;  %4107 = vmatpush3.msra.mxu1 %v5579_v48  ;;  %2709 = vrot.lane.b32.xlu1 %v5549_v11, %s4468_s13  ;;  %v2941_v21 = vsel %vm1160_vm5, %v2940_v57, %v2939_v19  ;;  %v2915_v24 = vrot.slane %v2815_v37, 4  ;;  %v2984_v17 = vrot.slane %v2837_v33, 7  ;;  %v2912_v30 = vsel %vm1154_vm3, %v2911_v41, %v2910_v50 }
 0x1ca   : > { %v2840_v63 = vld [vmem:[#allocation2 + $0x132] sm:$0x1]  ;;  %4307 = vmatprep.subr.bf16.mxu1 %v4470_v39  ;;  %v2829_v47 = vld [vmem:[#allocation2 + $0x71] sm:$0x1]  ;;  %2684 = vrot.lane.b32.xlu0 %v5570_v38, %s4469_s14  ;;  %v2943_v51 = vsel %vm1163_vm6, %v2942_v53, %v2941_v21  ;;  %v2917_v28 = vrot.slane %v5589_v12, 3  ;;  %v2986_v15 = vrot.slane %v2838_v31, 6  ;;  %v2914_v59 = vsel %vm1157_vm4, %v2913_v40, %v2912_v30 }
 0x1cb   : > { %v2841_v27 = vld [vmem:[#allocation2 + $0x172] sm:$0x1]  ;;  %v2830_v6 = vld [vmem:[#allocation2 + $0xb1] sm:$0x1]  ;;  %v2945_v52 = vsel %vm1166_vm7, %v2944_v60, %v2943_v51  ;;  %v2919_v7 = vrot.slane %v5595_v9, 2  ;;  %v2921_v18 = vrot.slane %v5597_v36, 1  ;;  %v2916_v12 = vsel %vm1160_vm5, %v2915_v24, %v2914_v59 }
 0x1cc   : > { %v5614_v0 = vld [vmem:[#allocation2 + $0x1b2] sm:$0x1]  ;;  %v2988_v25 = vrot.slane %v2839_v20, 5  ;;  %v2831_v54 = vld [vmem:[#allocation2 + $0xf1] sm:$0x1]  ;;  %v2947_v49 = vsel %vm1169_vm8, %v2946_v55, %v2945_v52  ;;  %v2990_v32 = vrot.slane %v2840_v63, 4  ;;  %v2918_v8 = vsel %vm1163_vm6, %v2917_v28, %v2916_v12 }
 0x1cd   : > { %v2836_v29 = vld [vmem:[#allocation2 + $0x32] sm:$0x1]  ;;  %v2832_v37 = vld [vmem:[#allocation2 + $0x131] sm:$0x1]  ;;  %v2959_v57 = vrot.slane %v2829_v47, 7  ;;  %2898 = vrot.lane.b32.xlu1 %v2897_v10, %s4464_s9  ;;  %v2992_v14 = vrot.slane %v2841_v27, 3  ;;  %v2920_v19 = vsel %vm1166_vm7, %v2919_v7, %v2918_v8 }
 0x1ce   : > { %v5621_v35 = vld [vmem:[#allocation2 + $0x1f2] sm:$0x1]  ;;  %v2833_v13 = vld [vmem:[#allocation2 + $0x171] sm:$0x1]  ;;  %v2985_v56 = vsel %vm1151_vm2, %v2984_v17, %v2836_v29  ;;  %v2961_v36 = vrot.slane %v2830_v6, 6  ;;  %2873 = vrot.lane.b32.xlu0 %v2872_v2, %s4462_s30  ;;  %v2994_v10 = vrot.slane %v5614_v0, 2  ;;  %v5641_v2 = vsel %vm1169_vm8, %v2921_v18, %v2920_v19 }
 0x1cf   : > { %v2828_v53 = vld [vmem:[#allocation2 + $0x31] sm:$0x1]  ;;  %v1069_v41 = vld [vmem:[#allocation2 + $0x40] sm:$0x1]  ;;  %v2987_v42 = vsel %vm1154_vm3, %v2986_v15, %v2985_v56  ;;  %v2963_v60 = vrot.slane %v2831_v54, 5  ;;  %v2996_v40 = vrot.slane %v5621_v35, 1 }
 0x1d0   : > { %v2834_v62 = vld [vmem:[#allocation2 + $0x1b1] sm:$0x1]  ;;  %v1070_v33 = vld [vmem:[#allocation2 + $0x80] sm:$0x1]  ;;  %v2989_v55 = vsel %vm1157_vm4, %v2988_v25, %v2987_v42  ;;  %v2965_v63 = vrot.slane %v2832_v37, 4  ;;  %v2960_v24 = vsel %vm1151_vm2, %v2959_v57, %v2828_v53  ;;  %v1150_v17 = vrot.slane %v1069_v41, 7 }
 0x1d1   : > { %v5631_v9 = vld [vmem:[#allocation2 + $0x1f1] sm:$0x1]  ;;  %v1071_v31 = vld [vmem:[#allocation2 + $0xc0] sm:$0x1]  ;;  %v2991_v50 = vsel %vm1160_vm5, %v2990_v32, %v2989_v55  ;;  %v3084_v47 = vld [vmem:[#allocation2 + $0x6b] sm:$0x1]  ;;  %2848 = vrot.lane.b32.xlu1 %v5404_v5, %s4465_s10  ;;  %v2962_v30 = vsel %vm1154_vm3, %v2961_v36, %v2960_v24 }
 0x1d2   : > { %v1072_v20 = vld [vmem:[#allocation2 + $0x100] sm:$0x1]  ;;  %v2993_v51 = vsel %vm1163_vm6, %v2992_v14, %v2991_v50  ;;  %v2967_v28 = vrot.slane %v2833_v13, 3  ;;  %v1153_v29 = vrot.slane %v1070_v33, 6  ;;  %v3085_v15 = vld [vmem:[#allocation2 + $0xab] sm:$0x1]  ;;  %2845 = vrot.lane.b32.xlu0 %v5421_v46, %s4463_s8  ;;  %v2964_v6 = vsel %vm1157_vm4, %v2963_v60, %v2962_v30 }
 0x1d3   : > { %v1073_v27 = vld [vmem:[#allocation2 + $0x140] sm:$0x1]  ;;  %v2969_v52 = vrot.slane %v2834_v62, 2  ;;  %v2971_v7 = vrot.slane %v5631_v9, 1  ;;  %v1156_v18 = vrot.slane %v1071_v31, 5  ;;  %v2995_v54 = vsel %vm1166_vm7, %v2994_v10, %v2993_v51 }
 0x1d4   : > { %v1074_v21 = vld [vmem:[#allocation2 + $0x180] sm:$0x1]  ;;  %v3086_v25 = vld [vmem:[#allocation2 + $0xeb] sm:$0x1]  ;;  %v2966_v59 = vsel %vm1160_vm5, %v2965_v63, %v2964_v6  ;;  %v1159_v32 = vrot.slane %v1072_v20, 4  ;;  %v3133_v57 = vrot.slane %v3084_v47, 7  ;;  %v5667_v19 = vsel %vm1169_vm8, %v2996_v40, %v2995_v54 }
 0x1d5   : > { %v5645_v0 = vld [vmem:[#allocation2 + $0x1c0] sm:$0x1]  ;;  %v3087_v37 = vld [vmem:[#allocation2 + $0x12b] sm:$0x1]  ;;  %v1162_v12 = vrot.slane %v1073_v27, 3  ;;  %v1165_v56 = vrot.slane %v1074_v21, 2  ;;  %2948 = vrot.lane.b32.xlu1 %v2947_v49, %s4466_s11  ;;  %v2968_v62 = vsel %vm1163_vm6, %v2967_v28, %v2966_v59 }
 0x1d6   : > { %v1068_v35 = vld [vmem:[#allocation2] sm:$0x1]  ;;  %v3088_v13 = vld [vmem:[#allocation2 + $0x16b] sm:$0x1]  ;;  %v3135_v53 = vrot.slane %v3085_v15, 6  ;;  %v1168_v9 = vrot.slane %v5645_v0, 1  ;;  %2923 = vrot.lane.b32.xlu0 %v5641_v2, %s4467_s12  ;;  %v2970_v42 = vsel %vm1166_vm7, %v2969_v52, %v2968_v62 }
 0x1d7   : > { %v1152_v14 = vsel %vm1151_vm2, %v1150_v17, %v1068_v35  ;;  %v3083_v46 = vld [vmem:[#allocation2 + $0x2b] sm:$0x1]  ;;  %v3137_v33 = vrot.slane %v3086_v25, 5  ;;  %v3092_v8 = vld [vmem:[#allocation2 + $0x6c] sm:$0x1]  ;;  %v3139_v31 = vrot.slane %v3087_v37, 4  ;;  %v2972_v55 = vsel %vm1169_vm8, %v2971_v7, %v2970_v42 }
 0x1d8   : > { %v1155_v36 = vsel %vm1154_vm3, %v1153_v29, %v1152_v14  ;;  %v3089_v41 = vld [vmem:[#allocation2 + $0x1ab] sm:$0x1]  ;;  %v3141_v20 = vrot.slane %v3088_v13, 3  ;;  %v3093_v49 = vld [vmem:[#allocation2 + $0xac] sm:$0x1]  ;;  %v3134_v27 = vsel %vm1151_vm2, %v3133_v57, %v3083_v46  ;;  %v3158_v30 = vrot.slane %v3092_v8, 7 }
 0x1d9   : > { %v1158_v10 = vsel %vm1157_vm4, %v1156_v18, %v1155_v36  ;;  %v3090_v60 = vld [vmem:[#allocation2 + $0x1eb] sm:$0x1]  ;;  %v3094_v21 = vld [vmem:[#allocation2 + $0xec] sm:$0x1]  ;;  %v3108_v24 = vld [vmem:[#allocation2 + $0x74] sm:$0x1]  ;;  %v3136_v17 = vsel %vm1154_vm3, %v3135_v53, %v3134_v27  ;;  %2998 = vrot.lane.b32.xlu1 %v5667_v19, %s4468_s13 }
 0x1da   : > { %v1161_v63 = vsel %vm1160_vm5, %v1159_v32, %v1158_v10  ;;  %v3095_v50 = vld [vmem:[#allocation2 + $0x12c] sm:$0x1]  ;;  %v3143_v47 = vrot.slane %v3089_v41, 2  ;;  %v3109_v28 = vld [vmem:[#allocation2 + $0xb4] sm:$0x1]  ;;  %v3138_v29 = vsel %vm1157_vm4, %v3137_v33, %v3136_v17  ;;  %v3145_v35 = vrot.slane %v3090_v60, 1  ;;  %2973 = vrot.lane.b32.xlu0 %v2972_v55, %s4469_s14 }
 0x1db   : > { %v1164_v0 = vsel %vm1163_vm6, %v1162_v12, %v1161_v63  ;;  %v3096_v51 = vld [vmem:[#allocation2 + $0x16c] sm:$0x1]  ;;  %v3160_v52 = vrot.slane %v3093_v49, 6  ;;  %v3110_v7 = vld [vmem:[#allocation2 + $0xf4] sm:$0x1]  ;;  %v3140_v25 = vsel %vm1160_vm5, %v3139_v31, %v3138_v29  ;;  %v3162_v59 = vrot.slane %v3094_v21, 5 }
 0x1dc   : > { %v1167_v40 = vsel %vm1166_vm7, %v1165_v56, %v1164_v0  ;;  %v3091_v15 = vld [vmem:[#allocation2 + $0x2c] sm:$0x1]  ;;  %v3111_v32 = vld [vmem:[#allocation2 + $0x134] sm:$0x1]  ;;  %v3211_v37 = vrot.slane %v3108_v24, 7  ;;  %v3142_v13 = vsel %vm1163_vm6, %v3141_v20, %v3140_v25  ;;  %v3164_v57 = vrot.slane %v3095_v50, 4 }
 0x1dd   : > { %v3097_v6 = vld [vmem:[#allocation2 + $0x1ac] sm:$0x1]  ;;  %v5680_v18 = vsel %vm1169_vm8, %v1168_v9, %v1167_v40  ;;  %v3166_v12 = vrot.slane %v3096_v51, 3  ;;  %v3112_v56 = vld [vmem:[#allocation2 + $0x174] sm:$0x1]  ;;  %v3213_v14 = vrot.slane %v3109_v28, 6  ;;  %v3144_v46 = vsel %vm1166_vm7, %v3143_v47, %v3142_v13  ;;  %3119 = vrot.lane.b32.xlu1 %v5465_v23, %s4465_s10  ;;  %v1245_v21 = vpop.permute.xlu1 %1244 }
 0x1de   : > { %v3098_v54 = vld [vmem:[#allocation2 + $0x1ec] sm:$0x1]  ;;  %v3159_v53 = vsel %vm1151_vm2, %v3158_v30, %v3091_v15  ;;  %v3168_v62 = vrot.slane %v3097_v6, 2  ;;  %v3113_v9 = vld [vmem:[#allocation2 + $0x1b4] sm:$0x1]  ;;  %v3215_v36 = vrot.slane %v3110_v7, 5  ;;  %v3146_v33 = vsel %vm1169_vm8, %v3145_v35, %v3144_v46  ;;  %3116 = vrot.lane.b32.xlu0 %v5483_v43, %s4463_s8  ;;  %v1195_v30 = vpop.permute.xlu0 %1194 }
 0x1df   : > { %v3100_v41 = vld [vmem:[#allocation2 + $0x73] sm:$0x1]  ;;  %v3161_v8 = vsel %vm1154_vm3, %v3160_v52, %v3159_v53  ;;  %v3170_v42 = vrot.slane %v3098_v54, 1  ;;  %v3107_v10 = vld [vmem:[#allocation2 + $0x34] sm:$0x1]  ;;  %v3217_v60 = vrot.slane %v3111_v32, 4 }
 0x1e0   : > { %v3101_v31 = vld [vmem:[#allocation2 + $0xb3] sm:$0x1]  ;;  %v3163_v20 = vsel %vm1157_vm4, %v3162_v59, %v3161_v8  ;;  %v5693_v49 = vld [vmem:[#allocation2 + $0x1f4] sm:$0x1]  ;;  %v3212_v55 = vsel %vm1151_vm2, %v3211_v37, %v3107_v10  ;;  %v3219_v63 = vrot.slane %v3112_v56, 3  ;;  %v3221_v0 = vrot.slane %v3113_v9, 2 }
 0x1e1   : > { %v3102_v27 = vld [vmem:[#allocation2 + $0xf3] sm:$0x1]  ;;  %v3165_v50 = vsel %vm1160_vm5, %v3164_v57, %v3163_v20  ;;  %v3214_v24 = vsel %vm1154_vm3, %v3213_v14, %v3212_v55  ;;  %v3186_v51 = vrot.slane %v3100_v41, 7  ;;  %v3188_v35 = vrot.slane %v3101_v31, 6  ;;  %3147 = vrot.lane.b32.xlu1 %v3146_v33, %s4464_s9  ;;  %v3311_v25 = vld [vmem:[#allocation2 + $0x6d] sm:$0x1] }
 0x1e2   : > { %v3103_v17 = vld [vmem:[#allocation2 + $0x133] sm:$0x1]  ;;  %v3167_v43 = vsel %vm1163_vm6, %v3166_v12, %v3165_v50  ;;  %v3216_v28 = vsel %vm1157_vm4, %v3215_v36, %v3214_v24  ;;  %v3223_v52 = vrot.slane %v5693_v49, 1  ;;  %v3190_v7 = vrot.slane %v3102_v27, 5  ;;  %3122 = vrot.lane.b32.xlu0 %v5641_v2, %s4462_s30  ;;  %v3312_v57 = vld [vmem:[#allocation2 + $0xad] sm:$0x1]  ;;  %v1270_v12 = vpop.permute.xlu1 %1269  ;;  %v1220_v9 = vpop.permute.xlu0 %1219 }
 0x1e3   : > { %v3104_v47 = vld [vmem:[#allocation2 + $0x173] sm:$0x1]  ;;  %v3169_v15 = vsel %vm1166_vm7, %v3168_v62, %v3167_v43  ;;  %v3218_v6 = vsel %vm1160_vm5, %v3217_v60, %v3216_v28  ;;  %v3192_v37 = vrot.slane %v3103_v17, 4  ;;  %v3313_v62 = vld [vmem:[#allocation2 + $0xed] sm:$0x1]  ;;  %v1372_v2 = vsel %vm6069_vm1, %v5680_v18, %v1195_v30 }
 0x1e4   : > { %v3105_v40 = vld [vmem:[#allocation2 + $0x1b3] sm:$0x1]  ;;  %v5707_v54 = vsel %vm1169_vm8, %v3170_v42, %v3169_v15  ;;  %v3220_v59 = vsel %vm1163_vm6, %v3219_v63, %v3218_v6  ;;  %v3194_v13 = vrot.slane %v3104_v47, 3  ;;  %v3314_v41 = vld [vmem:[#allocation2 + $0x12d] sm:$0x1]  ;;  %v3360_v8 = vrot.slane %v3311_v25, 7 }
 0x1e5   : > { %v3106_v29 = vld [vmem:[#allocation2 + $0x1f3] sm:$0x1]  ;;  %v3222_v56 = vsel %vm1166_vm7, %v3221_v0, %v3220_v59  ;;  %v3196_v46 = vrot.slane %v3105_v40, 2  ;;  %v3315_v33 = vld [vmem:[#allocation2 + $0x16d] sm:$0x1]  ;;  %v1374_v42 = vsel %vm1373_vm10, %v1372_v2, %v1220_v9  ;;  %3175 = vrot.lane.b32.xlu1 %v5667_v19, %s4466_s11  ;;  %v3362_v20 = vrot.slane %v3312_v57, 6 }
 0x1e6   : > { %v3099_v32 = vld [vmem:[#allocation2 + $0x33] sm:$0x1]  ;;  %v3198_v53 = vrot.slane %v3106_v29, 1  ;;  %v3310_v60 = vld [vmem:[#allocation2 + $0x2d] sm:$0x1]  ;;  %v1376_v18 = vsel %vm1375_vm11, %v1374_v42, %v1245_v21  ;;  %3172 = vrot.lane.b32.xlu0 %v5707_v54, %s4467_s12  ;;  %vm6070_vm1 = vcmask 588800   ;;  %v1320_v50 = vpop.permute.xlu1 %1319  ;;  %v1295_v30 = vpop.permute.xlu0 %1294  ;;  %v5726_v21 = vsel %vm1169_vm8, %v3223_v52, %v3222_v56 }
 0x1e7   : > { %v3187_v14 = vsel %vm1151_vm2, %v3186_v51, %v3099_v32  ;;  %v3316_v31 = vld [vmem:[#allocation2 + $0x1ad] sm:$0x1]  ;;  %v3364_v63 = vrot.slane %v3313_v62, 5  ;;  %v3319_v27 = vld [vmem:[#allocation2 + $0x6e] sm:$0x1]  ;;  %v1378_v19 = vsel %vm1377_vm12, %v1376_v18, %v1270_v12  ;;  %v3366_v0 = vrot.slane %v3314_v41, 4 }
 0x1e8   : > { %v3189_v36 = vsel %vm1154_vm3, %v3188_v35, %v3187_v14  ;;  %v3317_v55 = vld [vmem:[#allocation2 + $0x1ed] sm:$0x1]  ;;  %v3368_v17 = vrot.slane %v3315_v33, 3  ;;  %v3320_v47 = vld [vmem:[#allocation2 + $0xae] sm:$0x1]  ;;  %v3361_v28 = vsel %vm1151_vm2, %v3360_v8, %v3310_v60  ;;  %v1380_v15 = vsel %vm1379_vm13, %v1378_v19, %v1295_v30 }
 0x1e9   : > { %v3191_v10 = vsel %vm1157_vm4, %v3190_v7, %v3189_v36  ;;  %v3321_v51 = vld [vmem:[#allocation2 + $0xee] sm:$0x1]  ;;  %3225 = vrot.lane.b32.xlu1 %v5726_v21, %s4468_s13  ;;  %v3363_v7 = vsel %vm1154_vm3, %v3362_v20, %v3361_v28  ;;  %v3385_v25 = vrot.slane %v3319_v27, 7  ;;  %v3335_v59 = vld [vmem:[#allocation2 + $0x76] sm:$0x1]  ;;  %v3387_v12 = vrot.slane %v3320_v47, 6 }
 0x1ea   : > { %v3193_v49 = vsel %vm1160_vm5, %v3192_v37, %v3191_v10  ;;  %v3322_v40 = vld [vmem:[#allocation2 + $0x12e] sm:$0x1]  ;;  %v3365_v32 = vsel %vm1157_vm4, %v3364_v63, %v3363_v7  ;;  %v3370_v37 = vrot.slane %v3316_v31, 2  ;;  %v1370_v56 = vpop.permute.xlu1 %1369  ;;  %v3389_v14 = vrot.slane %v3321_v51, 5  ;;  %v3336_v2 = vld [vmem:[#allocation2 + $0xb6] sm:$0x1]  ;;  %v1345_v9 = vpop.permute.xlu0 %1344 }
 0x1eb   : > { %v3195_v24 = vsel %vm1163_vm6, %v3194_v13, %v3193_v49  ;;  %v5730_v29 = vld [vmem:[#allocation2 + $0x16e] sm:$0x1]  ;;  %v3372_v13 = vrot.slane %v3317_v55, 1  ;;  %v1382_v36 = vsel %vm1381_vm14, %v1380_v15, %v1320_v50  ;;  %v3367_v41 = vsel %vm1160_vm5, %v3366_v0, %v3365_v32  ;;  %v3337_v8 = vld [vmem:[#allocation2 + $0xf6] sm:$0x1] }
 0x1ec   : > { %v3197_v43 = vsel %vm1166_vm7, %v3196_v46, %v3195_v24  ;;  %v5732_v35 = vld [vmem:[#allocation2 + $0x1ae] sm:$0x1]  ;;  %v3391_v46 = vrot.slane %v3322_v40, 4  ;;  %v3393_v62 = vrot.slane %v5730_v29, 3  ;;  %v3438_v42 = vrot.slane %v3335_v59, 7 }
 0x1ed   : > { %v3199_v6 = vsel %vm1169_vm8, %v3198_v53, %v3197_v43  ;;  %v5739_v52 = vld [vmem:[#allocation2 + $0x1ee] sm:$0x1]  ;;  %v3395_v53 = vrot.slane %v5732_v35, 2  ;;  %v3327_v10 = vld [vmem:[#allocation2 + $0x75] sm:$0x1]  ;;  %v1384_v60 = vsel %vm1383_vm15, %v1382_v36, %v1345_v9  ;;  %3346 = vrot.lane.b32.xlu1 %v5549_v11, %s4465_s10  ;;  %v3369_v31 = vsel %vm1163_vm6, %v3368_v17, %v3367_v41 }
 0x1ee   : > { %3200 = vrot.lane.b32.xlu0 %v3199_v6, %s4469_s14  ;;  %v3318_v57 = vld [vmem:[#allocation2 + $0x2e] sm:$0x1]  ;;  %v3397_v33 = vrot.slane %v5739_v52, 1  ;;  %v3334_v18 = vld [vmem:[#allocation2 + $0x36] sm:$0x1]  ;;  %v1385_v27 = vsel %vm361_vm0, %v1384_v60, %v1370_v56  ;;  %v3371_v50 = vsel %vm1166_vm7, %v3370_v37, %v3369_v31  ;;  %v3440_v0 = vrot.slane %v3336_v2, 6  ;;  %v1574_v47 = vpop.permute.xlu1 %1573  ;;  %v1549_v40 = vpop.permute.xlu0 %1548 }
 0x1ef   : > { %v3386_v20 = vsel %vm1151_vm2, %v3385_v25, %v3318_v57  ;;  %v3338_v49 = vld [vmem:[#allocation2 + $0x136] sm:$0x1]  ;;  %v3328_v63 = vld [vmem:[#allocation2 + $0xb5] sm:$0x1]  ;;  %4109 = vmatmul.mubr.msk.f32.vlgmr.msra.gmra.mrb[0].mxu1 %vm6070_vm1, %v1385_v27  ;;  %v3373_v17 = vsel %vm1169_vm8, %v3372_v13, %v3371_v50  ;;  %v3442_v43 = vrot.slane %v3337_v8, 5  ;;  %v3439_v35 = vsel %vm1151_vm2, %v3438_v42, %v3334_v18 }
 0x1f0   : > { %v3339_v55 = vld [vmem:[#allocation2 + $0x176] sm:$0x1]  ;;  %v3388_v19 = vsel %vm1154_vm3, %v3387_v12, %v3386_v20  ;;  %v3329_v11 = vld [vmem:[#allocation2 + $0xf5] sm:$0x1]  ;;  %4309 = vmatpush3.bf16.msra.mxu1 %v5333_v58  ;;  %v3444_v15 = vrot.slane %v3338_v49, 4  ;;  %v3415_v7 = vrot.slane %v3328_v63, 6  ;;  %4129 = vmatprep.mubr.msk.f32.mxu1 %vm4472_vm9, %v4471_v16  ;;  %v3441_v57 = vsel %vm1154_vm3, %v3440_v0, %v3439_v35 }
 0x1f1   : > { %v3340_v24 = vld [vmem:[#allocation2 + $0x1b6] sm:$0x1]  ;;  %v3390_v51 = vsel %vm1157_vm4, %v3389_v14, %v3388_v19  ;;  %v3330_v28 = vld [vmem:[#allocation2 + $0x135] sm:$0x1]  ;;  %vm6071_vm1 = vcmask 64512   ;;  %3374 = vrot.lane.b32.xlu1 %v3373_v17, %s4464_s9  ;;  %4310 = vmatprep.subr.bf16.mxu1 %v4470_v39  ;;  %v3446_v59 = vrot.slane %v3339_v55, 3  ;;  %v3443_v9 = vsel %vm1157_vm4, %v3442_v43, %v3441_v57 }
 0x1f2   : > { %3343 = vrot.lane.b32.xlu0 %v5570_v38, %s4463_s8  ;;  %v3341_v30 = vld [vmem:[#allocation2 + $0x1f6] sm:$0x1]  ;;  %v3413_v38 = vrot.slane %v3327_v10, 7  ;;  %v3392_v29 = vsel %vm1160_vm5, %v3391_v46, %v3390_v51  ;;  %v3331_v6 = vld [vmem:[#allocation2 + $0x175] sm:$0x1]  ;;  %v1682_v52 = vsel %vm6071_vm1, %v5111_v4, %v1549_v40  ;;  %v3417_v13 = vrot.slane %v3329_v11, 5  ;;  %v1602_v4 = vpop.permute.xlu1 %1601  ;;  %v1577_v8 = vpop.permute.xlu0 %1576 }
 0x1f3   : > { %v3394_v25 = vsel %vm1163_vm6, %v3393_v62, %v3392_v29  ;;  %v3326_v32 = vld [vmem:[#allocation2 + $0x35] sm:$0x1]  ;;  %v3448_v12 = vrot.slane %v3340_v24, 2  ;;  %v3450_v56 = vrot.slane %v3341_v30, 1  ;;  %v3419_v46 = vrot.slane %v3330_v28, 4 }
 0x1f4   : > { %v3332_v37 = vld [vmem:[#allocation2 + $0x1b5] sm:$0x1]  ;;  %v3396_v2 = vsel %vm1166_vm7, %v3395_v53, %v3394_v25  ;;  %v3414_v62 = vsel %vm1151_vm2, %v3413_v38, %v3326_v32  ;;  %v3421_v36 = vrot.slane %v3331_v6, 3  ;;  %4312 = vmatpush3.bf16.msra.mxu1 %v5342_v26  ;;  %v1683_v41 = vsel %vm1373_vm10, %v1682_v52, %v1574_v47 }
 0x1f5   : > { %v3333_v14 = vld [vmem:[#allocation2 + $0x1f5] sm:$0x1]  ;;  %v3416_v42 = vsel %vm1154_vm3, %v3415_v7, %v3414_v62  ;;  %v3423_v10 = vrot.slane %v3332_v37, 2  ;;  %v1684_v60 = vsel %vm1375_vm11, %v1683_v41, %v1577_v8  ;;  %3402 = vrot.lane.b32.xlu1 %v5726_v21, %s4466_s11  ;;  %4313 = vmatprep.subr.bf16.mxu1 %v4470_v39  ;;  %v3445_v53 = vsel %vm1160_vm5, %v3444_v15, %v3443_v9 }
 0x1f6   : > { %3349 = vrot.lane.b32.xlu0 %v5707_v54, %s4462_s30  ;;  %v3398_v54 = vsel %vm1169_vm8, %v3397_v33, %v3396_v2  ;;  %v3418_v31 = vsel %vm1157_vm4, %v3417_v13, %v3416_v42  ;;  %v3425_v20 = vrot.slane %v3333_v14, 1  ;;  %v3447_v18 = vsel %vm1163_vm6, %v3446_v59, %v3445_v53  ;;  %v1630_v49 = vpop.permute.xlu1 %1629  ;;  %v1627_v27 = vpop.permute.xlu0 %1626 }
 0x1f7   : > { %v3420_v33 = vsel %vm1160_vm5, %v3419_v46, %v3418_v31  ;;  %v3449_v55 = vsel %vm1166_vm7, %v3448_v12, %v3447_v18  ;;  %v1685_v21 = vsel %vm1377_vm12, %v1684_v60, %v1602_v4  ;;  %vm6072_vm1 = vcmask 588800  }
 0x1f8   : > { %v3422_v63 = vsel %vm1163_vm6, %v3421_v36, %v3420_v33  ;;  %4315 = vmatpush3.bf16.msra.mxu1 %v5351_v1  ;;  %v3451_v50 = vsel %vm1169_vm8, %v3450_v56, %v3449_v55  ;;  %v1686_v24 = vsel %vm1379_vm13, %v1685_v21, %v1627_v27  ;;  %vm6073_vm2 = vcmask 64512   ;;  %vm6074_vm3 = vmmov %vm6072_vm1 }
 0x1f9   : > { %v3424_v19 = vsel %vm1166_vm7, %v3423_v10, %v3422_v63  ;;  %3452 = vrot.lane.b32.xlu1 %v3451_v50, %s4468_s13  ;;  %4316 = vmatprep.subr.bf16.mxu1 %v4470_v39  ;;  %v1687_v47 = vsel %vm1381_vm14, %v1686_v24, %v1630_v49  ;;  %vm6075_vm4 = vmmov %vm6073_vm2 }
 0x1fa   : > { %3399 = vrot.lane.b32.xlu0 %v3398_v54, %s4467_s12  ;;  %v3426_v0 = vsel %vm1169_vm8, %v3425_v20, %v3424_v19  ;;  %v1680_v11 = vpop.permute.xlu1 %1679  ;;  %v1655_v17 = vpop.permute.xlu0 %1654  ;;  %vm6076_vm5 = vmmov %vm6072_vm1 }
 0x1fb   : > { %v1688_v51 = vsel %vm1383_vm15, %v1687_v47, %v1655_v17  ;;  %vm6077_vm6 = vmmov %vm6073_vm2 }
 0x1fc   : > { %4318 = vmatpush3.bf16.msra.mxu1 %v5353_v22  ;;  %v1689_v30 = vsel %vm361_vm0, %v1688_v51, %v1680_v11  ;;  %vm6078_vm7 = vmmov %vm6072_vm1 }
 0x1fd   : > { %4127 = vmatprep.subr.mxu1 %v4471_v16  ;;  %vm6079_vm8 = vmmov %vm6073_vm2 }
 0x1fe   : > { %3427 = vrot.lane.b32.xlu0 %v3426_v0, %s4469_s14  ;;  %v1861_v43 = vpop.permute.xlu1 %1860  ;;  %v1836_v28 = vpop.permute.xlu0 %1835  ;;  %s4475_s14 = smov 112  }
 0x1ff   : > { %v1969_v38 = vsel %vm6073_vm2, %v5171_v61, %v1836_v28 }
 0x200   : > { %4128 = vmatpush3.msra.mxu1 %v5579_v48  ;;  %v1970_v35 = vsel %vm1373_vm10, %v1969_v38, %v1861_v43 }
 0x201   : > { %4130 = vmatmul.mubr.msk.f32.vlgmr.msra.gmra.mrb[2].mxu1 %vm6072_vm1, %v1689_v30  ;;  %4319 = vmatprep.subr.bf16.mxu1 %v4470_v39  ;;  %vm6080_vm1 = vmmov %vm6073_vm2 }
 0x202   : > { %4321 = vmatpush3.bf16.msra.mxu1 %v5333_v58  ;;  %4150 = vmatprep.mubr.msk.f32.mxu1 %vm4472_vm9, %v4471_v16  ;;  %v1889_v40 = vpop.permute.xlu1 %1888  ;;  %v1864_v29 = vpop.permute.xlu0 %1863  ;;  %vm6081_vm2 = vmmov %vm6074_vm3 }
 0x203   : > { %4322 = vmatprep.subr.bf16.mxu1 %v4470_v39  ;;  %v1971_v15 = vsel %vm1375_vm11, %v1970_v35, %v1864_v29 }
 0x204   : > { %v1972_v52 = vsel %vm1377_vm12, %v1971_v15, %v1889_v40 }
 0x206   : > { %4324 = vmatpush3.bf16.msra.mxu1 %v5342_v26  ;;  %v1917_v6 = vpop.permute.xlu1 %1916  ;;  %v1914_v7 = vpop.permute.xlu0 %1913 }
 0x207   : > { %4325 = vmatprep.subr.bf16.mxu1 %v4470_v39  ;;  %v1973_v61 = vsel %vm1379_vm13, %v1972_v52, %v1914_v7 }
 0x208   : > { %v1974_v32 = vsel %vm1381_vm14, %v1973_v61, %v1917_v6 }
 0x20a   : > { %4327 = vmatpush3.bf16.msra.mxu1 %v5351_v1  ;;  %v1967_v25 = vpop.permute.xlu1 %1966  ;;  %v1942_v59 = vpop.permute.xlu0 %1941 }
 0x20b   : > { %4328 = vmatprep.subr.bf16.mxu1 %v4470_v39  ;;  %v1975_v37 = vsel %vm1383_vm15, %v1974_v32, %v1942_v59 }
 0x20c   : > { %v1976_v12 = vsel %vm361_vm0, %v1975_v37, %v1967_v25 }
 0x20e   : > { %4330 = vmatpush3.bf16.msra.mxu1 %v5353_v22  ;;  %v2156_v13 = vpop.permute.xlu1 %2155  ;;  %v2131_v57 = vpop.permute.xlu0 %2130 }
 0x20f   : > { %4148 = vmatprep.subr.mxu1 %v4471_v16 }
 0x212   : > { %4149 = vmatpush3.msra.mxu1 %v5579_v48  ;;  %v2106_v56 = vpop.permute.xlu1 %2105  ;;  %v2103_v14 = vpop.permute.xlu0 %2102 }
 0x213   : > { %4151 = vmatmul.mubr.msk.f32.vlgmr.msra.gmra.mrb[4].mxu1 %vm6074_vm3, %v1976_v12  ;;  %4331 = vmatprep.subr.bf16.mxu1 %v4470_v39  ;;  %v2258_v46 = vsel %vm6075_vm4, %v5123_v34, %v2103_v14  ;;  %vm6082_vm3 = vmmov %vm6081_vm2 }
 0x214   : > { %4333 = vmatpush3.bf16.msra.mxu1 %v5333_v58  ;;  %4171 = vmatprep.mubr.msk.f32.mxu1 %vm4472_vm9, %v4471_v16  ;;  %v2259_v4 = vsel %vm1373_vm10, %v2258_v46, %v2106_v56  ;;  %vm6083_vm4 = vmmov %vm6080_vm1 }
 0x215   : > { %4334 = vmatprep.subr.bf16.mxu1 %v4470_v39  ;;  %v2260_v9 = vsel %vm1375_vm11, %v2259_v4, %v2131_v57 }
 0x216   : > { %v2206_v2 = vpop.permute.xlu1 %2205  ;;  %v2181_v62 = vpop.permute.xlu0 %2180  ;;  %v2261_v36 = vsel %vm1377_vm12, %v2260_v9, %v2156_v13 }
 0x217   : > { %v2262_v34 = vsel %vm1379_vm13, %v2261_v36, %v2181_v62 }
 0x218   : > { %4336 = vmatpush3.bf16.msra.mxu1 %v5342_v26  ;;  %v2263_v42 = vsel %vm1381_vm14, %v2262_v34, %v2206_v2 }
 0x219   : > { %4337 = vmatprep.subr.bf16.mxu1 %v4470_v39 }
 0x21a   : > { %v2256_v41 = vpop.permute.xlu1 %2255  ;;  %v2231_v8 = vpop.permute.xlu0 %2230 }
 0x21b   : > { %v2264_v60 = vsel %vm1383_vm15, %v2263_v42, %v2231_v8 }
 0x21c   : > { %4339 = vmatpush3.bf16.msra.mxu1 %v5351_v1  ;;  %v2265_v31 = vsel %vm361_vm0, %v2264_v60, %v2256_v41 }
 0x21d   : > { %4340 = vmatprep.subr.bf16.mxu1 %v4470_v39 }
 0x21e   : > { %v2377_v54 = vpop.permute.xlu1 %2376  ;;  %v2374_v10 = vpop.permute.xlu0 %2373 }
 0x21f   : > { %v2485_v18 = vsel %vm6077_vm6, %v5143_v3, %v2374_v10  ;;  %vm6085_vm6 = vmmov %vm6080_vm1 }
 0x220   : > { %4342 = vmatpush3.bf16.msra.mxu1 %v5353_v22  ;;  %v2486_v55 = vsel %vm1373_vm10, %v2485_v18, %v2377_v54  ;;  %v4453_v54 = vld [vmem:[%s6064_s3 + $0x40] sm:$0xff] }
 0x221   : > { %4169 = vmatprep.subr.mxu1 %v4471_v16 }
 0x222   : > { %v2405_v53 = vpop.permute.xlu1 %2404  ;;  %v2380_v20 = vpop.permute.xlu0 %2379 }
 0x223   : > { %v2487_v63 = vsel %vm1375_vm11, %v2486_v55, %v2380_v20 }
 0x224   : > { %4170 = vmatpush3.msra.mxu1 %v5579_v48  ;;  %v2488_v50 = vsel %vm1377_vm12, %v2487_v63, %v2405_v53 }
 0x225   : > { %4172 = vmatmul.mubr.msk.f32.vlgmr.msra.gmra.mrb[6].mxu1 %vm6076_vm5, %v2265_v31  ;;  %4343 = vmatprep.subr.bf16.mxu1 %v4470_v39  ;;  %vm6084_vm5 = vmmov %vm6081_vm2 }
 0x226   : > { %4345 = vmatpush3.bf16.msra.mxu1 %v5333_v58  ;;  %4192 = vmatprep.mubr.msk.f32.mxu1 %vm4472_vm9, %v4471_v16  ;;  %v2433_v33 = vpop.permute.xlu1 %2432 }
 0x227   : > { %4346 = vmatprep.subr.bf16.mxu1 %v4470_v39  ;;  %v2430_v49 = vpop.permute.xlu0 %2429 }
 0x228   : > { %v2489_v3 = vsel %vm1379_vm13, %v2488_v50, %v2430_v49 }
 0x229   : > { %v2490_v0 = vsel %vm1381_vm14, %v2489_v3, %v2433_v33 }
 0x22a   : > { %4348 = vmatpush3.bf16.msra.mxu1 %v5342_v26  ;;  %v2483_v21 = vpop.permute.xlu1 %2482 }
 0x22b   : > { %4349 = vmatprep.subr.bf16.mxu1 %v4470_v39  ;;  %v2458_v27 = vpop.permute.xlu0 %2457 }
 0x22c   : > { %v2491_v11 = vsel %vm1383_vm15, %v2490_v0, %v2458_v27 }
 0x22d   : > { %v2492_v51 = vsel %vm361_vm0, %v2491_v11, %v2483_v21 }
 0x22e   : > { %4351 = vmatpush3.bf16.msra.mxu1 %v5351_v1  ;;  %v2604_v19 = vpop.permute.xlu1 %2603 }
 0x22f   : > { %4352 = vmatprep.subr.bf16.mxu1 %v4470_v39  ;;  %v2601_v24 = vpop.permute.xlu0 %2600 }
 0x230   : > { %v2712_v28 = vsel %vm6079_vm8, %v5260_v45, %v2601_v24 }
 0x231   : > { %v2713_v40 = vsel %vm1373_vm10, %v2712_v28, %v2604_v19 }
 0x232   : > { %4354 = vmatpush3.bf16.msra.mxu1 %v5353_v22  ;;  %v2632_v47 = vpop.permute.xlu1 %2631 }
 0x233   : > { %4190 = vmatprep.subr.mxu1 %v4471_v16  ;;  %v2607_v17 = vpop.permute.xlu0 %2606 }
 0x234   : > { %v2714_v35 = vsel %vm1375_vm11, %v2713_v40, %v2607_v17  ;;  %v3578_v40 = vld [vmem:[%s6066_s5 + $0x18] sm:$0xff] }
 0x235   : > { %v2715_v6 = vsel %vm1377_vm12, %v2714_v35, %v2632_v47  ;;  %v5981_v35 = vld [vmem:[%s6065_s4] ss:$0 sm:$0xff] }
 0x236   : > { %4191 = vmatpush3.msra.mxu1 %v5579_v48  ;;  %v2660_v30 = vpop.permute.xlu1 %2659 }
 0x237   : > { %4193 = vmatmul.mubr.msk.f32.vlgmr.msra.gmra.mrb[8].mxu1 %vm6078_vm7, %v2492_v51  ;;  %4355 = vmatprep.subr.bf16.mxu1 %v4470_v39  ;;  %v2657_v43 = vpop.permute.xlu0 %2656 }
 0x238   : > { %4357 = vmatpush3.bf16.msra.mxu1 %v5333_v58  ;;  %4213 = vmatprep.mubr.msk.f32.mxu1 %vm4472_vm9, %v4471_v16  ;;  %v2716_v45 = vsel %vm1379_vm13, %v2715_v6, %v2657_v43  ;;  %v3576_v43 = vld [vmem:[%s6066_s5 + $0x8] sm:$0xff] }
 0x239   : > { %4358 = vmatprep.subr.bf16.mxu1 %v4470_v39  ;;  %v2717_v61 = vsel %vm1381_vm14, %v2716_v45, %v2660_v30  ;;  %v3579_v45 = vld [vmem:[%s6066_s5 + $0x20] sm:$0xff] }
 0x23b   : > { %v2710_v38 = vpop.permute.xlu1 %2709 }
 0x23c   : > { %4360 = vmatpush3.bf16.msra.mxu1 %v5342_v26  ;;  %v2685_v29 = vpop.permute.xlu0 %2684 }
 0x23d   : > { %4361 = vmatprep.subr.bf16.mxu1 %v4470_v39  ;;  %v2718_v59 = vsel %vm1383_vm15, %v2717_v61, %v2685_v29 }
 0x23e   : > { %v2719_v13 = vsel %vm361_vm0, %v2718_v59, %v2710_v38  ;;  %v3577_v38 = vld [vmem:[%s6066_s5 + $0x10] sm:$0xff] }
 0x23f   : > { %v2899_v15 = vpop.permute.xlu1 %2898  ;;  %v4407_v29 = vpack.c.bf16 %v3578_v40, %v3577_v38  ;;  %v3581_v59 = vld [vmem:[%s6066_s5 + $0x30] sm:$0xff] }
 0x240   : > { %4363 = vmatpush3.bf16.msra.mxu1 %v5351_v1  ;;  %v2874_v7 = vpop.permute.xlu0 %2873 }
 0x241   : > { %4364 = vmatprep.subr.bf16.mxu1 %v4470_v39 }
 0x243   : > { %v2849_v52 = vpop.permute.xlu1 %2848 }
 0x244   : > { %4366 = vmatpush3.bf16.msra.mxu1 %v5353_v22  ;;  %v2846_v25 = vpop.permute.xlu0 %2845 }
 0x245   : > { %4211 = vmatprep.subr.mxu1 %v4471_v16  ;;  %v3001_v32 = vsel %vm6080_vm1, %v5370_v44, %v2846_v25 }
 0x246   : > { %v3002_v12 = vsel %vm1373_vm10, %v3001_v32, %v2849_v52  ;;  %v3580_v52 = vld [vmem:[%s6066_s5 + $0x28] sm:$0xff]  ;;  %v3582_v32 = vld [vmem:[%s6066_s5 + $0x38] sm:$0xff] }
 0x247   : > { %v2949_v37 = vpop.permute.xlu1 %2948  ;;  %v3003_v56 = vsel %vm1375_vm11, %v3002_v12, %v2874_v7  ;;  %v4410_v61 = vpack.c.bf16 %v3580_v52, %v3579_v45 }
 0x248   : > { %4212 = vmatpush3.msra.mxu1 %v5579_v48  ;;  %v2924_v57 = vpop.permute.xlu0 %2923  ;;  %v3004_v48 = vsel %vm1377_vm12, %v3003_v56, %v2899_v15  ;;  %v3583_v56 = vld [vmem:[%s6066_s5 + $0x40] sm:$0xff] }
 0x249   : > { %4214 = vmatmul.mubr.msk.f32.vlgmr.msra.gmra.mrb[10].mxu1 %vm6081_vm2, %v2719_v13  ;;  %4367 = vmatprep.subr.bf16.mxu1 %v4470_v39  ;;  %v3005_v4 = vsel %vm1379_vm13, %v3004_v48, %v2924_v57  ;;  %v3585_v48 = vld [vmem:[%s6066_s5 + $0x50] sm:$0xff] }
 0x24a   : > { %4369 = vmatpush3.bf16.msra.mxu1 %v5333_v58  ;;  %4234 = vmatprep.mubr.msk.f32.mxu1 %vm4472_vm9, %v4471_v16  ;;  %v3006_v62 = vsel %vm1381_vm14, %v3005_v4, %v2949_v37  ;;  %v4413_v37 = vpack.c.bf16 %v3582_v32, %v3581_v59  ;;  %v3586_v4 = vld [vmem:[%s6066_s5 + $0x58] sm:$0xff] }
 0x24b   : > { %4370 = vmatprep.subr.bf16.mxu1 %v4470_v39  ;;  %v2999_v14 = vpop.permute.xlu1 %2998 }
 0x24c   : > { %v2974_v44 = vpop.permute.xlu0 %2973 }
 0x24d   : > { %v3007_v36 = vsel %vm1383_vm15, %v3006_v62, %v2974_v44 }
 0x24e   : > { %4372 = vmatpush3.bf16.msra.mxu1 %v5342_v26  ;;  %v3008_v8 = vsel %vm361_vm0, %v3007_v36, %v2999_v14  ;;  %v3584_v14 = vld [vmem:[%s6066_s5 + $0x48] sm:$0xff] }
 0x24f   : > { %4373 = vmatprep.subr.bf16.mxu1 %v4470_v39  ;;  %v3120_v2 = vpop.permute.xlu1 %3119 }
 0x250   : > { %v3117_v46 = vpop.permute.xlu0 %3116 }
 0x251   : > { %v3228_v42 = vsel %vm6083_vm4, %v5404_v5, %v3117_v46  ;;  %v4416_v46 = vpack.c.bf16 %v3584_v14, %v3583_v56 }
 0x252   : > { %4375 = vmatpush3.bf16.msra.mxu1 %v5351_v1  ;;  %v3229_v60 = vsel %vm1373_vm10, %v3228_v42, %v3120_v2  ;;  %v4419_v2 = vpack.c.bf16 %v3586_v4, %v3585_v48 }
 0x253   : > { %4376 = vmatprep.subr.bf16.mxu1 %v4470_v39  ;;  %v3148_v41 = vpop.permute.xlu1 %3147 }
 0x254   : > { %v3123_v9 = vpop.permute.xlu0 %3122 }
 0x255   : > { %v3230_v31 = vsel %vm1375_vm11, %v3229_v60, %v3123_v9 }
 0x256   : > { %4378 = vmatpush3.bf16.msra.mxu1 %v5353_v22  ;;  %v3231_v20 = vsel %vm1377_vm12, %v3230_v31, %v3148_v41  ;;  %v3589_v31 = vld [vmem:[%s6066_s5 + $0x70] sm:$0xff] }
 0x257   : > { %4232 = vmatprep.subr.mxu1 %v4471_v16  ;;  %v3176_v10 = vpop.permute.xlu1 %3175 }
 0x258   : > { %v3173_v34 = vpop.permute.xlu0 %3172 }
 0x259   : > { %v3232_v18 = vsel %vm1379_vm13, %v3231_v20, %v3173_v34  ;;  %v3588_v34 = vld [vmem:[%s6066_s5 + $0x68] sm:$0xff]  ;;  %v3590_v20 = vld [vmem:[%s6066_s5 + $0x78] sm:$0xff] }
 0x25a   : > { %4233 = vmatpush3.msra.mxu1 %v4453_v54  ;;  %v3233_v49 = vsel %vm1381_vm14, %v3232_v18, %v3176_v10  ;;  %v4425_v18 = vpack.c.bf16 %v3590_v20, %v3589_v31 }
 0x25b   : > { %4235 = vmatmul.mubr.msk.f32.vlgmr.msra.gmra.mrb[12].mxu1 %vm6082_vm3, %v3008_v8  ;;  %4379 = vmatprep.subr.bf16.mxu1 %v4470_v39  ;;  %v3226_v33 = vpop.permute.xlu1 %3225  ;;  %v3587_v8 = vld [vmem:[%s6066_s5 + $0x60] sm:$0xff] }
 0x25c   : > { %4381 = vmatpush3.bf16.msra.mxu1 %v5333_v58  ;;  %4255 = vmatprep.mubr.msk.f32.mxu1 %vm4472_vm9, %v4471_v16 }
 0x25d   : > { %4382 = vmatprep.subr.bf16.mxu1 %v4470_v39 }
 0x25f   : > { %v3347_v63 = vpop.permute.xlu1 %3346 }
 0x260   : > { %v3201_v53 = vpop.permute.xlu0 %3200  ;;  %4384 = vmatpush3.bf16.msra.mxu1 %v5342_v26 }
 0x261   : > { %4385 = vmatprep.subr.bf16.mxu1 %v4470_v39  ;;  %v3234_v55 = vsel %vm1383_vm15, %v3233_v49, %v3201_v53 }
 0x262   : > { %v3235_v21 = vsel %vm361_vm0, %v3234_v55, %v3226_v33 }
 0x263   : > { %v3375_v3 = vpop.permute.xlu1 %3374 }
 0x264   : > { %4387 = vmatpush3.bf16.msra.mxu1 %v5351_v1  ;;  %v3344_v5 = vpop.permute.xlu0 %3343 }
 0x265   : > { %4388 = vmatprep.subr.bf16.mxu1 %v4470_v39  ;;  %v3455_v50 = vsel %vm6085_vm6, %v5465_v23, %v3344_v5 }
 0x266   : > { %v3456_v19 = vsel %vm1373_vm10, %v3455_v50, %v3347_v63  ;;  %v3591_v63 = vld [vmem:[%s6066_s5 + $0x80] sm:$0xff] }
 0x267   : > { %v3403_v11 = vpop.permute.xlu1 %3402 }
 0x268   : > { %4390 = vmatpush3.bf16.msra.mxu1 %v5353_v22  ;;  %v3350_v27 = vpop.permute.xlu0 %3349 }
 0x269   : > { %4253 = vmatprep.subr.mxu1 %v4471_v16  ;;  %v3457_v0 = vsel %vm1375_vm11, %v3456_v19, %v3350_v27  ;;  %vm3569_vm11 = vcmask 654336  }
 0x26b   : > { %v3453_v51 = vpop.permute.xlu1 %3452 }
 0x26c   : > { %4254 = vmatpush3.msra.mxu1 %v4453_v54  ;;  %v3400_v24 = vpop.permute.xlu0 %3399 }
 0x26d   : > { %4256 = vmatmul.mubr.msk.f32.vlgmr.msra.gmra.mrb[14].mxu1 %vm6084_vm5, %v3235_v21  ;;  %4391 = vmatprep.subr.bf16.mxu1 %v4470_v39  ;;  %v3592_v21 = vld [vmem:[%s6066_s5 + $0x88] sm:$0xff] }
 0x26e   : > { %4393 = vmatpush3.bf16.msra.mxu1 %v5333_v58  ;;  %4276 = vmatprep.mubr.msk.f32.mxu1 %vm4472_vm9, %v4471_v16  ;;  %v3458_v58 = vsel %vm1377_vm12, %v3457_v0, %v3375_v3  ;;  %vm6086_vm9 = vmmov %vm6081_vm2  ;;  %v4428_v27 = vpack.c.bf16 %v3592_v21, %v3591_v63 }
 0x26f   : > { %4394 = vmatprep.subr.bf16.mxu1 %v4470_v39  ;;  %v3459_v47 = vsel %vm1379_vm13, %v3458_v58, %v3400_v24  ;;  %vm3571_vm13 = vcmask 785408  }
 0x270   : > { %v3428_v23 = vpop.permute.xlu0 %3427  ;;  %v3460_v17 = vsel %vm1381_vm14, %v3459_v47, %v3403_v11 }
 0x272   : > { %4396 = vmatpush3.bf16.msra.mxu1 %v5342_v26  ;;  %v3461_v26 = vsel %vm1383_vm15, %v3460_v17, %v3428_v23  ;;  %vm3573_vm15 = vcmask 916480  }
 0x273   : > { %4397 = vmatprep.subr.bf16.mxu1 %v4470_v39  ;;  %v3462_v30 = vsel %vm361_vm0, %v3461_v26, %v3453_v51 }
 0x276   : > { %4399 = vmatpush3.bf16.msra.mxu1 %v5351_v1  ;;  %v3575_v1 = vld [vmem:[%s6066_s5] sm:$0xff] }
 0x277   : > { %4400 = vmatprep.subr.bf16.mxu1 %v4470_v39  ;;  %v4404_v28 = vpack.c.bf16 %v3576_v43, %v3575_v1 }
 0x279   : > { %4405 = vmatpush1.bf16.msra.mxu0 %v4404_v28 }
 0x27a   : > { %4402 = vmatpush3.bf16.msra.mxu1 %v5353_v22  ;;  %4406 = vmatprep.subr.bf16.mxu0 %v4470_v39 }
 0x27b   : > { %4274 = vmatprep.subr.mxu1 %v4471_v16 }
 0x27d   : > { %4408 = vmatpush1.bf16.msra.mxu0 %v4407_v29 }
 0x27e   : > { %4275 = vmatpush3.msra.mxu1 %v4453_v54  ;;  %4409 = vmatprep.subr.bf16.mxu0 %v4470_v39  ;;  %v4422_v54 = vpack.c.bf16 %v3588_v34, %v3587_v8 }
 0x27f   : > { %4277 = vmatmul.mubr.msk.f32.vlgmr.msra.gmra.mrb[16].mxu1 %vm6086_vm9, %v3462_v30 }
 0x281   : > { %4411 = vmatpush1.bf16.msra.mxu0 %v4410_v61  ;;  %v3811_v61 = vld [vmem:[%s6067_s6] ss:$0 sm:$0xff] }
 0x282   : > { %4412 = vmatprep.subr.bf16.mxu0 %v4470_v39 }
 0x285   : > { %4414 = vmatpush1.bf16.msra.mxu0 %v4413_v37 }
 0x286   : > { %4415 = vmatprep.subr.bf16.mxu0 %v4470_v39 }
 0x289   : > { %4417 = vmatpush1.bf16.msra.mxu0 %v4416_v46 }
 0x28a   : > { %4418 = vmatprep.subr.bf16.mxu0 %v4470_v39 }
 0x28d   : > { %4420 = vmatpush1.bf16.msra.mxu0 %v4419_v2 }
 0x28e   : > { %4421 = vmatprep.subr.bf16.mxu0 %v4470_v39 }
 0x291   : > { %4423 = vmatpush1.bf16.msra.mxu0 %v4422_v54 }
 0x292   : > { %4424 = vmatprep.subr.bf16.mxu0 %v4470_v39 }
 0x295   : > { %4426 = vmatpush1.bf16.msra.mxu0 %v4425_v18 }
 0x296   : > { %4427 = vmatprep.subr.bf16.mxu0 %v4470_v39 }
 0x299   : > { %4429 = vmatpush1.bf16.msra.mxu0 %v4428_v27 }
 0x2c2   : > { %v5969_v22 = vpop.f32.mrb[0].mxu1 }
 0x2c3   : > { %v4110_v16 = vpop.f32.mrb[1].mxu1  ;;  %v1473_v30 = vadd.f32 %v5981_v35, %v5969_v22 }
 0x2c5   : > { %v1476_v28 = vmax.f32 %v1473_v30, 0.0 }
 0x2d4   : > { %v1759_v15 = vpop.f32.mrb[2].mxu1 }
 0x2d5   : > { %v1760_v6 = vadd.f32 %v5981_v35, %v1759_v15  ;;  %v4131_v7 = vpop.f32.mrb[3].mxu1 }
 0x2d7   : > { %v1763_v25 = vmax.f32 %v1760_v6, 0.0 }
 0x2d9   : > { %3538 = vrot.lane.b32.xlu0 %v1763_v25, %s4465_s10  ;;  %s4474_s10 = smov 96  }
 0x2e6   : > { %v2046_v13 = vpop.f32.mrb[4].mxu1 }
 0x2e7   : > { %v2047_v57 = vadd.f32 %v5981_v35, %v2046_v13  ;;  %v4152_v12 = vpop.f32.mrb[5].mxu1 }
 0x2e9   : > { %v2050_v44 = vmax.f32 %v2047_v57, 0.0 }
 0x2eb   : > { %3542 = vrot.lane.b32.xlu1 %v2050_v44, %s4464_s9 }
 0x2f8   : > { %v2335_v9 = vpop.f32.mrb[6].mxu1 }
 0x2f9   : > { %v2336_v62 = vadd.f32 %v5981_v35, %v2335_v9  ;;  %v4173_v36 = vpop.f32.mrb[7].mxu1 }
 0x2fb   : > { %v2339_v41 = vmax.f32 %v2336_v62, 0.0 }
 0x2fd   : > { %3546 = vrot.lane.b32.xlu0 %v2339_v41, %s4466_s11 }
 0x30a   : > { %v2562_v42 = vpop.f32.mrb[8].mxu1 }
 0x30b   : > { %v2563_v10 = vadd.f32 %v5981_v35, %v2562_v42  ;;  %v4194_v60 = vpop.f32.mrb[9].mxu1 }
 0x30d   : > { %v2566_v53 = vmax.f32 %v2563_v10, 0.0 }
 0x30f   : > { %3550 = vrot.lane.b32.xlu1 %v2566_v53, %s4468_s13 }
 0x31c   : > { %v2789_v33 = vpop.f32.mrb[10].mxu1 }
 0x31d   : > { %v2790_v5 = vadd.f32 %v5981_v35, %v2789_v33  ;;  %v4215_v49 = vpop.f32.mrb[11].mxu1 }
 0x31f   : > { %v2793_v55 = vmax.f32 %v2790_v5, 0.0 }
 0x321   : > { %3554 = vrot.lane.b32.xlu0 %v2793_v55, %s4473_s19 }
 0x32e   : > { %v3078_v50 = vpop.f32.mrb[12].mxu1 }
 0x32f   : > { %v3079_v39 = vadd.f32 %v5981_v35, %v3078_v50  ;;  %v4236_v3 = vpop.f32.mrb[13].mxu1 }
 0x331   : > { %v3082_v19 = vmax.f32 %v3079_v39, 0.0 }
 0x333   : > { %3558 = vrot.lane.b32.xlu1 %v3082_v19, %s4474_s10 }
 0x340   : > { %v3305_v24 = vpop.f32.mrb[14].mxu1 }
 0x341   : > { %v3306_v0 = vadd.f32 %v5981_v35, %v3305_v24  ;;  %v4257_v58 = vpop.f32.mrb[15].mxu1 }
 0x343   : > { %v3309_v11 = vmax.f32 %v3306_v0, 0.0 }
 0x345   : > { %3562 = vrot.lane.b32.xlu0 %v3309_v11, %s4475_s14 }
 0x34b   : > { %v3539_v51 = vpop.permute.xlu0 %3538 }
 0x34c   : > { %v3565_v38 = vsel %vm1373_vm10, %v1476_v28, %v3539_v51 }
 0x352   : > { %v3532_v47 = vpop.f32.mrb[16].mxu1 }
 0x353   : > { %v3533_v23 = vadd.f32 %v5981_v35, %v3532_v47  ;;  %v4278_v17 = vpop.f32.mrb[17].mxu1 }
 0x355   : > { %v3536_v26 = vmax.f32 %v3533_v23, 0.0 }
 0x357   : > { %3812 = vmatprep.mubr.msk.f32.mxu0 %vm1373_vm10, %v3536_v26 }
 0x35d   : > { %v3543_v1 = vpop.permute.xlu1 %3542 }
 0x35e   : > { %v3566_v40 = vsel %vm1377_vm12, %v3565_v38, %v3543_v1 }
 0x36f   : > { %v3547_v43 = vpop.permute.xlu0 %3546 }
 0x370   : > { %v3567_v15 = vsel %vm1381_vm14, %v3566_v40, %v3547_v43 }
 0x381   : > { %v3551_v16 = vpop.permute.xlu1 %3550 }
 0x382   : > { %v3568_v7 = vsel %vm361_vm0, %v3567_v15, %v3551_v16 }
 0x393   : > { %v3555_v29 = vpop.permute.xlu0 %3554 }
 0x394   : > { %v3570_v22 = vsel %vm3569_vm11, %v3568_v7, %v3555_v29 }
 0x3a5   : > { %v3559_v6 = vpop.permute.xlu1 %3558 }
 0x3a6   : > { %v3572_v35 = vsel %vm3571_vm13, %v3570_v22, %v3559_v6 }
 0x3b7   : > { %v3563_v45 = vpop.permute.xlu0 %3562 }
 0x3b8   : > { %v3574_v52 = vsel %vm3573_vm15, %v3572_v35, %v3563_v45 }
 0x3b9   : > { %3668 = vmatmul.mubr.f32.vlgmr.msra.gmra.mrb[64].mxu0 %v3574_v52 }
 0x48c   : > { %v3669_v25 = vpop.f32.mrb[64].mxu0 }
 0x48d   : > { %v3670_v59 = vadd.f32 %v3811_v61, %v3669_v25  ;;  %v3671_v32 = vpop.f32.mrb[65].mxu0 }
 0x48f   : > { %3673 = vst [vmem:[%s281_s27] sm:$0xff] %v3670_v59 }
 0x490 PF: > { %s17_s24 = sadd.s32 1, %s4460_s24  }
 0x491   : > { %p14_p5 = scmp.ge.s32.totalorder %s17_s24, 4  }
 0x493   :  { %16 = sbr.rel (!%p14_p5) target bundleno = 1 (0x1), region = 84 }

</bundles_post_ra>
